<compile_context>
chip_gen: v5e
topology: v5e:2x2
jax: 0.10.0
libtpu: 0.0.40
codegen_flags: <defaults>
</compile_context>

<pallas_src>
import numpy as np
import jax
import jax.numpy as jnp
from jax.experimental import pallas as pl
from jax.experimental.pallas import tpu as pltpu

POOL_SIZES = (1, 3, 5, 15)
PMAX = POOL_SIZES[-1]                 # finest pyramid grid (15x15); all pools divide it
NB_TOTAL = sum(p * p for p in POOL_SIZES)   # 1 + 9 + 25 + 225 = 260
BN_EPS = 1e-5


# ----------------------------------------------------------------------------
# Pallas kernel (one grid step = one group of B images)
# ----------------------------------------------------------------------------
def _pyramid_kernel(x_ref, s_ref, st_ref, wall_ref, ball_ref, mask_ref,
                    w4b_ref, w4a_ref, b4_ref, o_ref):
    bf16 = jnp.bfloat16
    x = x_ref[...]                                            # (B*C, HWp) bf16

    # 1) All pyramid pooling levels in one MXU pass.  Columns of s_ref are the
    #    concatenated [1x1 | 3x3 | 5x5 | 15x15] bins (0/1 sums; the average
    #    scale is folded into the branch weights).
    p_cat = jnp.dot(x, s_ref[...],
                    preferred_element_type=jnp.float32)      # (B*C, 260)

    # 2) Fused branch 1x1 convs + folded BN + ReLU.  wall is block-diagonal
    #    over images; the 0/1 mask zeroes every (branch-row, foreign-column)
    #    pair so the next matmul only sees each branch's own grid.
    h = jnp.dot(wall_ref[...], p_cat.astype(bf16),
                preferred_element_type=jnp.float32) + ball_ref[...]
    h = jnp.maximum(h, 0.0) * mask_ref[...]                   # (B*KB, 260)

    # 3) conv4's branch-half weight applied on the coarse grids (reassociated
    #    ahead of the upsample so no (M, C4, HW) intermediates exist).
    g = jnp.dot(w4b_ref[...], h.astype(bf16),
                preferred_element_type=jnp.float32)           # (B*Cout, 260)

    # 4)+5) conv4 on x and the fused nearest-upsample/combine of all branches,
    #    as two back-to-back accumulating matmuls (MRB in-place on v7x).
    acc = jnp.dot(w4a_ref[...], x, preferred_element_type=jnp.float32)
    acc = acc + jnp.dot(g.astype(bf16), st_ref[...],
                        preferred_element_type=jnp.float32)   # (B*Cout, HWp)

    # Folded BN4 bias + ReLU; lane-dense (multiple of 128) unmasked store.
    o_ref[...] = jnp.maximum(acc + b4_ref[...], 0.0)


def pyramid_pooling_forward(x_nchw, kp):
    N, C, H, W = x_nchw.shape
    B, HW, HWp, NB = kp["B"], kp["HW"], kp["HWp"], kp["NB"]
    Cout, KB = kp["Cout"], kp["KB"]
    assert H * W == HW and N % B == 0 and C == kp["C"]
    G = N // B

    x_flat = jnp.reshape(x_nchw, (N, C, HW)).astype(jnp.bfloat16)
    x_pad = jnp.pad(x_flat, ((0, 0), (0, 0), (0, HWp - HW)))
    x_grp = x_pad.reshape(G, B * C, HWp)

    whole = lambda n: (0, 0)

    out = pl.pallas_call(
        _pyramid_kernel,
        grid=(G,),
        in_specs=[
            pl.BlockSpec((None, B * C, HWp), lambda n: (n, 0, 0)),   # x (per group)
            pl.BlockSpec((HWp, NB), whole),                          # S_all  (pool)
            pl.BlockSpec((NB, HWp), whole),                          # S_all^T (upsample)
            pl.BlockSpec((B * KB, B * C), whole),                    # stacked branch weights
            pl.BlockSpec((B * KB, 1), whole),                        # stacked branch biases
            pl.BlockSpec((B * KB, NB), whole),                       # block-diagonal mask
            pl.BlockSpec((B * Cout, B * KB), whole),                 # conv4 on branches
            pl.BlockSpec((B * Cout, B * C), whole),                  # conv4 on x
            pl.BlockSpec((B * Cout, 1), whole),                      # folded conv4 bias
        ],
        out_specs=pl.BlockSpec((None, B * Cout, HWp), lambda n: (n, 0, 0)),
        out_shape=jax.ShapeDtypeStruct((G, B * Cout, HWp), jnp.float32),
        compiler_params=pltpu.CompilerParams(
            dimension_semantics=("parallel",)),
    )(x_grp, kp["S"], kp["ST"], kp["W_all"], kp["B_all"], kp["mask"],
      kp["W4_all"], kp["W4a"], kp["b4"])

    out = out.reshape(N, Cout, HWp)[:, :, :HW]
    return out.reshape(N, Cout, H, W)


# ----------------------------------------------------------------------------
# Host-side constant construction (0/1 pooling matrices, BN folding, batching)
# ----------------------------------------------------------------------------
def build_fine_bin_matrix(H, W, p=PMAX):
    """S[h*W+w, b] = 1 iff pixel (h, w) lies in 15x15 bin b (0/1, exact in bf16)."""
    bh, bw = H // p, W // p
    S = np.zeros((H * W, p * p), np.float32)
    rows = np.arange(H * W)
    h, w = rows // W, rows % W
    S[rows, (h // bh) * p + (w // bw)] = 1.0
    return S


def build_coarsen_matrix(p, pmax=PMAX):
    """D[b15, q] = 1 iff fine 15x15 bin b15 lies inside coarse p x p bin q."""
    r = pmax // p
    D = np.zeros((pmax * pmax, p * p), np.float32)
    idx = np.arange(pmax * pmax)
    i, j = idx // pmax, idx % pmax
    D[idx, (i // r) * p + (j // r)] = 1.0
    return D


def build_pool_matrix(H, W, pool_sizes=POOL_SIZES):
    """(HW, 260) 0/1: pixel -> concatenated [1x1 | 3x3 | 5x5 | 15x15] bins."""
    S = build_fine_bin_matrix(H, W)
    cols = [S if p == PMAX else S @ build_coarsen_matrix(p) for p in pool_sizes]
    return np.concatenate(cols, axis=1)


def build_branch_mask(C4, pool_sizes=POOL_SIZES):
    """0/1 block-diagonal mask pairing branch k's rows with its own columns."""
    M = np.zeros((len(pool_sizes) * C4, NB_TOTAL), np.float32)
    off = 0
    for k, p in enumerate(pool_sizes):
        nb = p * p
        M[k * C4:(k + 1) * C4, off:off + nb] = 1.0
        off += nb
    return M


def choose_batch_group(N, max_group=8):
    """Images per grid step: fill the MXU M axis but keep >=2 parallel steps."""
    if N <= 1:
        return 1
    g = min(max_group, N)
    if N // g < 2:
        g = max(1, N // 2)
    while N % g:
        g -= 1
    return g


def init_raw_params(key, C, Cout):
    C4 = C // 4
    keys = iter(jax.random.split(key, 25))
    raw = {"w_branch": [], "bn_branch": []}
    for _ in POOL_SIZES:
        w = np.asarray(jax.random.normal(next(keys), (C4, C), jnp.float32)) / np.sqrt(C)
        g = np.asarray(0.5 + jax.random.uniform(next(keys), (C4,), jnp.float32))
        b = np.asarray(0.1 * jax.random.normal(next(keys), (C4,), jnp.float32))
        m = np.asarray(0.1 * jax.random.normal(next(keys), (C4,), jnp.float32))
        v = np.asarray(0.5 + jax.random.uniform(next(keys), (C4,), jnp.float32))
        raw["w_branch"].append(w)
        raw["bn_branch"].append((g, b, m, v))
    w4 = np.asarray(jax.random.normal(next(keys), (Cout, 2 * C), jnp.float32)) / np.sqrt(2 * C)
    g4 = np.asarray(0.5 + jax.random.uniform(next(keys), (Cout,), jnp.float32))
    b4 = np.asarray(0.1 * jax.random.normal(next(keys), (Cout,), jnp.float32))
    m4 = np.asarray(0.1 * jax.random.normal(next(keys), (Cout,), jnp.float32))
    v4 = np.asarray(0.5 + jax.random.uniform(next(keys), (Cout,), jnp.float32))
    raw["w4_torch"] = w4
    raw["bn4"] = (g4, b4, m4, v4)
    return raw


def build_kernel_params(raw, C, Cout, H, W, B):
    C4 = C // 4
    KB = 4 * C4
    HW = H * W
    HWp = ((HW + 127) // 128) * 128

    # Fold eval-mode BN + adaptive-avg-pool scale into the branch 1x1 convs.
    wb, bb = [], []
    for k, p in enumerate(POOL_SIZES):
        w = raw["w_branch"][k]
        g, b, m, v = raw["bn_branch"][k]
        s = g / np.sqrt(v + BN_EPS)
        area = (H // p) * (W // p)
        wb.append((w * s[:, None]) / area)
        bb.append((b - m * s)[:, None])
    W_all = np.concatenate(wb, axis=0)                       # (KB, C)
    B_all = np.concatenate(bb, axis=0)                       # (KB, 1)

    g4, b4, m4, v4 = raw["bn4"]
    s4 = g4 / np.sqrt(v4 + BN_EPS)
    w4s = raw["w4_torch"] * s4[:, None]                      # (Cout, 2C) BN4-folded
    w4a = w4s[:, :C]                                         # conv4 applied to x
    W4_all = w4s[:, C:]                                      # conv4 applied to branches
    b4f = (b4 - m4 * s4)[:, None]                            # (Cout, 1)

    S_pool = build_pool_matrix(H, W)                         # (HW, 260) 0/1
    S_pad = np.zeros((HWp, NB_TOTAL), np.float32)
    S_pad[:HW] = S_pool
    mask = build_branch_mask(C4)                             # (KB, 260)

    eye = np.eye(B, dtype=np.float32)                        # block-diag over images
    return dict(
        B=B, HW=HW, HWp=HWp, NB=NB_TOTAL, C=C, Cout=Cout, KB=KB,
        S=jnp.asarray(S_pad, jnp.bfloat16),                        # (HWp, 260)
        ST=jnp.asarray(S_pad.T, jnp.bfloat16),                     # (260, HWp) pre-transposed
        W_all=jnp.asarray(np.kron(eye, W_all), jnp.bfloat16),      # (B*KB, B*C)
        B_all=jnp.asarray(np.tile(B_all, (B, 1)), jnp.float32),    # (B*KB, 1)
        mask=jnp.asarray(np.tile(mask, (B, 1)), jnp.float32),      # (B*KB, 260)
        W4_all=jnp.asarray(np.kron(eye, W4_all), jnp.bfloat16),    # (B*Cout, B*KB)
        W4a=jnp.asarray(np.kron(eye, w4a), jnp.bfloat16),          # (B*Cout, B*C)
        b4=jnp.asarray(np.tile(b4f, (B, 1)), jnp.float32),         # (B*Cout, 1)
    )


# ----------------------------------------------------------------------------
# Pure numpy reference (mirrors the PyTorch module, eval-mode BN)
# ----------------------------------------------------------------------------
def reference_forward(x, raw, pool_sizes=POOL_SIZES):
    N, C, H, W = x.shape

    def bn_relu(y, bn):
        g, b, m, v = (a.astype(np.float64) for a in bn)
        y = (y - m[None, :, None, None]) / np.sqrt(v[None, :, None, None] + BN_EPS)
        y = y * g[None, :, None, None] + b[None, :, None, None]
        return np.maximum(y, 0.0)

    feats = [x]
    for k, p in enumerate(pool_sizes):
        bh, bw = H // p, W // p
        pooled = x.reshape(N, C, p, bh, p, bw).mean(axis=(3, 5))     # adaptive avg pool
        y = np.einsum("oc,ncij->noij", raw["w_branch"][k].astype(np.float64), pooled)
        y = bn_relu(y, raw["bn_branch"][k])
        y = np.repeat(np.repeat(y, bh, axis=2), bw, axis=3)          # nearest upsample
        feats.append(y)
    cat = np.concatenate(feats, axis=1)                              # (N, 2C, H, W)
    y = np.einsum("oc,ncij->noij", raw["w4_torch"].astype(np.float64), cat)
    return bn_relu(y, raw["bn4"])


# ----------------------------------------------------------------------------
if __name__ == "__main__":
    # H, W fixed at (30, 45) by the module's hard-coded upsample targets.
    N, C, H, W = 4, 16, 30, 45
    Cout = 16

    key = jax.random.PRNGKey(0)
    kx, kparam = jax.random.split(key)
    x = jax.random.normal(kx, (N, C, H, W), dtype=jnp.float32)

    raw = init_raw_params(kparam, C, Cout)
    B = choose_batch_group(N)                 # N=4 -> B=2 images per grid step
    kp = build_kernel_params(raw, C, Cout, H, W, B)

    out = pyramid_pooling_forward(x, kp)
    out = jax.block_until_ready(out)

    ref = reference_forward(np.asarray(x, np.float64), raw)
    # bf16 inputs/weights with f32 accumulation stay well inside this tolerance.
    np.testing.assert_allclose(np.asarray(out), ref, rtol=2e-2, atol=2e-2)

    print("KERNEL_OK")
</pallas_src>

<mosaic_0001>
module attributes {stable_mosaic.version = 11 : i64} {
  func.func @_pyramid_kernel(%arg0: i32, %arg1: memref<1x32x1408xbf16, #tpu.memory_space<vmem>>, %arg2: memref<1408x260xbf16, #tpu.memory_space<vmem>>, %arg3: memref<260x1408xbf16, #tpu.memory_space<vmem>>, %arg4: memref<32x32xbf16, #tpu.memory_space<vmem>>, %arg5: memref<32x1xf32, #tpu.memory_space<vmem>>, %arg6: memref<32x260xf32, #tpu.memory_space<vmem>>, %arg7: memref<32x32xbf16, #tpu.memory_space<vmem>>, %arg8: memref<32x32xbf16, #tpu.memory_space<vmem>>, %arg9: memref<32x1xf32, #tpu.memory_space<vmem>>, %arg10: memref<1x32x1408xf32, #tpu.memory_space<vmem>>) attributes {dimension_semantics = [#tpu.dimension_semantics<parallel>], iteration_bounds = array<i64: 2>, scalar_prefetch = 0 : i64, scratch_operands = 0 : i64, tpu.core_type = #tpu.core_type<tc>, window_params = [{transform_indices = @transform_0, window_bounds = array<i64: 1, 32, 1408>}, {pipeline_mode = #tpu.pipeline_mode<synchronous>, transform_indices = @transform_1, window_bounds = array<i64: 1408, 260>}, {pipeline_mode = #tpu.pipeline_mode<synchronous>, transform_indices = @transform_2, window_bounds = array<i64: 260, 1408>}, {pipeline_mode = #tpu.pipeline_mode<synchronous>, transform_indices = @transform_3, window_bounds = array<i64: 32, 32>}, {pipeline_mode = #tpu.pipeline_mode<synchronous>, transform_indices = @transform_4, window_bounds = array<i64: 32, 1>}, {pipeline_mode = #tpu.pipeline_mode<synchronous>, transform_indices = @transform_5, window_bounds = array<i64: 32, 260>}, {pipeline_mode = #tpu.pipeline_mode<synchronous>, transform_indices = @transform_6, window_bounds = array<i64: 32, 32>}, {pipeline_mode = #tpu.pipeline_mode<synchronous>, transform_indices = @transform_7, window_bounds = array<i64: 32, 32>}, {pipeline_mode = #tpu.pipeline_mode<synchronous>, transform_indices = @transform_8, window_bounds = array<i64: 32, 1>}, {transform_indices = @transform_9, window_bounds = array<i64: 1, 32, 1408>}]} {
    %c0 = arith.constant 0 : index
    %c0_0 = arith.constant 0 : index
    %c0_1 = arith.constant 0 : index
    %0 = vector.load %arg1[%c0, %c0_0, %c0_1] : memref<1x32x1408xbf16, #tpu.memory_space<vmem>>, vector<1x32x1408xbf16>
    %1 = vector.shape_cast %0 : vector<1x32x1408xbf16> to vector<32x1408xbf16>
    %c0_2 = arith.constant 0 : index
    %c0_3 = arith.constant 0 : index
    %2 = vector.load %arg2[%c0_2, %c0_3] : memref<1408x260xbf16, #tpu.memory_space<vmem>>, vector<1408x260xbf16>
    %cst = arith.constant dense<0.000000e+00> : vector<32x260xf32>
    %3 = tpu.matmul %1, %2, %cst {dimension_numbers = #tpu.dot_dimension_numbers<[1], [0], [0], [1], [0, 0, 1, 1], [], []>} : vector<32x1408xbf16>, vector<1408x260xbf16>, vector<32x260xf32> -> vector<32x260xf32>
    %c0_4 = arith.constant 0 : index
    %c0_5 = arith.constant 0 : index
    %4 = vector.load %arg4[%c0_4, %c0_5] : memref<32x32xbf16, #tpu.memory_space<vmem>>, vector<32x32xbf16>
    %5 = arith.truncf %3 : vector<32x260xf32> to vector<32x260xbf16>
    %cst_6 = arith.constant dense<0.000000e+00> : vector<32x260xf32>
    %6 = tpu.matmul %4, %5, %cst_6 {dimension_numbers = #tpu.dot_dimension_numbers<[1], [0], [0], [1], [0, 0, 1, 1], [], []>} : vector<32x32xbf16>, vector<32x260xbf16>, vector<32x260xf32> -> vector<32x260xf32>
    %c0_7 = arith.constant 0 : index
    %c0_8 = arith.constant 0 : index
    %7 = vector.load %arg5[%c0_7, %c0_8] : memref<32x1xf32, #tpu.memory_space<vmem>>, vector<32x1xf32>
    %8 = vector.broadcast %7 : vector<32x1xf32> to vector<32x260xf32>
    %9 = arith.addf %6, %8 : vector<32x260xf32>
    %cst_9 = arith.constant 0.000000e+00 : f32
    %10 = vector.broadcast %cst_9 : f32 to vector<32x260xf32>
    %11 = arith.maximumf %9, %10 : vector<32x260xf32>
    %c0_10 = arith.constant 0 : index
    %c0_11 = arith.constant 0 : index
    %12 = vector.load %arg6[%c0_10, %c0_11] : memref<32x260xf32, #tpu.memory_space<vmem>>, vector<32x260xf32>
    %13 = arith.mulf %11, %12 : vector<32x260xf32>
    %c0_12 = arith.constant 0 : index
    %c0_13 = arith.constant 0 : index
    %14 = vector.load %arg7[%c0_12, %c0_13] : memref<32x32xbf16, #tpu.memory_space<vmem>>, vector<32x32xbf16>
    %15 = arith.truncf %13 : vector<32x260xf32> to vector<32x260xbf16>
    %cst_14 = arith.constant dense<0.000000e+00> : vector<32x260xf32>
    %16 = tpu.matmul %14, %15, %cst_14 {dimension_numbers = #tpu.dot_dimension_numbers<[1], [0], [0], [1], [0, 0, 1, 1], [], []>} : vector<32x32xbf16>, vector<32x260xbf16>, vector<32x260xf32> -> vector<32x260xf32>
    %c0_15 = arith.constant 0 : index
    %c0_16 = arith.constant 0 : index
    %17 = vector.load %arg8[%c0_15, %c0_16] : memref<32x32xbf16, #tpu.memory_space<vmem>>, vector<32x32xbf16>
    %cst_17 = arith.constant dense<0.000000e+00> : vector<32x1408xf32>
    %18 = tpu.matmul %17, %1, %cst_17 {dimension_numbers = #tpu.dot_dimension_numbers<[1], [0], [0], [1], [0, 0, 1, 1], [], []>} : vector<32x32xbf16>, vector<32x1408xbf16>, vector<32x1408xf32> -> vector<32x1408xf32>
    %19 = arith.truncf %16 : vector<32x260xf32> to vector<32x260xbf16>
    %c0_18 = arith.constant 0 : index
    %c0_19 = arith.constant 0 : index
    %20 = vector.load %arg3[%c0_18, %c0_19] : memref<260x1408xbf16, #tpu.memory_space<vmem>>, vector<260x1408xbf16>
    %cst_20 = arith.constant dense<0.000000e+00> : vector<32x1408xf32>
    %21 = tpu.matmul %19, %20, %cst_20 {dimension_numbers = #tpu.dot_dimension_numbers<[1], [0], [0], [1], [0, 0, 1, 1], [], []>} : vector<32x260xbf16>, vector<260x1408xbf16>, vector<32x1408xf32> -> vector<32x1408xf32>
    %22 = arith.addf %18, %21 : vector<32x1408xf32>
    %c0_21 = arith.constant 0 : index
    %c0_22 = arith.constant 0 : index
    %23 = vector.load %arg9[%c0_21, %c0_22] : memref<32x1xf32, #tpu.memory_space<vmem>>, vector<32x1xf32>
    %24 = vector.broadcast %23 : vector<32x1xf32> to vector<32x1408xf32>
    %25 = arith.addf %22, %24 : vector<32x1408xf32>
    %cst_23 = arith.constant 0.000000e+00 : f32
    %26 = vector.broadcast %cst_23 : f32 to vector<32x1408xf32>
    %27 = arith.maximumf %25, %26 : vector<32x1408xf32>
    %c0_24 = arith.constant 0 : index
    %c0_25 = arith.constant 0 : index
    %c0_26 = arith.constant 0 : index
    %28 = vector.load %arg10[%c0_24, %c0_25, %c0_26] : memref<1x32x1408xf32, #tpu.memory_space<vmem>>, vector<1x32x1408xf32>
    %29 = vector.shape_cast %28 : vector<1x32x1408xf32> to vector<32x1408xf32>
    %30 = vector.shape_cast %27 : vector<32x1408xf32> to vector<1x32x1408xf32>
    tpu.vector_store %arg10[%c0_24, %c0_25, %c0_26], %30 {strides = array<i32>} : memref<1x32x1408xf32, #tpu.memory_space<vmem>>, vector<1x32x1408xf32>,
    return
  }
  func.func @transform_0(%arg0: i32) -> (i32, i32, i32) {
    %c0_i32 = arith.constant 0 : i32
    %c0_i32_0 = arith.constant 0 : i32
    %c0_i32_1 = arith.constant 0 : i32
    return %arg0, %c0_i32, %c0_i32_0 : i32, i32, i32
  }
  func.func @transform_1(%arg0: i32) -> (i32, i32) {
    %c0_i32 = arith.constant 0 : i32
    %c0_i32_0 = arith.constant 0 : i32
    %c0_i32_1 = arith.constant 0 : i32
    return %c0_i32, %c0_i32_0 : i32, i32
  }
  func.func @transform_2(%arg0: i32) -> (i32, i32) {
    %c0_i32 = arith.constant 0 : i32
    %c0_i32_0 = arith.constant 0 : i32
    %c0_i32_1 = arith.constant 0 : i32
    return %c0_i32, %c0_i32_0 : i32, i32
  }
  func.func @transform_3(%arg0: i32) -> (i32, i32) {
    %c0_i32 = arith.constant 0 : i32
    %c0_i32_0 = arith.constant 0 : i32
    %c0_i32_1 = arith.constant 0 : i32
    return %c0_i32, %c0_i32_0 : i32, i32
  }
  func.func @transform_4(%arg0: i32) -> (i32, i32) {
    %c0_i32 = arith.constant 0 : i32
    %c0_i32_0 = arith.constant 0 : i32
    %c0_i32_1 = arith.constant 0 : i32
    return %c0_i32, %c0_i32_0 : i32, i32
  }
  func.func @transform_5(%arg0: i32) -> (i32, i32) {
    %c0_i32 = arith.constant 0 : i32
    %c0_i32_0 = arith.constant 0 : i32
    %c0_i32_1 = arith.constant 0 : i32
    return %c0_i32, %c0_i32_0 : i32, i32
  }
  func.func @transform_6(%arg0: i32) -> (i32, i32) {
    %c0_i32 = arith.constant 0 : i32
    %c0_i32_0 = arith.constant 0 : i32
    %c0_i32_1 = arith.constant 0 : i32
    return %c0_i32, %c0_i32_0 : i32, i32
  }
  func.func @transform_7(%arg0: i32) -> (i32, i32) {
    %c0_i32 = arith.constant 0 : i32
    %c0_i32_0 = arith.constant 0 : i32
    %c0_i32_1 = arith.constant 0 : i32
    return %c0_i32, %c0_i32_0 : i32, i32
  }
  func.func @transform_8(%arg0: i32) -> (i32, i32) {
    %c0_i32 = arith.constant 0 : i32
    %c0_i32_0 = arith.constant 0 : i32
    %c0_i32_1 = arith.constant 0 : i32
    return %c0_i32, %c0_i32_0 : i32, i32
  }
  func.func @transform_9(%arg0: i32) -> (i32, i32, i32) {
    %c0_i32 = arith.constant 0 : i32
    %c0_i32_0 = arith.constant 0 : i32
    %c0_i32_1 = arith.constant 0 : i32
    return %arg0, %c0_i32, %c0_i32_0 : i32, i32, i32
  }
}

</mosaic_0001>

<bundles_post_ra>
// kernel: tpu_custom_call.1
= control target key start
LH: loop header
LB: loop body
LE: loop exit
PB: predicated region body
PF: predicated region fallthrough
CT: control target
= control target key end

     0   :  { %s11586_s0 = inlined_call_operand.vmem [shape: bf16[2,32,1408], index: 0, kind: input, shape index: {}]   ;;  %s11587_s1 = inlined_call_operand.vmem [shape: bf16[1408,260], index: 1, kind: input, shape index: {}]   ;;  %s11588_s2 = inlined_call_operand.vmem [shape: bf16[260,1408], index: 2, kind: input, shape index: {}]   ;;  %s11589_s3 = inlined_call_operand.vmem [shape: bf16[32,32], index: 3, kind: input, shape index: {}]   ;;  %s11590_s4 = inlined_call_operand.vmem [shape: f32[32,1], index: 4, kind: input, shape index: {}]   ;;  %s11591_s5 = inlined_call_operand.vmem [shape: f32[32,260], index: 5, kind: input, shape index: {}]   ;;  %s11592_s6 = inlined_call_operand.vmem [shape: bf16[32,32], index: 6, kind: input, shape index: {}]   ;;  %s11593_s7 = inlined_call_operand.vmem [shape: bf16[32,32], index: 7, kind: input, shape index: {}]   ;;  %s11594_s8 = inlined_call_operand.vmem [shape: f32[32,1], index: 8, kind: input, shape index: {}]   ;;  %s11595_s9 = inlined_call_operand.hbm [shape: f32[2,32,1408], index: 9, kind: output, shape index: {}]  }
   0x1   :  { %11609 = sst [smem:[#allocation15_spill]] %s11586_s0 }
   0x2   :  { %14 = vsyncpa [#allocation3], 0 }
   0x3   :  { %16 = vsyncpa [#allocation3 + $0x1], 0  ;;  %s7918_s30 = smov 0   ;;  %s7920_s10 = smov 0  }
   0x4   :  { %s7922_s11 = smov 0   ;;  %s7924_s12 = smov 0  }
   0x5 LB: > { %s7939_s13 = sadd.s32 4294967295, %s7863_s12   ;;  %s5341_s14 = sadd.s32 4294967294, %s7863_s12   ;;  %s7863_s12 = sphi %s7924_s12, %s11646_s12   ;;  %s7859_s11 = sphi %s7922_s11, %s11645_s11   ;;  %s7855_s10 = sphi %s7920_s10, %s11644_s10   ;;  %s7851_s30 = sphi %s7918_s30, %s11643_s30  }
   0x6   : > { %s7943_s15 = sadd.s32 1, %s7863_s12   ;;  %s223_s16 = sadd.s32 1, %s7859_s11 }
   0x7   : > { %s220_s17 = ssub.s32 %s7863_s12, %s7943_s15  ;;  %p233_p0 = scmp.ne.s32.totalorder %s7859_s11, %s7855_s10 }
   0x8   : > { %p221_p1 = scmp.eq.s32.totalorder %s220_s17, 0  ;;  %p234_p2 = scmp.eq.s32.totalorder %s7939_s13, 1 }
   0x9   : > { %p239_p3 = scmp.ne.s32.totalorder %s7855_s10, %s7851_s30  ;;  %p240_p4 = scmp.eq.s32.totalorder %s5341_s14, 1 }
   0xa   : > { %s7954_s18 = scalar_select %p221_p1, %s7859_s11, %s223_s16  }
   0xb   : > { %p7956_p5 = por %p234_p2, %p233_p0  ;;  %p7960_p6 = por %p240_p4, %p239_p3 }
   0xc   : > { %p5344_p7 = scmp.ge.s32.totalorder %s7863_s12, 1  ;;  %p290_p8 = scmp.lt.s32.totalorder %s7863_s12, 3 }
   0xe   : > { %p291_p9 = pnand %p5344_p7, %p290_p8 }
  0x10   : > { %294 = sbr.rel (%p291_p9) target bundleno = 1257 (0x4e9), region = 56 }
  0x15   : > { %v5520_v0 = vld [vmem:[%s11587_s1 + $0xa8] sm:$0xf]  ;;  %v7321_v1 = vld [vmem:[%s11587_s1 + $0xb0] sm:$0xf0]  ;;  %v5508_v11 = vld [vmem:[%s11587_s1 + $0x90] sm:$0xf] }
  0x16   : > { %v5712_v2 = vld [vmem:[%s11587_s1 + $0x228] sm:$0xf]  ;;  %v5521_v3 = vor.u32 %v7321_v1, %v5520_v0  ;;  %v7369_v4 = vld [vmem:[%s11587_s1 + $0x230] sm:$0xf0]  ;;  %v7318_v13 = vld [vmem:[%s11587_s1 + $0x98] sm:$0xf0] }
  0x17   : > { %v5808_v5 = vld [vmem:[%s11587_s1 + $0x2e8] sm:$0xf]  ;;  %v7393_v6 = vld [vmem:[%s11587_s1 + $0x2f0] sm:$0xf0]  ;;  %v5713_v7 = vor.u32 %v7369_v4, %v5712_v2  ;;  %v5700_v14 = vld [vmem:[%s11587_s1 + $0x210] sm:$0xf]  ;;  %v5509_v16 = vor.u32 %v7318_v13, %v5508_v11 }
  0x18   : > { %v5809_v8 = vor.u32 %v7393_v6, %v5808_v5  ;;  %v5616_v9 = vld [vmem:[%s11587_s1 + $0x168] sm:$0xf]  ;;  %v7345_v10 = vld [vmem:[%s11587_s1 + $0x170] sm:$0xf0]  ;;  %2228 = vmatpush.bf16.msra.mxu0 %v5521_v3  ;;  %v7366_v15 = vld [vmem:[%s11587_s1 + $0x218] sm:$0xf0] }
  0x19   : > { %v5617_v12 = vor.u32 %v7345_v10, %v5616_v9  ;;  %2266 = vmatpush.bf16.msra.mxu2 %v5713_v7  ;;  %v5701_v17 = vor.u32 %v7366_v15, %v5700_v14  ;;  %v5796_v18 = vld [vmem:[%s11587_s1 + $0x2d0] sm:$0xf]  ;;  %v7390_v19 = vld [vmem:[%s11587_s1 + $0x2d8] sm:$0xf0]  ;;  %v5496_v23 = vld [vmem:[%s11587_s1 + $0x78] sm:$0xf] }
  0x1a   : > { %2285 = vmatpush.bf16.msra.mxu3 %v5809_v8  ;;  %v5604_v20 = vld [vmem:[%s11587_s1 + $0x150] sm:$0xf]  ;;  %v5797_v21 = vor.u32 %v7390_v19, %v5796_v18  ;;  %v7342_v22 = vld [vmem:[%s11587_s1 + $0x158] sm:$0xf0]  ;;  %v7315_v24 = vld [vmem:[%s11587_s1 + $0x80] sm:$0xf0] }
  0x1b   : > { %2247 = vmatpush.bf16.msra.mxu1 %v5617_v12  ;;  %v5605_v25 = vor.u32 %v7342_v22, %v5604_v20  ;;  %v5688_v26 = vld [vmem:[%s11587_s1 + $0x1f8] sm:$0xf]  ;;  %v7363_v27 = vld [vmem:[%s11587_s1 + $0x200] sm:$0xf0]  ;;  %v5497_v29 = vor.u32 %v7315_v24, %v5496_v23  ;;  %v5484_v35 = vld [vmem:[%s11587_s1 + $0x60] sm:$0xf] }
  0x1c   : > { %v5784_v28 = vld [vmem:[%s11587_s1 + $0x2b8] sm:$0xf]  ;;  %2229 = vmatpush.bf16.msra.mxu0 %v5509_v16  ;;  %v7387_v30 = vld [vmem:[%s11587_s1 + $0x2c0] sm:$0xf0]  ;;  %v5689_v33 = vor.u32 %v7363_v27, %v5688_v26  ;;  %v7312_v36 = vld [vmem:[%s11587_s1 + $0x68] sm:$0xf0] }
  0x1d   : > { %v5592_v31 = vld [vmem:[%s11587_s1 + $0x138] sm:$0xf]  ;;  %v7339_v32 = vld [vmem:[%s11587_s1 + $0x140] sm:$0xf0]  ;;  %2267 = vmatpush.bf16.msra.mxu2 %v5701_v17  ;;  %v5785_v34 = vor.u32 %v7387_v30, %v5784_v28  ;;  %v5676_v37 = vld [vmem:[%s11587_s1 + $0x1e0] sm:$0xf]  ;;  %v5485_v44 = vor.u32 %v7312_v36, %v5484_v35 }
  0x1e   : > { %2286 = vmatpush.bf16.msra.mxu3 %v5797_v21  ;;  %v5593_v38 = vor.u32 %v7339_v32, %v5592_v31  ;;  %v7360_v39 = vld [vmem:[%s11587_s1 + $0x1e8] sm:$0xf0]  ;;  %v5772_v40 = vld [vmem:[%s11587_s1 + $0x2a0] sm:$0xf]  ;;  %v5472_v47 = vld [vmem:[%s11587_s1 + $0x48] sm:$0xf] }
  0x1f   : > { %2248 = vmatpush.bf16.msra.mxu1 %v5605_v25  ;;  %v7384_v41 = vld [vmem:[%s11587_s1 + $0x2a8] sm:$0xf0]  ;;  %v5580_v42 = vld [vmem:[%s11587_s1 + $0x120] sm:$0xf]  ;;  %v5677_v45 = vor.u32 %v7360_v39, %v5676_v37  ;;  %v7309_v48 = vld [vmem:[%s11587_s1 + $0x50] sm:$0xf0] }
  0x20   : > { %v7336_v43 = vld [vmem:[%s11587_s1 + $0x128] sm:$0xf0]  ;;  %2230 = vmatpush.bf16.msra.mxu0 %v5497_v29  ;;  %v5773_v46 = vor.u32 %v7384_v41, %v5772_v40  ;;  %v5664_v49 = vld [vmem:[%s11587_s1 + $0x1c8] sm:$0xf]  ;;  %v7357_v51 = vld [vmem:[%s11587_s1 + $0x1d0] sm:$0xf0]  ;;  %v5473_v56 = vor.u32 %v7309_v48, %v5472_v47 }
  0x21   : > { %2268 = vmatpush.bf16.msra.mxu2 %v5689_v33  ;;  %v5581_v50 = vor.u32 %v7336_v43, %v5580_v42  ;;  %v5760_v52 = vld [vmem:[%s11587_s1 + $0x288] sm:$0xf]  ;;  %v7381_v53 = vld [vmem:[%s11587_s1 + $0x290] sm:$0xf0]  ;;  %v5665_v57 = vor.u32 %v7357_v51, %v5664_v49  ;;  %v5460_v59 = vld [vmem:[%s11587_s1 + $0x30] sm:$0xf] }
  0x22   : > { %2287 = vmatpush.bf16.msra.mxu3 %v5785_v34  ;;  %v5568_v54 = vld [vmem:[%s11587_s1 + $0x108] sm:$0xf]  ;;  %v7333_v55 = vld [vmem:[%s11587_s1 + $0x110] sm:$0xf0]  ;;  %v5761_v58 = vor.u32 %v7381_v53, %v5760_v52  ;;  %v7306_v60 = vld [vmem:[%s11587_s1 + $0x38] sm:$0xf0] }
  0x23   : > { %2249 = vmatpush.bf16.msra.mxu1 %v5593_v38  ;;  %v5652_v61 = vld [vmem:[%s11587_s1 + $0x1b0] sm:$0xf]  ;;  %v5569_v62 = vor.u32 %v7333_v55, %v5568_v54  ;;  %v7354_v63 = vld [vmem:[%s11587_s1 + $0x1b8] sm:$0xf0]  ;;  %v5461_v4 = vor.u32 %v7306_v60, %v5460_v59  ;;  %v5448_v5 = vld [vmem:[%s11587_s1 + $0x18] sm:$0xf] }
  0x24   : > { %2231 = vmatpush.bf16.msra.mxu0 %v5485_v44  ;;  %v5748_v0 = vld [vmem:[%s11587_s1 + $0x270] sm:$0xf]  ;;  %v7378_v1 = vld [vmem:[%s11587_s1 + $0x278] sm:$0xf0]  ;;  %v5653_v6 = vor.u32 %v7354_v63, %v5652_v61  ;;  %v7303_v8 = vld [vmem:[%s11587_s1 + $0x20] sm:$0xf0] }
  0x25   : > { %2269 = vmatpush.bf16.msra.mxu2 %v5677_v45  ;;  %v5556_v2 = vld [vmem:[%s11587_s1 + $0xf0] sm:$0xf]  ;;  %v7330_v3 = vld [vmem:[%s11587_s1 + $0xf8] sm:$0xf0]  ;;  %v5749_v7 = vor.u32 %v7378_v1, %v5748_v0  ;;  %v5640_v9 = vld [vmem:[%s11587_s1 + $0x198] sm:$0xf]  ;;  %v5449_v17 = vor.u32 %v7303_v8, %v5448_v5 }
  0x26   : > { %2288 = vmatpush.bf16.msra.mxu3 %v5773_v46  ;;  %v7351_v10 = vld [vmem:[%s11587_s1 + $0x1a0] sm:$0xf0]  ;;  %v5557_v11 = vor.u32 %v7330_v3, %v5556_v2  ;;  %v5736_v12 = vld [vmem:[%s11587_s1 + $0x258] sm:$0xf]  ;;  %p326_p10 = scmp.lt.s32.totalorder %s7939_s13, 1  ;;  %s11612_s0 = sld [smem:[#allocation15_spill]] }
  0x27   : > { %2250 = vmatpush.bf16.msra.mxu1 %v5581_v50  ;;  %v7375_v13 = vld [vmem:[%s11587_s1 + $0x260] sm:$0xf0]  ;;  %v5544_v14 = vld [vmem:[%s11587_s1 + $0xd8] sm:$0xf]  ;;  %v5436_v16 = vld [vmem:[%s11587_s1] sm:$0xf]  ;;  %v5641_v20 = vor.u32 %v7351_v10, %v5640_v9 }
  0x28   : > { %2232 = vmatpush.bf16.msra.mxu0 %v5473_v56  ;;  %v7327_v15 = vld [vmem:[%s11587_s1 + $0xe0] sm:$0xf0]  ;;  %v7300_v18 = vld [vmem:[%s11587_s1 + $0x8] sm:$0xf0]  ;;  %v5628_v19 = vld [vmem:[%s11587_s1 + $0x180] sm:$0xf]  ;;  %v5737_v21 = vor.u32 %v7375_v13, %v5736_v12 }
  0x29   : > { %2270 = vmatpush.bf16.msra.mxu2 %v5665_v57  ;;  %s327_s16 = scalar_select %p326_p10, %s7939_s13, 1  ;;  %v7348_v22 = vld [vmem:[%s11587_s1 + $0x188] sm:$0xf0]  ;;  %v5724_v23 = vld [vmem:[%s11587_s1 + $0x240] sm:$0xf]  ;;  %v5545_v25 = vor.u32 %v7327_v15, %v5544_v14  ;;  %v5437_v31 = vor.u32 %v7300_v18, %v5436_v16  ;;  %vm2899_vm0 = vcmask 261120  }
  0x2a   : > { %2289 = vmatpush.bf16.msra.mxu3 %v5761_v58  ;;  %v7372_v24 = vld [vmem:[%s11587_s1 + $0x248] sm:$0xf0]  ;;  %v5532_v26 = vld [vmem:[%s11587_s1 + $0xc0] sm:$0xf]  ;;  %v5904_v28 = vld [vmem:[%s11587_s1 + $0x3a8] sm:$0xf]  ;;  %v5629_v35 = vor.u32 %v7348_v22, %v5628_v19 }
  0x2b   : > { %2251 = vmatpush.bf16.msra.mxu1 %v5569_v62  ;;  %v7324_v27 = vld [vmem:[%s11587_s1 + $0xc8] sm:$0xf0]  ;;  %s7754_s14 = smul.u32 176, %s327_s16  ;;  %v7417_v29 = vld [vmem:[%s11587_s1 + $0x3b0] sm:$0xf0]  ;;  %v5725_v36 = vor.u32 %v7372_v24, %v5724_v23  ;;  %vm4221_vm1 = vcmask 1041408  }
  0x2c   : > { %2233 = vmatpush.bf16.msra.mxu0 %v5461_v4  ;;  %v6096_v30 = vld [vmem:[%s11587_s1 + $0x528] sm:$0xf]  ;;  %v7465_v32 = vld [vmem:[%s11587_s1 + $0x530] sm:$0xf0]  ;;  %v5892_v42 = vld [vmem:[%s11587_s1 + $0x390] sm:$0xf]  ;;  %v5533_v43 = vor.u32 %v7324_v27, %v5532_v26  ;;  %v5905_v47 = vor.u32 %v7417_v29, %v5904_v28 }
  0x2d   : > { %2271 = vmatpush.bf16.msra.mxu2 %v5653_v6  ;;  %s8172_s28 = scalar_lea.vmem %s11612_s0, %s7754_s14  ;;  %v6192_v33 = vld [vmem:[%s11587_s1 + $0x5e8] sm:$0xf]  ;;  %v7489_v34 = vld [vmem:[%s11587_s1 + $0x5f0] sm:$0xf0]  ;;  %v6097_v49 = vor.u32 %v7465_v32, %v6096_v30  ;;  %v7414_v52 = vld [vmem:[%s11587_s1 + $0x398] sm:$0xf0] }
  0x2e   : > { %2290 = vmatpush.bf16.msra.mxu3 %v5749_v7  ;;  %v5348_v37 = vld [vmem:[%s8172_s28] sm:$0xf]  ;;  %v7282_v38 = vld [vmem:[%s8172_s28 + $0x28] sm:$0xf0]  ;;  %v5356_v39 = vld [vmem:[%s8172_s28 + $0x8] sm:$0xf]  ;;  %v6193_v57 = vor.u32 %v7489_v34, %v6192_v33  ;;  %v5893_v60 = vor.u32 %v7414_v52, %v5892_v42 }
  0x2f   : > { %2252 = vmatpush.bf16.msra.mxu1 %v5557_v11  ;;  %v6000_v40 = vld [vmem:[%s11587_s1 + $0x468] sm:$0xf]  ;;  %v7441_v41 = vld [vmem:[%s11587_s1 + $0x470] sm:$0xf0]  ;;  %v7278_v45 = vld [vmem:[%s8172_s28 + $0xc] sm:$0xf]  ;;  %v8198_v48 = vor.u32 %v7282_v38, %v5348_v37 }
  0x30   : > { %2234 = vmatpush.bf16.msra.mxu0 %v5449_v17  ;;  %v7283_v44 = vld [vmem:[%s8172_s28 + $0x30] sm:$0xf0]  ;;  %v5358_v46 = vld [vmem:[%s8172_s28 + $0x34] sm:$0xf0]  ;;  %v7277_v50 = vld [vmem:[%s8172_s28 + $0x4] sm:$0xf]  ;;  %v6001_v59 = vor.u32 %v7441_v41, %v6000_v40 }
  0x31   : > { %2272 = vmatpush.bf16.msra.mxu2 %v5641_v20  ;;  %11613 = vst [vmem:[#allocation5_spill] sm:$0xff] %v8198_v48  ;;  %v5350_v51 = vld [vmem:[%s8172_s28 + $0x2c] sm:$0xf0]  ;;  %v8205_v53 = vor.u32 %v7283_v44, %v5356_v39  ;;  %v8207_v54 = vor.u32 %v7278_v45, %v5358_v46  ;;  %v7462_v56 = vld [vmem:[%s11587_s1 + $0x518] sm:$0xf0]  ;;  %vm4214_vm2 = vcmask 31744  }
  0x32   : > { %2291 = vmatpush.bf16.msra.mxu3 %v5737_v21  ;;  %v6084_v55 = vld [vmem:[%s11587_s1 + $0x510] sm:$0xf]  ;;  %v8215_v58 = vor.u32 %v7277_v50, %v5350_v51  ;;  %v7486_v62 = vld [vmem:[%s11587_s1 + $0x5d8] sm:$0xf0]  ;;  %v5880_v2 = vld [vmem:[%s11587_s1 + $0x378] sm:$0xf] }
  0x33   : > { %2253 = vmatpush.bf16.msra.mxu1 %v5545_v25  ;;  %v6180_v61 = vld [vmem:[%s11587_s1 + $0x5d0] sm:$0xf]  ;;  %v6085_v0 = vor.u32 %v7462_v56, %v6084_v55  ;;  %v7438_v1 = vld [vmem:[%s11587_s1 + $0x458] sm:$0xf0]  ;;  %v7411_v3 = vld [vmem:[%s11587_s1 + $0x380] sm:$0xf0] }
  0x34   : > { %2235 = vmatpush.bf16.msra.mxu0 %v5437_v31  ;;  %11614 = vst [vmem:[#allocation6_spill] sm:$0xff] %v8215_v58  ;;  %v5988_v63 = vld [vmem:[%s11587_s1 + $0x450] sm:$0xf]  ;;  %v6072_v4 = vld [vmem:[%s11587_s1 + $0x4f8] sm:$0xf]  ;;  %v6181_v6 = vor.u32 %v7486_v62, %v6180_v61  ;;  %v5881_v8 = vor.u32 %v7411_v3, %v5880_v2  ;;  %s323_s27 = sand.u32 1, %s7855_s10  }
  0x35   : > { %2273 = vmatpush.bf16.msra.mxu2 %v5629_v35  ;;  %v7459_v5 = vld [vmem:[%s11587_s1 + $0x500] sm:$0xf0]  ;;  %v5989_v7 = vor.u32 %v7438_v1, %v5988_v63  ;;  %v6168_v9 = vld [vmem:[%s11587_s1 + $0x5b8] sm:$0xf]  ;;  %v5868_v14 = vld [vmem:[%s11587_s1 + $0x360] sm:$0xf] }
  0x36   : > { %2292 = vmatpush.bf16.msra.mxu3 %v5725_v36  ;;  %v7483_v10 = vld [vmem:[%s11587_s1 + $0x5c0] sm:$0xf0]  ;;  %v5976_v11 = vld [vmem:[%s11587_s1 + $0x438] sm:$0xf]  ;;  %v6073_v12 = vor.u32 %v7459_v5, %v6072_v4  ;;  %v7408_v15 = vld [vmem:[%s11587_s1 + $0x368] sm:$0xf0] }
  0x37   : > { %2254 = vmatpush.bf16.msra.mxu1 %v5533_v43  ;;  %2236 = vmatmul.bf16.vlgmr.msra.gmra.mxu0 %v8198_v48  ;;  %v7435_v13 = vld [vmem:[%s11587_s1 + $0x440] sm:$0xf0]  ;;  %v6060_v16 = vld [vmem:[%s11587_s1 + $0x4e0] sm:$0xf]  ;;  %v7456_v17 = vld [vmem:[%s11587_s1 + $0x4e8] sm:$0xf0]  ;;  %v6169_v18 = vor.u32 %v7483_v10, %v6168_v9  ;;  %v5869_v23 = vor.u32 %v7408_v15, %v5868_v14 }
  0x38   : > { %2304 = vmatpush.bf16.msrb.mxu0 %v5905_v47  ;;  %2274 = vmatmul.bf16.vlgmr.msra.gmra.mxu2 %v8205_v53  ;;  %v6156_v19 = vld [vmem:[%s11587_s1 + $0x5a0] sm:$0xf]  ;;  %v7480_v20 = vld [vmem:[%s11587_s1 + $0x5a8] sm:$0xf0]  ;;  %v5977_v22 = vor.u32 %v7435_v13, %v5976_v11  ;;  %v5392_v25 = vld [vmem:[%s8172_s28 + $0x58] sm:$0xf]  ;;  %v6061_v27 = vor.u32 %v7456_v17, %v6060_v16 }
  0x39   : > { %2342 = vmatpush.bf16.msrb.mxu2 %v6097_v49  ;;  %2293 = vmatmul.bf16.vlgmr.msra.gmra.mxu3 %v8207_v54  ;;  %v5964_v21 = vld [vmem:[%s11587_s1 + $0x420] sm:$0xf]  ;;  %v7432_v24 = vld [vmem:[%s11587_s1 + $0x428] sm:$0xf0]  ;;  %v7293_v26 = vld [vmem:[%s8172_s28 + $0x80] sm:$0xf0]  ;;  %v6157_v35 = vor.u32 %v7480_v20, %v6156_v19 }
  0x3a   : > { %2361 = vmatpush.bf16.msrb.mxu3 %v6193_v57  ;;  %2255 = vmatmul.bf16.vlgmr.msra.gmra.mxu1 %v8215_v58  ;;  %v5400_v28 = vld [vmem:[%s8172_s28 + $0x60] sm:$0xf]  ;;  %v7294_v29 = vld [vmem:[%s8172_s28 + $0x88] sm:$0xf0]  ;;  %v5856_v30 = vld [vmem:[%s11587_s1 + $0x348] sm:$0xf]  ;;  %v5965_v39 = vor.u32 %v7432_v24, %v5964_v21  ;;  %v8310_v44 = vor.u32 %v7293_v26, %v5392_v25 }
  0x3b   : > { %2323 = vmatpush.bf16.msrb.mxu1 %v6001_v59  ;;  %v7405_v31 = vld [vmem:[%s11587_s1 + $0x350] sm:$0xf0]  ;;  %v7289_v32 = vld [vmem:[%s8172_s28 + $0x64] sm:$0xf]  ;;  %v6048_v33 = vld [vmem:[%s11587_s1 + $0x4c8] sm:$0xf]  ;;  %v8321_v50 = vor.u32 %v7294_v29, %v5400_v28 }
  0x3c   : > { %2305 = vmatpush.bf16.msrb.mxu0 %v5893_v60  ;;  %v7453_v34 = vld [vmem:[%s11587_s1 + $0x4d0] sm:$0xf0]  ;;  %v5402_v36 = vld [vmem:[%s8172_s28 + $0x8c] sm:$0xf0]  ;;  %v6144_v37 = vld [vmem:[%s11587_s1 + $0x588] sm:$0xf]  ;;  %v5857_v40 = vor.u32 %v7405_v31, %v5856_v30 }
  0x3d   : > { %2343 = vmatpush.bf16.msrb.mxu2 %v6085_v0  ;;  %v7477_v38 = vld [vmem:[%s11587_s1 + $0x590] sm:$0xf0]  ;;  %v7288_v41 = vld [vmem:[%s8172_s28 + $0x5c] sm:$0xf]  ;;  %v5394_v42 = vld [vmem:[%s8172_s28 + $0x84] sm:$0xf0]  ;;  %v6049_v45 = vor.u32 %v7453_v34, %v6048_v33  ;;  %v8323_v51 = vor.u32 %v7289_v32, %v5402_v36 }
  0x3e   : > { %2362 = vmatpush.bf16.msrb.mxu3 %v6181_v6  ;;  %v5952_v43 = vld [vmem:[%s11587_s1 + $0x408] sm:$0xf]  ;;  %11615 = vst [vmem:[#allocation7_spill] sm:$0xff] %v8310_v44  ;;  %v7429_v46 = vld [vmem:[%s11587_s1 + $0x410] sm:$0xf0]  ;;  %v6145_v56 = vor.u32 %v7477_v38, %v6144_v37  ;;  %v8331_v57 = vor.u32 %v7288_v41, %v5394_v42  ;;  %s7753_s16 = smul.u32 352, %s323_s27 }
  0x3f   : > { %2324 = vmatpush.bf16.msrb.mxu1 %v5989_v7  ;;  %v5844_v47 = vld [vmem:[%s11587_s1 + $0x330] sm:$0xf]  ;;  %v7402_v49 = vld [vmem:[%s11587_s1 + $0x338] sm:$0xf0]  ;;  %v5953_v59 = vor.u32 %v7429_v46, %v5952_v43  ;;  %v5832_v2 = vld [vmem:[%s11587_s1 + $0x318] sm:$0xf] }
  0x40   : > { %2306 = vmatpush.bf16.msrb.mxu0 %v5881_v8  ;;  %v6036_v52 = vld [vmem:[%s11587_s1 + $0x4b0] sm:$0xf]  ;;  %v7450_v55 = vld [vmem:[%s11587_s1 + $0x4b8] sm:$0xf0]  ;;  %11616 = vst [vmem:[#allocation8_spill] sm:$0xff] %v8331_v57  ;;  %v5845_v60 = vor.u32 %v7402_v49, %v5844_v47  ;;  %s11374_s29 = scalar_lea.vmem [#allocation2], %s7753_s16 }
  0x41   : > { %2344 = vmatpush.bf16.msrb.mxu2 %v6073_v12  ;;  %v6132_v61 = vld [vmem:[%s11587_s1 + $0x570] sm:$0xf]  ;;  %v7474_v62 = vld [vmem:[%s11587_s1 + $0x578] sm:$0xf0]  ;;  %v6037_v0 = vor.u32 %v7450_v55, %v6036_v52  ;;  %v7399_v3 = vld [vmem:[%s11587_s1 + $0x320] sm:$0xf0] }
  0x42   : > { %2363 = vmatpush.bf16.msrb.mxu3 %v6169_v18  ;;  %v5940_v63 = vld [vmem:[%s11587_s1 + $0x3f0] sm:$0xf]  ;;  %v7426_v1 = vld [vmem:[%s11587_s1 + $0x3f8] sm:$0xf0]  ;;  %v6024_v4 = vld [vmem:[%s11587_s1 + $0x498] sm:$0xf]  ;;  %v6133_v6 = vor.u32 %v7474_v62, %v6132_v61  ;;  %v5833_v10 = vor.u32 %v7399_v3, %v5832_v2 }
  0x43   : > { %2325 = vmatpush.bf16.msrb.mxu1 %v5977_v22  ;;  %v7447_v5 = vld [vmem:[%s11587_s1 + $0x4a0] sm:$0xf0]  ;;  %v6120_v7 = vld [vmem:[%s11587_s1 + $0x558] sm:$0xf]  ;;  %v5941_v9 = vor.u32 %v7426_v1, %v5940_v63  ;;  %v5820_v13 = vld [vmem:[%s11587_s1 + $0x300] sm:$0xf] }
  0x44   : > { %2307 = vmatpush.bf16.msrb.mxu0 %v5869_v23  ;;  %v7471_v8 = vld [vmem:[%s11587_s1 + $0x560] sm:$0xf0]  ;;  %v5928_v11 = vld [vmem:[%s11587_s1 + $0x3d8] sm:$0xf]  ;;  %v6025_v14 = vor.u32 %v7447_v5, %v6024_v4  ;;  %v7396_v15 = vld [vmem:[%s11587_s1 + $0x308] sm:$0xf0] }
  0x45   : > { %2345 = vmatpush.bf16.msrb.mxu2 %v6061_v27  ;;  %v7423_v12 = vld [vmem:[%s11587_s1 + $0x3e0] sm:$0xf0]  ;;  %v6012_v16 = vld [vmem:[%s11587_s1 + $0x480] sm:$0xf]  ;;  %v7444_v17 = vld [vmem:[%s11587_s1 + $0x488] sm:$0xf0]  ;;  %v6121_v22 = vor.u32 %v7471_v8, %v6120_v7  ;;  %v5821_v27 = vor.u32 %v7396_v15, %v5820_v13 }
  0x46   : > { %2364 = vmatpush.bf16.msrb.mxu3 %v6157_v35  ;;  %v6108_v18 = vld [vmem:[%s11587_s1 + $0x540] sm:$0xf]  ;;  %v7468_v19 = vld [vmem:[%s11587_s1 + $0x548] sm:$0xf0]  ;;  %v6288_v20 = vld [vmem:[%s11587_s1 + $0x6a8] sm:$0xf]  ;;  %v5929_v26 = vor.u32 %v7423_v12, %v5928_v11  ;;  %v6013_v31 = vor.u32 %v7444_v17, %v6012_v16 }
  0x47   : > { %2326 = vmatpush.bf16.msrb.mxu1 %v5965_v39  ;;  %2241 = vmatmul.bf16.gmra.mxu0 %v8310_v44  ;;  %v7513_v21 = vld [vmem:[%s11587_s1 + $0x6b0] sm:$0xf0]  ;;  %v5916_v23 = vld [vmem:[%s11587_s1 + $0x3c0] sm:$0xf]  ;;  %v6480_v24 = vld [vmem:[%s11587_s1 + $0x828] sm:$0xf]  ;;  %v6109_v41 = vor.u32 %v7468_v19, %v6108_v18 }
  0x48   : > { %2308 = vmatpush.bf16.msrb.mxu0 %v5857_v40  ;;  %2279 = vmatmul.bf16.gmra.mxu2 %v8321_v50  ;;  %v7561_v25 = vld [vmem:[%s11587_s1 + $0x830] sm:$0xf0]  ;;  %v7420_v28 = vld [vmem:[%s11587_s1 + $0x3c8] sm:$0xf0]  ;;  %v5364_v29 = vld [vmem:[%s8172_s28 + $0x10] sm:$0xf]  ;;  %v6289_v34 = vor.u32 %v7513_v21, %v6288_v20 }
  0x49   : > { %2346 = vmatpush.bf16.msrb.mxu2 %v6049_v45  ;;  %2298 = vmatmul.bf16.gmra.mxu3 %v8323_v51  ;;  %v7284_v30 = vld [vmem:[%s8172_s28 + $0x38] sm:$0xf0]  ;;  %v5372_v32 = vld [vmem:[%s8172_s28 + $0x18] sm:$0xf]  ;;  %v7285_v33 = vld [vmem:[%s8172_s28 + $0x40] sm:$0xf0]  ;;  %v6481_v38 = vor.u32 %v7561_v25, %v6480_v24  ;;  %v5917_v46 = vor.u32 %v7420_v28, %v5916_v23 }
  0x4a   : > { %2365 = vmatpush.bf16.msrb.mxu3 %v6145_v56  ;;  %2260 = vmatmul.bf16.gmra.mxu1 %v8331_v57  ;;  %v7320_v35 = vld [vmem:[%s11587_s1 + $0xac] sm:$0xf]  ;;  %v5522_v36 = vld [vmem:[%s11587_s1 + $0xb4] sm:$0xf0]  ;;  %v7280_v37 = vld [vmem:[%s8172_s28 + $0x1c] sm:$0xf]  ;;  %v8438_v56 = vor.u32 %v7284_v30, %v5364_v29  ;;  %v8449_v63 = vor.u32 %v7285_v33, %v5372_v32 }
  0x4b   : > { %2327 = vmatpush.bf16.msrb.mxu1 %v5953_v59  ;;  %v6384_v39 = vld [vmem:[%s11587_s1 + $0x768] sm:$0xf]  ;;  %v7537_v40 = vld [vmem:[%s11587_s1 + $0x770] sm:$0xf0]  ;;  %v5366_v45 = vld [vmem:[%s8172_s28 + $0x3c] sm:$0xf0]  ;;  %v5525_v47 = vor.u32 %v7320_v35, %v5522_v36 }
  0x4c   : > { %2309 = vmatpush.bf16.msrb.mxu0 %v5845_v60  ;;  %v5374_v42 = vld [vmem:[%s8172_s28 + $0x44] sm:$0xf0]  ;;  %v7279_v43 = vld [vmem:[%s8172_s28 + $0x14] sm:$0xf]  ;;  %v6276_v49 = vld [vmem:[%s11587_s1 + $0x690] sm:$0xf]  ;;  %v6385_v59 = vor.u32 %v7537_v40, %v6384_v39 }
  0x4d   : > { %2347 = vmatpush.bf16.msrb.mxu2 %v6037_v0  ;;  %v7510_v52 = vld [vmem:[%s11587_s1 + $0x698] sm:$0xf0]  ;;  %v6468_v55 = vld [vmem:[%s11587_s1 + $0x810] sm:$0xf]  ;;  %v7317_v61 = vld [vmem:[%s11587_s1 + $0x94] sm:$0xf]  ;;  %v8451_v0 = vor.u32 %v7280_v37, %v5374_v42  ;;  %v8459_v3 = vor.u32 %v7279_v43, %v5366_v45 }
  0x4e   : > { %2366 = vmatpush.bf16.msrb.mxu3 %v6133_v6  ;;  %v7558_v60 = vld [vmem:[%s11587_s1 + $0x818] sm:$0xf0]  ;;  %v5510_v62 = vld [vmem:[%s11587_s1 + $0x9c] sm:$0xf0]  ;;  %v6372_v1 = vld [vmem:[%s11587_s1 + $0x750] sm:$0xf]  ;;  %v6277_v4 = vor.u32 %v7510_v52, %v6276_v49 }
  0x4f   : > { %2328 = vmatpush.bf16.msrb.mxu1 %v5941_v9  ;;  %v7534_v2 = vld [vmem:[%s11587_s1 + $0x758] sm:$0xf0]  ;;  %v6469_v5 = vor.u32 %v7558_v60, %v6468_v55  ;;  %v5513_v6 = vor.u32 %v7317_v61, %v5510_v62  ;;  %v6264_v7 = vld [vmem:[%s11587_s1 + $0x678] sm:$0xf]  ;;  %v7507_v8 = vld [vmem:[%s11587_s1 + $0x680] sm:$0xf0] }
  0x50   : > { %2310 = vmatpush.bf16.msrb.mxu0 %v5833_v10  ;;  %v6456_v9 = vld [vmem:[%s11587_s1 + $0x7f8] sm:$0xf]  ;;  %v6373_v10 = vor.u32 %v7534_v2, %v6372_v1  ;;  %v7555_v11 = vld [vmem:[%s11587_s1 + $0x800] sm:$0xf0]  ;;  %v7314_v12 = vld [vmem:[%s11587_s1 + $0x7c] sm:$0xf]  ;;  %v6265_v16 = vor.u32 %v7507_v8, %v6264_v7 }
  0x51   : > { %2348 = vmatpush.bf16.msrb.mxu2 %v6025_v14  ;;  %v5498_v13 = vld [vmem:[%s11587_s1 + $0x84] sm:$0xf0]  ;;  %v6360_v14 = vld [vmem:[%s11587_s1 + $0x738] sm:$0xf]  ;;  %v7531_v15 = vld [vmem:[%s11587_s1 + $0x740] sm:$0xf0]  ;;  %v6457_v17 = vor.u32 %v7555_v11, %v6456_v9 }
  0x52   : > { %2367 = vmatpush.bf16.msrb.mxu3 %v6121_v22  ;;  %v5501_v18 = vor.u32 %v7314_v12, %v5498_v13  ;;  %v6252_v19 = vld [vmem:[%s11587_s1 + $0x660] sm:$0xf]  ;;  %v7504_v20 = vld [vmem:[%s11587_s1 + $0x668] sm:$0xf0]  ;;  %v6361_v22 = vor.u32 %v7531_v15, %v6360_v14  ;;  %v7311_v24 = vld [vmem:[%s11587_s1 + $0x64] sm:$0xf] }
  0x53   : > { %2329 = vmatpush.bf16.msrb.mxu1 %v5929_v26  ;;  %v6444_v21 = vld [vmem:[%s11587_s1 + $0x7e0] sm:$0xf]  ;;  %v7552_v23 = vld [vmem:[%s11587_s1 + $0x7e8] sm:$0xf0]  ;;  %v5486_v25 = vld [vmem:[%s11587_s1 + $0x6c] sm:$0xf0]  ;;  %v6253_v28 = vor.u32 %v7504_v20, %v6252_v19 }
  0x54   : > { %2311 = vmatpush.bf16.msrb.mxu0 %v5821_v27  ;;  %v6348_v26 = vld [vmem:[%s11587_s1 + $0x720] sm:$0xf]  ;;  %v7528_v27 = vld [vmem:[%s11587_s1 + $0x728] sm:$0xf0]  ;;  %v6445_v29 = vor.u32 %v7552_v23, %v6444_v21  ;;  %v5489_v30 = vor.u32 %v7311_v24, %v5486_v25  ;;  %v7295_v32 = vld [vmem:[%s8172_s28 + $0x90] sm:$0xf0] }
  0x55   : > { %2349 = vmatpush.bf16.msrb.mxu2 %v6013_v31  ;;  %v5408_v31 = vld [vmem:[%s8172_s28 + $0x68] sm:$0xf]  ;;  %v6349_v36 = vor.u32 %v7528_v27, %v6348_v26  ;;  %v5416_v37 = vld [vmem:[%s8172_s28 + $0x70] sm:$0xf]  ;;  %v7549_v39 = vld [vmem:[%s11587_s1 + $0x7d0] sm:$0xf0] }
  0x56   : > { %2368 = vmatpush.bf16.msrb.mxu3 %v6109_v41  ;;  %v6240_v33 = vld [vmem:[%s11587_s1 + $0x648] sm:$0xf]  ;;  %v7308_v40 = vld [vmem:[%s11587_s1 + $0x4c] sm:$0xf]  ;;  %v5474_v41 = vld [vmem:[%s11587_s1 + $0x54] sm:$0xf0]  ;;  %v8554_v1 = vor.u32 %v7295_v32, %v5408_v31 }
  0x57   : > { %2330 = vmatpush.bf16.msrb.mxu1 %v5917_v46  ;;  %2312 = vmatmul.bf16.vlgmr.msrb.gmra.mxu0 %v8438_v56  ;;  %v6432_v35 = vld [vmem:[%s11587_s1 + $0x7c8] sm:$0xf]  ;;  %v7291_v42 = vld [vmem:[%s8172_s28 + $0x74] sm:$0xf]  ;;  %v5418_v46 = vld [vmem:[%s8172_s28 + $0x9c] sm:$0xf0] }
  0x58   : > { %2380 = vmatpush.bf16.msra.mxu0 %v6289_v34  ;;  %2350 = vmatmul.bf16.vlgmr.msrb.gmra.mxu2 %v8449_v63  ;;  %v7501_v34 = vld [vmem:[%s11587_s1 + $0x650] sm:$0xf0]  ;;  %v6336_v43 = vld [vmem:[%s11587_s1 + $0x708] sm:$0xf]  ;;  %v7290_v49 = vld [vmem:[%s8172_s28 + $0x6c] sm:$0xf]  ;;  %v6433_v55 = vor.u32 %v7549_v39, %v6432_v35  ;;  %v8567_v8 = vor.u32 %v7291_v42, %v5418_v46 }
  0x59   : > { %2418 = vmatpush.bf16.msra.mxu2 %v6481_v38  ;;  %2369 = vmatmul.bf16.vlgmr.msrb.gmra.mxu3 %v8451_v0  ;;  %v7296_v38 = vld [vmem:[%s8172_s28 + $0x98] sm:$0xf0]  ;;  %v7525_v45 = vld [vmem:[%s11587_s1 + $0x710] sm:$0xf0]  ;;  %v5410_v52 = vld [vmem:[%s8172_s28 + $0x94] sm:$0xf0] }
  0x5a   : > { %2437 = vmatpush.bf16.msra.mxu3 %v5525_v47  ;;  %2331 = vmatmul.bf16.vlgmr.msrb.gmra.mxu1 %v8459_v3  ;;  %v6241_v47 = vor.u32 %v7501_v34, %v6240_v33  ;;  %v6228_v60 = vld [vmem:[%s11587_s1 + $0x630] sm:$0xf]  ;;  %v7498_v61 = vld [vmem:[%s11587_s1 + $0x638] sm:$0xf0]  ;;  %v6337_v2 = vor.u32 %v7525_v45, %v6336_v43  ;;  %v8565_v7 = vor.u32 %v7296_v38, %v5416_v37  ;;  %v6216_v15 = vld [vmem:[%s11587_s1 + $0x618] sm:$0xf] }
  0x5b   : > { %2399 = vmatpush.bf16.msra.mxu1 %v6385_v59  ;;  %v5477_v59 = vor.u32 %v7308_v40, %v5474_v41  ;;  %v6420_v62 = vld [vmem:[%s11587_s1 + $0x7b0] sm:$0xf]  ;;  %11617 = vst [vmem:[#allocation9_spill] sm:$0xff] %v8567_v8  ;;  %v8575_v11 = vor.u32 %v7290_v49, %v5410_v52  ;;  %v6229_v12 = vor.u32 %v7498_v61, %v6228_v60  ;;  %v7543_v19 = vld [vmem:[%s11587_s1 + $0x7a0] sm:$0xf0]  ;;  %s7755_s17 = smul.u32 352, %s7939_s13 }
  0x5c   : > { %2381 = vmatpush.bf16.msra.mxu0 %v6277_v4  ;;  %v7546_v4 = vld [vmem:[%s11587_s1 + $0x7b8] sm:$0xf0]  ;;  %v6324_v9 = vld [vmem:[%s11587_s1 + $0x6f0] sm:$0xf]  ;;  %v5450_v21 = vld [vmem:[%s11587_s1 + $0x24] sm:$0xf0] }
  0x5d   : > { %2419 = vmatpush.bf16.msra.mxu2 %v6469_v5  ;;  %v7305_v5 = vld [vmem:[%s11587_s1 + $0x34] sm:$0xf]  ;;  %v6421_v13 = vor.u32 %v7546_v4, %v6420_v62  ;;  %v7302_v20 = vld [vmem:[%s11587_s1 + $0x1c] sm:$0xf]  ;;  %v7519_v23 = vld [vmem:[%s11587_s1 + $0x6e0] sm:$0xf0]  ;;  %s5275_s23 = scalar_lea.hbm %s11595_s9, %s7755_s17 }
  0x5e   : > { %2438 = vmatpush.bf16.msra.mxu3 %v5513_v6  ;;  %v5462_v6 = vld [vmem:[%s11587_s1 + $0x3c] sm:$0xf0]  ;;  %v7492_v26 = vld [vmem:[%s11587_s1 + $0x608] sm:$0xf0]  ;;  %v7299_v31 = vld [vmem:[%s11587_s1 + $0x4] sm:$0xf] }
  0x5f   : > { %2400 = vmatpush.bf16.msra.mxu1 %v6373_v10  ;;  %v7522_v10 = vld [vmem:[%s11587_s1 + $0x6f8] sm:$0xf0]  ;;  %v5465_v14 = vor.u32 %v7305_v5, %v5462_v6  ;;  %v6204_v25 = vld [vmem:[%s11587_s1 + $0x600] sm:$0xf]  ;;  %v5438_v33 = vld [vmem:[%s11587_s1 + $0xc] sm:$0xf0] }
  0x60   : > { %2382 = vmatpush.bf16.msra.mxu0 %v6265_v16  ;;  %v7495_v16 = vld [vmem:[%s11587_s1 + $0x620] sm:$0xf0]  ;;  %v6300_v34 = vld [vmem:[%s11587_s1 + $0x6c0] sm:$0xf]  ;;  %v7516_v35 = vld [vmem:[%s11587_s1 + $0x6c8] sm:$0xf0]  ;;  %v6205_v39 = vor.u32 %v7492_v26, %v6204_v25  ;;  %v5441_v45 = vor.u32 %v7299_v31, %v5438_v33 }
  0x61   : > { %2420 = vmatpush.bf16.msra.mxu2 %v6457_v17  ;;  %v6408_v17 = vld [vmem:[%s11587_s1 + $0x798] sm:$0xf]  ;;  %v6217_v24 = vor.u32 %v7495_v16, %v6216_v15  ;;  %v7392_v38 = vld [vmem:[%s11587_s1 + $0x2ec] sm:$0xf]  ;;  %v6301_v49 = vor.u32 %v7516_v35, %v6300_v34  ;;  %v5388_v60 = vld [vmem:[%s8172_s28 + $0x28] sm:$0xf] }
  0x62   : > { %2439 = vmatpush.bf16.msra.mxu3 %v5501_v18  ;;  %v6325_v18 = vor.u32 %v7522_v10, %v6324_v9  ;;  %v6409_v27 = vor.u32 %v7543_v19, %v6408_v17  ;;  %v5618_v37 = vld [vmem:[%s11587_s1 + $0x174] sm:$0xf0]  ;;  %v7416_v41 = vld [vmem:[%s11587_s1 + $0x3ac] sm:$0xf]  ;;  %v7281_v4 = vld [vmem:[%s8172_s28 + $0x24] sm:$0xf] }
  0x63   : > { %2401 = vmatpush.bf16.msra.mxu1 %v6361_v22  ;;  %v6312_v22 = vld [vmem:[%s11587_s1 + $0x6d8] sm:$0xf]  ;;  %v7368_v46 = vld [vmem:[%s11587_s1 + $0x22c] sm:$0xf]  ;;  %v5382_v5 = vld [vmem:[%s8172_s28 + $0x4c] sm:$0xf0] }
  0x64   : > { %2383 = vmatpush.bf16.msra.mxu0 %v6253_v28  ;;  %v5453_v28 = vor.u32 %v7302_v20, %v5450_v21  ;;  %v6313_v32 = vor.u32 %v7519_v23, %v6312_v22  ;;  %v5810_v40 = vld [vmem:[%s11587_s1 + $0x2f4] sm:$0xf0]  ;;  %v7341_v9 = vld [vmem:[%s11587_s1 + $0x154] sm:$0xf]  ;;  %v5606_v10 = vld [vmem:[%s11587_s1 + $0x15c] sm:$0xf0]  ;;  %v8687_v20 = vor.u32 %v7281_v4, %v5382_v5 }
  0x65   : > { %2421 = vmatpush.bf16.msra.mxu2 %v6445_v29  ;;  %v6396_v29 = vld [vmem:[%s11587_s1 + $0x780] sm:$0xf]  ;;  %v5906_v42 = vld [vmem:[%s11587_s1 + $0x3b4] sm:$0xf0]  ;;  %v5813_v61 = vor.u32 %v7392_v38, %v5810_v40  ;;  %v7413_v15 = vld [vmem:[%s11587_s1 + $0x394] sm:$0xf]  ;;  %v5609_v21 = vor.u32 %v7341_v9, %v5606_v10 }
  0x66   : > { %2440 = vmatpush.bf16.msra.mxu3 %v5489_v30  ;;  %v7540_v30 = vld [vmem:[%s11587_s1 + $0x788] sm:$0xf0]  ;;  %v5909_v62 = vor.u32 %v7416_v41, %v5906_v42  ;;  %v5894_v16 = vld [vmem:[%s11587_s1 + $0x39c] sm:$0xf0]  ;;  %11620 = vst [vmem:[#allocation12_spill] sm:$0xff] %v8687_v20  ;;  %s5276_s14 = sshll.u32 %s11374_s29, 4  ;;  %s5277_s14 = int_to_ptr.vmem [resolvable:$true] %s5276_s14 }
  0x67   : > { %2402 = vmatpush.bf16.msra.mxu1 %v6349_v36  ;;  %2317 = vmatmul.bf16.gmra.mxu0 %v8554_v1  ;;  %v7344_v36 = vld [vmem:[%s11587_s1 + $0x16c] sm:$0xf]  ;;  %v6397_v43 = vor.u32 %v7540_v30, %v6396_v29  ;;  %v5702_v19 = vld [vmem:[%s11587_s1 + $0x21c] sm:$0xf0]  ;;  %v5897_v23 = vor.u32 %v7413_v15, %v5894_v16  ;;  %v5594_v25 = vld [vmem:[%s11587_s1 + $0x144] sm:$0xf0] }
  0x68   : > { %2384 = vmatpush.bf16.msra.mxu0 %v6241_v47  ;;  %2355 = vmatmul.bf16.gmra.mxu2 %v8565_v7  ;;  %v5714_v47 = vld [vmem:[%s11587_s1 + $0x234] sm:$0xf0]  ;;  %v5621_v52 = vor.u32 %v7344_v36, %v5618_v37  ;;  %v7386_v26 = vld [vmem:[%s11587_s1 + $0x2bc] sm:$0xf]  ;;  %v5882_v30 = vld [vmem:[%s11587_s1 + $0x384] sm:$0xf0] }
  0x69   : > { %2422 = vmatpush.bf16.msra.mxu2 %v6433_v55  ;;  %2374 = vmatmul.bf16.gmra.mxu3 %v8567_v8  ;;  %v5380_v55 = vld [vmem:[%s8172_s28 + $0x20] sm:$0xf]  ;;  %v5717_v6 = vor.u32 %v7368_v46, %v5714_v47  ;;  %v7410_v29 = vld [vmem:[%s11587_s1 + $0x37c] sm:$0xf]  ;;  %v7335_v36 = vld [vmem:[%s11587_s1 + $0x124] sm:$0xf] }
  0x6a   : > { %2441 = vmatpush.bf16.msra.mxu3 %v5477_v59  ;;  %2336 = vmatmul.bf16.gmra.mxu1 %v8575_v11  ;;  %v7286_v59 = vld [vmem:[%s8172_s28 + $0x48] sm:$0xf0]  ;;  %v7362_v31 = vld [vmem:[%s11587_s1 + $0x1fc] sm:$0xf]  ;;  %v5885_v35 = vor.u32 %v7410_v29, %v5882_v30  ;;  %v5582_v37 = vld [vmem:[%s11587_s1 + $0x12c] sm:$0xf0] }
  0x6b   : > { %2403 = vmatpush.bf16.msra.mxu1 %v6337_v2  ;;  %v7287_v2 = vld [vmem:[%s8172_s28 + $0x50] sm:$0xf0]  ;;  %v7383_v38 = vld [vmem:[%s11587_s1 + $0x2a4] sm:$0xf]  ;;  %v5774_v40 = vld [vmem:[%s11587_s1 + $0x2ac] sm:$0xf0]  ;;  %v5585_v46 = vor.u32 %v7335_v36, %v5582_v37 }
  0x6c   : > { %2385 = vmatpush.bf16.msra.mxu0 %v6229_v12  ;;  %v7389_v12 = vld [vmem:[%s11587_s1 + $0x2d4] sm:$0xf]  ;;  %v8679_v17 = vor.u32 %v7287_v2, %v5388_v60  ;;  %v7407_v41 = vld [vmem:[%s11587_s1 + $0x364] sm:$0xf]  ;;  %v5870_v42 = vld [vmem:[%s11587_s1 + $0x36c] sm:$0xf0]  ;;  %v5777_v47 = vor.u32 %v7383_v38, %v5774_v40 }
  0x6d   : > { %2423 = vmatpush.bf16.msra.mxu2 %v6421_v13  ;;  %v8668_v13 = vor.u32 %v7286_v59, %v5380_v55  ;;  %v7297_v55 = vld [vmem:[%s8172_s28 + $0xa0] sm:$0xf0]  ;;  %v7332_v59 = vld [vmem:[%s11587_s1 + $0x10c] sm:$0xf]  ;;  %v5570_v60 = vld [vmem:[%s11587_s1 + $0x114] sm:$0xf0] }
  0x6e   : > { %2442 = vmatpush.bf16.msra.mxu3 %v5465_v14  ;;  %v5798_v14 = vld [vmem:[%s11587_s1 + $0x2dc] sm:$0xf0]  ;;  %11619 = vst [vmem:[#allocation11_spill] sm:$0xff] %v8679_v17  ;;  %v5762_v2 = vld [vmem:[%s11587_s1 + $0x294] sm:$0xf0]  ;;  %s5278_s24 = sshll.u32 %s5275_s23, 4  ;;  %s5279_s24 = int_to_ptr.hbm [resolvable:$true] %s5278_s24 }
  0x6f   : > { %2404 = vmatpush.bf16.msra.mxu1 %v6325_v18  ;;  %11618 = vst [vmem:[#allocation10_spill] sm:$0xff] %v8668_v13  ;;  %v7365_v18 = vld [vmem:[%s11587_s1 + $0x214] sm:$0xf]  ;;  %v5801_v22 = vor.u32 %v7389_v12, %v5798_v14  ;;  %v7404_v4 = vld [vmem:[%s11587_s1 + $0x34c] sm:$0xf]  ;;  %v5573_v14 = vor.u32 %v7332_v59, %v5570_v60  ;;  %s5264_s13 = scalar_lea.sflag [#allocation3], %s323_s27 }
  0x70   : > { %2386 = vmatpush.bf16.msra.mxu0 %v6217_v24  ;;  %v7338_v24 = vld [vmem:[%s11587_s1 + $0x13c] sm:$0xf]  ;;  %v5858_v5 = vld [vmem:[%s11587_s1 + $0x354] sm:$0xf0]  ;;  %v7356_v9 = vld [vmem:[%s11587_s1 + $0x1cc] sm:$0xf] }
  0x71   : > { %2424 = vmatpush.bf16.msra.mxu2 %v6409_v27  ;;  %v5705_v27 = vor.u32 %v7365_v18, %v5702_v19  ;;  %v5597_v33 = vor.u32 %v7338_v24, %v5594_v25  ;;  %v5666_v10 = vld [vmem:[%s11587_s1 + $0x1d4] sm:$0xf0]  ;;  %v7298_v12 = vld [vmem:[%s8172_s28 + $0xa8] sm:$0xf0]  ;;  %v7292_v15 = vld [vmem:[%s8172_s28 + $0x7c] sm:$0xf]  ;;  %v5861_v19 = vor.u32 %v7404_v4, %v5858_v5 }
  0x72   : > { %2443 = vmatpush.bf16.msra.mxu3 %v5453_v28  ;;  %v5786_v28 = vld [vmem:[%s11587_s1 + $0x2c4] sm:$0xf0]  ;;  %v5669_v25 = vor.u32 %v7356_v9, %v5666_v10  ;;  %v7353_v30 = vld [vmem:[%s11587_s1 + $0x1b4] sm:$0xf]  ;;  %v7326_v36 = vld [vmem:[%s11587_s1 + $0xdc] sm:$0xf] }
  0x73   : > { %2405 = vmatpush.bf16.msra.mxu1 %v6313_v32  ;;  %v5690_v32 = vld [vmem:[%s11587_s1 + $0x204] sm:$0xf0]  ;;  %v5789_v34 = vor.u32 %v7386_v26, %v5786_v28  ;;  %v5750_v26 = vld [vmem:[%s11587_s1 + $0x27c] sm:$0xf0]  ;;  %v7374_v38 = vld [vmem:[%s11587_s1 + $0x25c] sm:$0xf] }
  0x74   : > { %2387 = vmatpush.bf16.msra.mxu0 %v6205_v39  ;;  %v5693_v39 = vor.u32 %v7362_v31, %v5690_v32  ;;  %v5426_v16 = vld [vmem:[%s8172_s28 + $0xa4] sm:$0xf0]  ;;  %v5846_v28 = vld [vmem:[%s11587_s1 + $0x33c] sm:$0xf0]  ;;  %v7371_v59 = vld [vmem:[%s11587_s1 + $0x244] sm:$0xf] }
  0x75   : > { %2425 = vmatpush.bf16.msra.mxu2 %v6397_v43  ;;  %v7359_v43 = vld [vmem:[%s11587_s1 + $0x1e4] sm:$0xf]  ;;  %v5654_v31 = vld [vmem:[%s11587_s1 + $0x1bc] sm:$0xf0]  ;;  %v8799_v32 = vor.u32 %v7292_v15, %v5426_v16  ;;  %v5546_v37 = vld [vmem:[%s11587_s1 + $0xe4] sm:$0xf0] }
  0x76   : > { %2444 = vmatpush.bf16.msra.mxu3 %v5441_v45  ;;  %v5678_v45 = vld [vmem:[%s11587_s1 + $0x1ec] sm:$0xf0]  ;;  %v5738_v40 = vld [vmem:[%s11587_s1 + $0x264] sm:$0xf0]  ;;  %v7347_v4 = vld [vmem:[%s11587_s1 + $0x184] sm:$0xf] }
  0x77   : > { %2406 = vmatpush.bf16.msra.mxu1 %v6301_v49  ;;  %2388 = vmatmul.bf16.vlgmr.msra.gmra.mxu0 %v8668_v13  ;;  %v5873_v49 = vor.u32 %v7407_v41, %v5870_v42  ;;  %11622 = vst [vmem:[#allocation14_spill] sm:$0xff] %v8799_v32  ;;  %v7398_v41 = vld [vmem:[%s11587_s1 + $0x31c] sm:$0xf]  ;;  %v5834_v42 = vld [vmem:[%s11587_s1 + $0x324] sm:$0xf0]  ;;  %s7815_s0 = sshra.s32 %s5279_s24, 4  ;;  %s7816_s0 = int_to_ptr.hbm [resolvable:$true] %s7815_s0 }
  0x78   : > { %2456 = vmatpush.bf16.msrb.mxu0 %v5621_v52  ;;  %2426 = vmatmul.bf16.vlgmr.msra.gmra.mxu2 %v8679_v17  ;;  %v5424_v52 = vld [vmem:[%s8172_s28 + $0x78] sm:$0xf]  ;;  %v5726_v60 = vld [vmem:[%s11587_s1 + $0x24c] sm:$0xf0]  ;;  %v7488_v10 = vld [vmem:[%s11587_s1 + $0x5ec] sm:$0xf]  ;;  %p7822_p0 = scmp.lt.s32.totalorder %s7816_s0, %s11595_s9 }
  0x79   : > { %2494 = vmatpush.bf16.msrb.mxu2 %v5813_v61  ;;  %2445 = vmatmul.bf16.vlgmr.msra.gmra.mxu3 %v8198_v48  ;;  %v7380_v61 = vld [vmem:[%s11587_s1 + $0x28c] sm:$0xf]  ;;  %v8780_v24 = vor.u32 %v7297_v55, %v5424_v52  ;;  %v5741_v52 = vor.u32 %v7374_v38, %v5738_v40  ;;  %v5837_v55 = vor.u32 %v7398_v41, %v5834_v42  ;;  %v5630_v5 = vld [vmem:[%s11587_s1 + $0x18c] sm:$0xf0]  ;;  %v6002_v9 = vld [vmem:[%s11587_s1 + $0x474] sm:$0xf0] }
  0x7a   : > { %2513 = vmatpush.bf16.msrb.mxu3 %v5909_v62  ;;  %2407 = vmatmul.bf16.vlgmr.msra.gmra.mxu1 %v8687_v20  ;;  %v5681_v62 = vor.u32 %v7359_v43, %v5678_v45  ;;  %v5765_v18 = vor.u32 %v7380_v61, %v5762_v2  ;;  %v7350_v43 = vld [vmem:[%s11587_s1 + $0x19c] sm:$0xf]  ;;  %v5642_v45 = vld [vmem:[%s11587_s1 + $0x1a4] sm:$0xf0]  ;;  %v7395_v61 = vld [vmem:[%s11587_s1 + $0x304] sm:$0xf] }
  0x7b   : > { %2475 = vmatpush.bf16.msrb.mxu1 %v5717_v6  ;;  %v5432_v6 = vld [vmem:[%s8172_s28 + $0x80] sm:$0xf]  ;;  %v5822_v2 = vld [vmem:[%s11587_s1 + $0x30c] sm:$0xf0]  ;;  %v7512_v15 = vld [vmem:[%s11587_s1 + $0x6ac] sm:$0xf] }
  0x7c   : > { %2457 = vmatpush.bf16.msrb.mxu0 %v5609_v21  ;;  %v7329_v21 = vld [vmem:[%s11587_s1 + $0xf4] sm:$0xf]  ;;  %v8791_v29 = vor.u32 %v7298_v12, %v5432_v6  ;;  %v7440_v6 = vld [vmem:[%s11587_s1 + $0x46c] sm:$0xf]  ;;  %v6290_v16 = vld [vmem:[%s11587_s1 + $0x6b4] sm:$0xf0] }
  0x7d   : > { %2495 = vmatpush.bf16.msrb.mxu2 %v5801_v22  ;;  %v5558_v22 = vld [vmem:[%s11587_s1 + $0xfc] sm:$0xf0]  ;;  %v7434_v42 = vld [vmem:[%s11587_s1 + $0x43c] sm:$0xf]  ;;  %s7817_s25 = scalar_lea.hbm %s7816_s0, 352  ;;  %s7821_s16 = scalar_lea.hbm %s11595_s9, 704 }
  0x7e   : > { %2514 = vmatpush.bf16.msrb.mxu3 %v5897_v23  ;;  %v7377_v23 = vld [vmem:[%s11587_s1 + $0x274] sm:$0xf]  ;;  %11621 = vst [vmem:[#allocation13_spill] sm:$0xff] %v8791_v29  ;;  %v6086_v38 = vld [vmem:[%s11587_s1 + $0x51c] sm:$0xf0]  ;;  %p7818_p11 = scmp.ne.s32.totalorder %s7816_s0, %s7817_s25  ;;  %p7823_p1 = scmp.lt.s32.totalorder %s7821_s16, %s7817_s25 }
  0x7f   : > { %2476 = vmatpush.bf16.msrb.mxu1 %v5705_v27  ;;  %v7401_v27 = vld [vmem:[%s11587_s1 + $0x334] sm:$0xf] }
  0x80   : > { %2458 = vmatpush.bf16.msrb.mxu0 %v5597_v33  ;;  %v5561_v33 = vor.u32 %v7329_v21, %v5558_v22  ;;  %v7464_v21 = vld [vmem:[%s11587_s1 + $0x52c] sm:$0xf]  ;;  %v6098_v22 = vld [vmem:[%s11587_s1 + $0x534] sm:$0xf0]  ;;  %p7819_p12 = pnand %p7818_p11, %p7956_p5  ;;  %p7824_p2 = por %p7823_p1, %p7822_p0 }
  0x81   : > { %2496 = vmatpush.bf16.msrb.mxu2 %v5789_v34  ;;  %v5753_v34 = vor.u32 %v7377_v23, %v5750_v26  ;;  %v5633_v23 = vor.u32 %v7347_v4, %v5630_v5  ;;  %v5966_v4 = vld [vmem:[%s11587_s1 + $0x42c] sm:$0xf0]  ;;  %v7479_v5 = vld [vmem:[%s11587_s1 + $0x5a4] sm:$0xf] }
  0x82   : > { %2515 = vmatpush.bf16.msrb.mxu3 %v5885_v35  ;;  %v5849_v35 = vor.u32 %v7401_v27, %v5846_v28  ;;  %v6293_v27 = vor.u32 %v7512_v15, %v6290_v16  ;;  %v6101_v28 = vor.u32 %v7464_v21, %v6098_v22  ;;  %v6062_v15 = vld [vmem:[%s11587_s1 + $0x4ec] sm:$0xf0]  ;;  %v7428_v21 = vld [vmem:[%s11587_s1 + $0x40c] sm:$0xf]  ;;  %v5954_v22 = vld [vmem:[%s11587_s1 + $0x414] sm:$0xf0]  ;;  %p7820_p13 = pneg %p7819_p12 }
  0x83   : > { %2477 = vmatpush.bf16.msrb.mxu1 %v5693_v39  ;;  %v5657_v39 = vor.u32 %v7353_v30, %v5654_v31  ;;  %v7437_v30 = vld [vmem:[%s11587_s1 + $0x454] sm:$0xf]  ;;  %v5990_v31 = vld [vmem:[%s11587_s1 + $0x45c] sm:$0xf0] }
  0x84   : > { %2459 = vmatpush.bf16.msrb.mxu0 %v5585_v46  ;;  %v5549_v46 = vor.u32 %v7326_v36, %v5546_v37  ;;  %v6278_v36 = vld [vmem:[%s11587_s1 + $0x69c] sm:$0xf0]  ;;  %v7461_v37 = vld [vmem:[%s11587_s1 + $0x514] sm:$0xf]  ;;  %p7825_p3 = pnand %p7824_p2, %p7820_p13 }
  0x85   : > { %2497 = vmatpush.bf16.msrb.mxu2 %v5777_v47  ;;  %v7323_v47 = vld [vmem:[%s11587_s1 + $0xc4] sm:$0xf] }
  0x86   : > { %2516 = vmatpush.bf16.msrb.mxu3 %v5873_v49  ;;  %v5534_v49 = vld [vmem:[%s11587_s1 + $0xcc] sm:$0xf0] }
  0x87   : > { %2478 = vmatpush.bf16.msrb.mxu1 %v5681_v62  ;;  %2393 = vmatmul.bf16.gmra.mxu0 %v8780_v24  ;;  %v5645_v62 = vor.u32 %v7350_v43, %v5642_v45  ;;  %v5537_v12 = vor.u32 %v7323_v47, %v5534_v49  ;;  %v5978_v43 = vld [vmem:[%s11587_s1 + $0x444] sm:$0xf0]  ;;  %v7482_v45 = vld [vmem:[%s11587_s1 + $0x5bc] sm:$0xf] }
  0x88   : > { %2460 = vmatpush.bf16.msrb.mxu0 %v5573_v14  ;;  %2431 = vmatmul.bf16.gmra.mxu2 %v8791_v29  ;;  %v6194_v14 = vld [vmem:[%s11587_s1 + $0x5f4] sm:$0xf0]  ;;  %v6170_v47 = vld [vmem:[%s11587_s1 + $0x5c4] sm:$0xf0]  ;;  %v7506_v49 = vld [vmem:[%s11587_s1 + $0x67c] sm:$0xf] }
  0x89   : > { %2498 = vmatpush.bf16.msrb.mxu2 %v5765_v18  ;;  %2450 = vmatmul.bf16.gmra.mxu3 %v8310_v44  ;;  %v5729_v18 = vor.u32 %v7371_v59, %v5726_v60  ;;  %v6197_v26 = vor.u32 %v7488_v10, %v6194_v14  ;;  %v6074_v59 = vld [vmem:[%s11587_s1 + $0x504] sm:$0xf0]  ;;  %v5981_v60 = vor.u32 %v7434_v42, %v5978_v43  ;;  %v7503_v10 = vld [vmem:[%s11587_s1 + $0x664] sm:$0xf]  ;;  %v6230_v42 = vld [vmem:[%s11587_s1 + $0x63c] sm:$0xf0] }
  0x8a   : > { %2517 = vmatpush.bf16.msrb.mxu3 %v5861_v19  ;;  %2412 = vmatmul.bf16.gmra.mxu1 %v8799_v32  ;;  %v5825_v19 = vor.u32 %v7395_v61, %v5822_v2  ;;  %v6173_v61 = vor.u32 %v7482_v45, %v6170_v47  ;;  %v7431_v2 = vld [vmem:[%s11587_s1 + $0x424] sm:$0xf]  ;;  %v7449_v43 = vld [vmem:[%s11587_s1 + $0x4b4] sm:$0xf]  ;;  %v6038_v45 = vld [vmem:[%s11587_s1 + $0x4bc] sm:$0xf0] }
  0x8b   : > { %2479 = vmatpush.bf16.msrb.mxu1 %v5669_v25  ;;  %v6005_v25 = vor.u32 %v7440_v6, %v6002_v9  ;;  %v6158_v9 = vld [vmem:[%s11587_s1 + $0x5ac] sm:$0xf0]  ;;  %v7455_v14 = vld [vmem:[%s11587_s1 + $0x4e4] sm:$0xf]  ;;  %v5969_v16 = vor.u32 %v7431_v2, %v5966_v4  ;;  %v6218_v2 = vld [vmem:[%s11587_s1 + $0x624] sm:$0xf0] }
  0x8c   : > { %2461 = vmatpush.bf16.msrb.mxu0 %v5561_v33  ;;  %v7485_v33 = vld [vmem:[%s11587_s1 + $0x5d4] sm:$0xf]  ;;  %v7446_v4 = vld [vmem:[%s11587_s1 + $0x49c] sm:$0xf] }
  0x8d   : > { %2499 = vmatpush.bf16.msrb.mxu2 %v5753_v34  ;;  %v6182_v34 = vld [vmem:[%s11587_s1 + $0x5dc] sm:$0xf0] }
  0x8e   : > { %2518 = vmatpush.bf16.msrb.mxu3 %v5849_v35  ;;  %v7509_v35 = vld [vmem:[%s11587_s1 + $0x694] sm:$0xf]  ;;  %v6185_v40 = vor.u32 %v7485_v33, %v6182_v34  ;;  %v5957_v33 = vor.u32 %v7428_v21, %v5954_v22  ;;  %v6206_v21 = vld [vmem:[%s11587_s1 + $0x60c] sm:$0xf0]  ;;  %v7443_v22 = vld [vmem:[%s11587_s1 + $0x484] sm:$0xf] }
  0x8f   : > { %2480 = vmatpush.bf16.msrb.mxu1 %v5657_v39  ;;  %v5993_v39 = vor.u32 %v7437_v30, %v5990_v31  ;;  %v6281_v41 = vor.u32 %v7509_v35, %v6278_v36  ;;  %v7452_v30 = vld [vmem:[%s11587_s1 + $0x4cc] sm:$0xf]  ;;  %v6050_v31 = vld [vmem:[%s11587_s1 + $0x4d4] sm:$0xf0]  ;;  %v7425_v36 = vld [vmem:[%s11587_s1 + $0x3f4] sm:$0xf] }
  0x90   : > { %2462 = vmatpush.bf16.msrb.mxu0 %v5549_v46  ;;  %v6089_v46 = vor.u32 %v7461_v37, %v6086_v38  ;;  %v5942_v37 = vld [vmem:[%s11587_s1 + $0x3fc] sm:$0xf0]  ;;  %v7473_v38 = vld [vmem:[%s11587_s1 + $0x574] sm:$0xf] }
  0x91   : > { %2500 = vmatpush.bf16.msrb.mxu2 %v5741_v52  ;;  %v6266_v52 = vld [vmem:[%s11587_s1 + $0x684] sm:$0xf0] }
  0x92   : > { %2519 = vmatpush.bf16.msrb.mxu3 %v5837_v55  ;;  %v7458_v55 = vld [vmem:[%s11587_s1 + $0x4fc] sm:$0xf] }
  0x93   : > { %2481 = vmatpush.bf16.msrb.mxu1 %v5645_v62  ;;  %v6269_v62 = vor.u32 %v7506_v49, %v6266_v52  ;;  %v6077_v6 = vor.u32 %v7458_v55, %v6074_v59  ;;  %v7422_v52 = vld [vmem:[%s11587_s1 + $0x3dc] sm:$0xf]  ;;  %v5930_v55 = vld [vmem:[%s11587_s1 + $0x3e4] sm:$0xf0] }
  0x94   : > { %2463 = vmatpush.bf16.msrb.mxu0 %v5537_v12  ;;  %v6254_v12 = vld [vmem:[%s11587_s1 + $0x66c] sm:$0xf0]  ;;  %v7470_v59 = vld [vmem:[%s11587_s1 + $0x55c] sm:$0xf] }
  0x95   : > { %2501 = vmatpush.bf16.msrb.mxu2 %v5729_v18  ;;  %v6161_v18 = vor.u32 %v7479_v5, %v6158_v9  ;;  %v6026_v5 = vld [vmem:[%s11587_s1 + $0x4a4] sm:$0xf0]  ;;  %v7419_v9 = vld [vmem:[%s11587_s1 + $0x3c4] sm:$0xf] }
  0x96   : > { %2520 = vmatpush.bf16.msrb.mxu3 %v5825_v19  ;;  %v6257_v19 = vor.u32 %v7503_v10, %v6254_v12  ;;  %v5918_v10 = vld [vmem:[%s11587_s1 + $0x3cc] sm:$0xf0] }
  0x97   : > { %2482 = vmatpush.bf16.msrb.mxu1 %v5633_v23  ;;  %2464 = vmatmul.bf16.vlgmr.msrb.gmra.mxu0 %v8215_v58  ;;  %v7476_v23 = vld [vmem:[%s11587_s1 + $0x58c] sm:$0xf] }
  0x98   : > { %2532 = vmatpush.bf16.msra.mxu0 %v6005_v25  ;;  %2502 = vmatmul.bf16.vlgmr.msrb.gmra.mxu2 %v8207_v54  ;;  %v6065_v25 = vor.u32 %v7455_v14, %v6062_v15  ;;  %v7467_v15 = vld [vmem:[%s11587_s1 + $0x544] sm:$0xf] }
  0x99   : > { %2570 = vmatpush.bf16.msra.mxu2 %v6197_v26  ;;  %2521 = vmatmul.bf16.vlgmr.msrb.gmra.mxu3 %v8438_v56  ;;  %v6146_v26 = vld [vmem:[%s11587_s1 + $0x594] sm:$0xf0] }
  0x9a   : > { %2589 = vmatpush.bf16.msra.mxu3 %v6293_v27  ;;  %2483 = vmatmul.bf16.vlgmr.msrb.gmra.mxu1 %v8205_v53  ;;  %v7500_v27 = vld [vmem:[%s11587_s1 + $0x64c] sm:$0xf]  ;;  %v6149_v34 = vor.u32 %v7476_v23, %v6146_v26  ;;  %v6014_v23 = vld [vmem:[%s11587_s1 + $0x48c] sm:$0xf0]  ;;  %v6386_v26 = vld [vmem:[%s11587_s1 + $0x774] sm:$0xf0] }
  0x9b   : > { %2551 = vmatpush.bf16.msra.mxu1 %v6101_v28  ;;  %v6242_v28 = vld [vmem:[%s11587_s1 + $0x654] sm:$0xf0] }
  0x9c   : > { %2533 = vmatpush.bf16.msra.mxu0 %v5993_v39  ;;  %v6245_v35 = vor.u32 %v7500_v27, %v6242_v28  ;;  %v6053_v39 = vor.u32 %v7452_v30, %v6050_v31  ;;  %v5528_v27 = vld [vmem:[%s11587_s1 + $0xb0] sm:$0xf]  ;;  %v5921_v28 = vor.u32 %v7419_v9, %v5918_v10  ;;  %v7322_v30 = vld [vmem:[%s11587_s1 + $0xb8] sm:$0xf0]  ;;  %v5504_v9 = vld [vmem:[%s11587_s1 + $0x80] sm:$0xf] }
  0x9d   : > { %2571 = vmatpush.bf16.msra.mxu2 %v6185_v40  ;;  %v6134_v40 = vld [vmem:[%s11587_s1 + $0x57c] sm:$0xf0]  ;;  %v5624_v31 = vld [vmem:[%s11587_s1 + $0x170] sm:$0xf] }
  0x9e   : > { %2590 = vmatpush.bf16.msra.mxu3 %v6281_v41  ;;  %v7497_v41 = vld [vmem:[%s11587_s1 + $0x634] sm:$0xf]  ;;  %v6137_v47 = vor.u32 %v7473_v38, %v6134_v40  ;;  %v6017_v38 = vor.u32 %v7443_v22, %v6014_v23  ;;  %v5529_v40 = vor.u32 %v7322_v30, %v5528_v27  ;;  %v5492_v27 = vld [vmem:[%s11587_s1 + $0x68] sm:$0xf] }
  0x9f   : > { %2552 = vmatpush.bf16.msra.mxu1 %v6089_v46  ;;  %v5945_v46 = vor.u32 %v7425_v36, %v5942_v37  ;;  %v6233_v49 = vor.u32 %v7497_v41, %v6230_v42  ;;  %v7560_v36 = vld [vmem:[%s11587_s1 + $0x82c] sm:$0xf]  ;;  %v6482_v37 = vld [vmem:[%s11587_s1 + $0x834] sm:$0xf0] }
  0xa0   : > { %2534 = vmatpush.bf16.msra.mxu0 %v5981_v60  ;;  %v6041_v60 = vor.u32 %v7449_v43, %v6038_v45  ;;  %v6485_v42 = vor.u32 %v7560_v36, %v6482_v37  ;;  %v7533_v43 = vld [vmem:[%s11587_s1 + $0x754] sm:$0xf]  ;;  %v6374_v45 = vld [vmem:[%s11587_s1 + $0x75c] sm:$0xf0] }
  0xa1   : > { %2572 = vmatpush.bf16.msra.mxu2 %v6173_v61  ;;  %v6122_v61 = vld [vmem:[%s11587_s1 + $0x564] sm:$0xf0] }
  0xa2   : > { %2591 = vmatpush.bf16.msra.mxu3 %v6269_v62  ;;  %v7494_v62 = vld [vmem:[%s11587_s1 + $0x61c] sm:$0xf]  ;;  %v6125_v12 = vor.u32 %v7470_v59, %v6122_v61  ;;  %v7557_v59 = vld [vmem:[%s11587_s1 + $0x814] sm:$0xf]  ;;  %v6377_v61 = vor.u32 %v7533_v43, %v6374_v45 }
  0xa3   : > { %2553 = vmatpush.bf16.msra.mxu1 %v6077_v6  ;;  %v5933_v6 = vor.u32 %v7422_v52, %v5930_v55  ;;  %v6221_v14 = vor.u32 %v7494_v62, %v6218_v2  ;;  %v7343_v52 = vld [vmem:[%s11587_s1 + $0x160] sm:$0xf0] }
  0xa4   : > { %2535 = vmatpush.bf16.msra.mxu0 %v5969_v16  ;;  %v6110_v16 = vld [vmem:[%s11587_s1 + $0x54c] sm:$0xf0] }
  0xa5   : > { %2573 = vmatpush.bf16.msra.mxu2 %v6161_v18  ;;  %v7491_v18 = vld [vmem:[%s11587_s1 + $0x604] sm:$0xf] }
  0xa6   : > { %2592 = vmatpush.bf16.msra.mxu3 %v6257_v19  ;;  %v6029_v19 = vor.u32 %v7446_v4, %v6026_v5  ;;  %v7530_v5 = vld [vmem:[%s11587_s1 + $0x73c] sm:$0xf] }
  0xa7   : > { %2554 = vmatpush.bf16.msra.mxu1 %v6065_v25  ;;  %2469 = vmatmul.bf16.gmra.mxu0 %v8331_v57  ;;  %v7536_v25 = vld [vmem:[%s11587_s1 + $0x76c] sm:$0xf] }
  0xa8   : > { %2536 = vmatpush.bf16.msra.mxu0 %v5957_v33  ;;  %2507 = vmatmul.bf16.gmra.mxu2 %v8323_v51  ;;  %v7346_v33 = vld [vmem:[%s11587_s1 + $0x178] sm:$0xf0] }
  0xa9   : > { %2574 = vmatpush.bf16.msra.mxu2 %v6149_v34  ;;  %2526 = vmatmul.bf16.gmra.mxu3 %v8554_v1  ;;  %v6113_v34 = vor.u32 %v7467_v15, %v6110_v16  ;;  %v5625_v41 = vor.u32 %v7346_v33, %v5624_v31  ;;  %v5600_v15 = vld [vmem:[%s11587_s1 + $0x140] sm:$0xf]  ;;  %v7340_v16 = vld [vmem:[%s11587_s1 + $0x148] sm:$0xf0]  ;;  %v7313_v33 = vld [vmem:[%s11587_s1 + $0x70] sm:$0xf0] }
  0xaa   : > { %2593 = vmatpush.bf16.msra.mxu3 %v6245_v35  ;;  %2488 = vmatmul.bf16.gmra.mxu1 %v8321_v50  ;;  %v6209_v35 = vor.u32 %v7491_v18, %v6206_v21  ;;  %v7554_v18 = vld [vmem:[%s11587_s1 + $0x7fc] sm:$0xf]  ;;  %v5601_v23 = vor.u32 %v7340_v16, %v5600_v15  ;;  %v5493_v43 = vor.u32 %v7313_v33, %v5492_v27 }
  0xab   : > { %2555 = vmatpush.bf16.msra.mxu1 %v6053_v39  ;;  %v6389_v39 = vor.u32 %v7536_v25, %v6386_v26  ;;  %v7527_v25 = vld [vmem:[%s11587_s1 + $0x724] sm:$0xf]  ;;  %v6350_v26 = vld [vmem:[%s11587_s1 + $0x72c] sm:$0xf0] }
  0xac   : > { %2537 = vmatpush.bf16.msra.mxu0 %v5945_v46  ;;  %v5516_v46 = vld [vmem:[%s11587_s1 + $0x98] sm:$0xf] }
  0xad   : > { %2575 = vmatpush.bf16.msra.mxu2 %v6137_v47  ;;  %v7319_v47 = vld [vmem:[%s11587_s1 + $0xa0] sm:$0xf0] }
  0xae   : > { %2594 = vmatpush.bf16.msra.mxu3 %v6233_v49  ;;  %v5612_v49 = vld [vmem:[%s11587_s1 + $0x158] sm:$0xf]  ;;  %v5517_v2 = vor.u32 %v7319_v47, %v5516_v46  ;;  %v7524_v46 = vld [vmem:[%s11587_s1 + $0x70c] sm:$0xf] }
  0xaf   : > { %2556 = vmatpush.bf16.msra.mxu1 %v6041_v60  ;;  %v6470_v60 = vld [vmem:[%s11587_s1 + $0x81c] sm:$0xf0]  ;;  %v5613_v4 = vor.u32 %v7343_v52, %v5612_v49  ;;  %v6338_v47 = vld [vmem:[%s11587_s1 + $0x714] sm:$0xf0]  ;;  %v5480_v49 = vld [vmem:[%s11587_s1 + $0x50] sm:$0xf] }
  0xb0   : > { %2538 = vmatpush.bf16.msra.mxu0 %v5933_v6  ;;  %v6362_v6 = vld [vmem:[%s11587_s1 + $0x744] sm:$0xf0] }
  0xb1   : > { %2576 = vmatpush.bf16.msra.mxu2 %v6125_v12  ;;  %v6473_v12 = vor.u32 %v7557_v59, %v6470_v60  ;;  %v6365_v21 = vor.u32 %v7530_v5, %v6362_v6  ;;  %v7310_v59 = vld [vmem:[%s11587_s1 + $0x58] sm:$0xf0]  ;;  %v5576_v60 = vld [vmem:[%s11587_s1 + $0x110] sm:$0xf] }
  0xb2   : > { %2595 = vmatpush.bf16.msra.mxu3 %v6221_v14  ;;  %v7316_v14 = vld [vmem:[%s11587_s1 + $0x88] sm:$0xf0]  ;;  %v5481_v5 = vor.u32 %v7310_v59, %v5480_v49  ;;  %v7301_v59 = vld [vmem:[%s11587_s1 + $0x10] sm:$0xf0] }
  0xb3   : > { %2557 = vmatpush.bf16.msra.mxu1 %v6029_v19  ;;  %v6458_v19 = vld [vmem:[%s11587_s1 + $0x804] sm:$0xf0]  ;;  %v5505_v22 = vor.u32 %v7316_v14, %v5504_v9  ;;  %v7521_v9 = vld [vmem:[%s11587_s1 + $0x6f4] sm:$0xf] }
  0xb4   : > { %2539 = vmatpush.bf16.msra.mxu0 %v5921_v28  ;;  %v2237_v55 = vpop.f32.mrf.mxu0  ;;  %v6461_v31 = vor.u32 %v7554_v18, %v6458_v19  ;;  %v7307_v18 = vld [vmem:[%s11587_s1 + $0x40] sm:$0xf0]  ;;  %v5564_v19 = vld [vmem:[%s11587_s1 + $0xf8] sm:$0xf] }
  0xb5   : > { %2577 = vmatpush.bf16.msra.mxu2 %v6113_v34  ;;  %v5588_v34 = vld [vmem:[%s11587_s1 + $0x128] sm:$0xf] }
  0xb6   : > { %2596 = vmatpush.bf16.msra.mxu3 %v6209_v35  ;;  %v7337_v35 = vld [vmem:[%s11587_s1 + $0x130] sm:$0xf0] }
  0xb7   : > { %2558 = vmatpush.bf16.msra.mxu1 %v6017_v38  ;;  %v2256_v62 = vpop.f32.mrf.mxu1  ;;  %2540 = vmatmul.bf16.vlgmr.msra.gmra.mxu0 %v8459_v3  ;;  %v7551_v38 = vld [vmem:[%s11587_s1 + $0x7e4] sm:$0xf]  ;;  %v5589_v45 = vor.u32 %v7337_v35, %v5588_v34  ;;  %v7518_v34 = vld [vmem:[%s11587_s1 + $0x6dc] sm:$0xf]  ;;  %v6314_v35 = vld [vmem:[%s11587_s1 + $0x6e4] sm:$0xf0] }
  0xb8   : > { %2608 = vmatpush.bf16.msrb.mxu0 %v6389_v39  ;;  %v2257_v10 = vadd.f32 %v2256_v62, %v2237_v55  ;;  %2578 = vmatmul.bf16.vlgmr.msra.gmra.mxu2 %v8451_v0  ;;  %v6446_v39 = vld [vmem:[%s11587_s1 + $0x7ec] sm:$0xf0]  ;;  %v7548_v62 = vld [vmem:[%s11587_s1 + $0x7cc] sm:$0xf] }
  0xb9   : > { %2646 = vmatpush.bf16.msrb.mxu2 %v5529_v40  ;;  %2597 = vmatmul.bf16.vlgmr.msra.gmra.mxu3 %v8668_v13  ;;  %v6353_v40 = vor.u32 %v7527_v25, %v6350_v26  ;;  %v6449_v55 = vor.u32 %v7551_v38, %v6446_v39  ;;  %v7545_v25 = vld [vmem:[%s11587_s1 + $0x7b4] sm:$0xf]  ;;  %v6422_v26 = vld [vmem:[%s11587_s1 + $0x7bc] sm:$0xf0]  ;;  %v7304_v38 = vld [vmem:[%s11587_s1 + $0x28] sm:$0xf0] }
  0xba   : > { %2665 = vmatpush.bf16.msrb.mxu3 %v5625_v41  ;;  %2559 = vmatmul.bf16.vlgmr.msra.gmra.mxu1 %v8449_v63  ;;  %v5552_v39 = vld [vmem:[%s11587_s1 + $0xe0] sm:$0xf] }
  0xbb   : > { %2627 = vmatpush.bf16.msrb.mxu1 %v6485_v42  ;;  %v2275_v28 = vpop.f32.mrf.mxu2 }
  0xbc   : > { %2609 = vmatpush.bf16.msrb.mxu0 %v6377_v61  ;;  %v2294_v30 = vpop.f32.mrf.mxu3  ;;  %v2276_v36 = vadd.f32 %v2275_v28, %v2257_v10  ;;  %v2239_v37 = vpop.f32.mrf.mxu0  ;;  %v7334_v61 = vld [vmem:[%s11587_s1 + $0x118] sm:$0xf0]  ;;  %v6326_v10 = vld [vmem:[%s11587_s1 + $0x6fc] sm:$0xf0] }
  0xbd   : > { %2647 = vmatpush.bf16.msrb.mxu2 %v5517_v2  ;;  %v6434_v2 = vld [vmem:[%s11587_s1 + $0x7d4] sm:$0xf0]  ;;  %v5577_v6 = vor.u32 %v7334_v61, %v5576_v60  ;;  %v6329_v27 = vor.u32 %v7521_v9, %v6326_v10  ;;  %v5540_v60 = vld [vmem:[%s11587_s1 + $0xc8] sm:$0xf]  ;;  %v5720_v10 = vld [vmem:[%s11587_s1 + $0x230] sm:$0xf] }
  0xbe   : > { %2666 = vmatpush.bf16.msrb.mxu3 %v5613_v4  ;;  %v9153_v41 = vadd.f32 %v2294_v30, %v2276_v36  ;;  %v6341_v4 = vor.u32 %v7524_v46, %v6338_v47  ;;  %v6437_v16 = vor.u32 %v7548_v62, %v6434_v2  ;;  %v5456_v36 = vld [vmem:[%s11587_s1 + $0x20] sm:$0xf]  ;;  %v7515_v46 = vld [vmem:[%s11587_s1 + $0x6c4] sm:$0xf]  ;;  %v6302_v47 = vld [vmem:[%s11587_s1 + $0x6cc] sm:$0xf0] }
  0xbf   : > { %2628 = vmatpush.bf16.msrb.mxu1 %v6473_v12  ;;  %v2258_v42 = vpop.f32.mrf.mxu1  ;;  %v5468_v12 = vld [vmem:[%s11587_s1 + $0x38] sm:$0xf]  ;;  %v5457_v49 = vor.u32 %v7304_v38, %v5456_v36  ;;  %v7367_v38 = vld [vmem:[%s11587_s1 + $0x220] sm:$0xf0] }
  0xc0   : > { %2610 = vmatpush.bf16.msrb.mxu0 %v6365_v21  ;;  %v2259_v52 = vadd.f32 %v2258_v42, %v2239_v37  ;;  %v7331_v21 = vld [vmem:[%s11587_s1 + $0x100] sm:$0xf0]  ;;  %v6425_v37 = vor.u32 %v7545_v25, %v6422_v26  ;;  %v7542_v42 = vld [vmem:[%s11587_s1 + $0x79c] sm:$0xf]  ;;  %v5816_v26 = vld [vmem:[%s11587_s1 + $0x2f0] sm:$0xf] }
  0xc1   : > { %2648 = vmatpush.bf16.msrb.mxu2 %v5505_v22  ;;  %v5565_v33 = vor.u32 %v7331_v21, %v5564_v19  ;;  %v7442_v19 = vld [vmem:[%s11587_s1 + $0x478] sm:$0xf0] }
  0xc2   : > { %2667 = vmatpush.bf16.msrb.mxu3 %v5601_v23 }
  0xc3   : > { %2629 = vmatpush.bf16.msrb.mxu1 %v6461_v31  ;;  %v2277_v14 = vpop.f32.mrf.mxu2  ;;  %v5469_v31 = vor.u32 %v7307_v18, %v5468_v12  ;;  %v7370_v12 = vld [vmem:[%s11587_s1 + $0x238] sm:$0xf0]  ;;  %v6008_v18 = vld [vmem:[%s11587_s1 + $0x470] sm:$0xf] }
  0xc4   : > { %2611 = vmatpush.bf16.msrb.mxu0 %v6353_v40  ;;  %v2296_v15 = vpop.f32.mrf.mxu3  ;;  %v2278_v22 = vadd.f32 %v2277_v14, %v2259_v52  ;;  %v9197_v23 = vpop.f32.mrf.mxu0  ;;  %v7328_v40 = vld [vmem:[%s11587_s1 + $0xe8] sm:$0xf0]  ;;  %v5912_v14 = vld [vmem:[%s11587_s1 + $0x3b0] sm:$0xf] }
  0xc5   : > { %2649 = vmatpush.bf16.msrb.mxu2 %v5493_v43  ;;  %v6410_v43 = vld [vmem:[%s11587_s1 + $0x7a4] sm:$0xf0]  ;;  %v5553_v52 = vor.u32 %v7328_v40, %v5552_v39  ;;  %v5900_v39 = vld [vmem:[%s11587_s1 + $0x398] sm:$0xf] }
  0xc6   : > { %2668 = vmatpush.bf16.msrb.mxu3 %v5589_v45  ;;  %v9205_v28 = vadd.f32 %v2296_v15, %v2278_v22  ;;  %v6317_v45 = vor.u32 %v7518_v34, %v6314_v35  ;;  %v6413_v2 = vor.u32 %v7542_v42, %v6410_v43  ;;  %v6305_v15 = vor.u32 %v7515_v46, %v6302_v47  ;;  %v7415_v43 = vld [vmem:[%s11587_s1 + $0x3a0] sm:$0xf0] }
  0xc7   : > { %2630 = vmatpush.bf16.msrb.mxu1 %v6449_v55  ;;  %v9207_v30 = vpop.f32.mrf.mxu1  ;;  %2545 = vmatmul.bf16.gmra.mxu0 %v8575_v11  ;;  %v5444_v55 = vld [vmem:[%s11587_s1 + $0x8] sm:$0xf]  ;;  %v6009_v35 = vor.u32 %v7442_v19, %v6008_v18  ;;  %v7439_v46 = vld [vmem:[%s11587_s1 + $0x460] sm:$0xf0]  ;;  %v7388_v18 = vld [vmem:[%s11587_s1 + $0x2c8] sm:$0xf0] }
  0xc8   : > { %2612 = vmatpush.bf16.msrb.mxu0 %v6341_v4  ;;  %2583 = vmatmul.bf16.gmra.mxu2 %v8567_v8  ;;  %v7325_v4 = vld [vmem:[%s11587_s1 + $0xd0] sm:$0xf0]  ;;  %v5445_v22 = vor.u32 %v7301_v59, %v5444_v55 }
  0xc9   : > { %2650 = vmatpush.bf16.msrb.mxu2 %v5481_v5  ;;  %2602 = vmatmul.bf16.gmra.mxu3 %v8780_v24  ;;  %v7539_v5 = vld [vmem:[%s11587_s1 + $0x784] sm:$0xf]  ;;  %v5541_v25 = vor.u32 %v7325_v4, %v5540_v60  ;;  %v5901_v60 = vor.u32 %v7415_v43, %v5900_v39  ;;  %v5696_v4 = vld [vmem:[%s11587_s1 + $0x200] sm:$0xf]  ;;  %v5780_v43 = vld [vmem:[%s11587_s1 + $0x2a8] sm:$0xf] }
  0xca   : > { %2669 = vmatpush.bf16.msrb.mxu3 %v5577_v6  ;;  %2564 = vmatmul.bf16.gmra.mxu1 %v8565_v7  ;;  %v6398_v6 = vld [vmem:[%s11587_s1 + $0x78c] sm:$0xf0] }
  0xcb   : > { %2631 = vmatpush.bf16.msrb.mxu1 %v6437_v16  ;;  %v9252_v61 = vpop.f32.mrf.mxu2  ;;  %v7418_v16 = vld [vmem:[%s11587_s1 + $0x3b8] sm:$0xf0] }
  0xcc   : > { %2613 = vmatpush.bf16.msrb.mxu0 %v6329_v27  ;;  %v9254_v62 = vpop.f32.mrf.mxu3  ;;  %v9265_v9 = vpop.f32.mrf.mxu0  ;;  %v7394_v27 = vld [vmem:[%s11587_s1 + $0x2f8] sm:$0xf0]  ;;  %v5913_v34 = vor.u32 %v7418_v16, %v5912_v14  ;;  %v5984_v14 = vld [vmem:[%s11587_s1 + $0x440] sm:$0xf] }
  0xcd   : > { %2651 = vmatpush.bf16.msrb.mxu2 %v5469_v31  ;;  %v6401_v31 = vor.u32 %v7539_v5, %v6398_v6  ;;  %v5817_v36 = vor.u32 %v7394_v27, %v5816_v26  ;;  %v7364_v5 = vld [vmem:[%s11587_s1 + $0x208] sm:$0xf0]  ;;  %v5888_v6 = vld [vmem:[%s11587_s1 + $0x380] sm:$0xf]  ;;  %v5684_v26 = vld [vmem:[%s11587_s1 + $0x1e8] sm:$0xf] }
  0xce   : > { %2670 = vmatpush.bf16.msrb.mxu3 %v5565_v33  ;;  %v5721_v33 = vor.u32 %v7370_v12, %v5720_v10  ;;  %v7412_v12 = vld [vmem:[%s11587_s1 + $0x388] sm:$0xf0]  ;;  %v5792_v16 = vld [vmem:[%s11587_s1 + $0x2c0] sm:$0xf]  ;;  %v5697_v19 = vor.u32 %v7364_v5, %v5696_v4  ;;  %v7361_v27 = vld [vmem:[%s11587_s1 + $0x1f0] sm:$0xf0] }
  0xcf   : > { %2632 = vmatpush.bf16.msrb.mxu1 %v6425_v37  ;;  %v9285_v21 = vpop.f32.mrf.mxu1  ;;  %v5708_v37 = vld [vmem:[%s11587_s1 + $0x218] sm:$0xf]  ;;  %v5864_v4 = vld [vmem:[%s11587_s1 + $0x350] sm:$0xf] }
  0xd0   : > { %2614 = vmatpush.bf16.msrb.mxu0 %v6317_v45  ;;  %v5996_v45 = vld [vmem:[%s11587_s1 + $0x458] sm:$0xf]  ;;  %v5709_v55 = vor.u32 %v7367_v38, %v5708_v37  ;;  %v5972_v37 = vld [vmem:[%s11587_s1 + $0x428] sm:$0xf]  ;;  %v7433_v38 = vld [vmem:[%s11587_s1 + $0x430] sm:$0xf0] }
  0xd1   : > { %2652 = vmatpush.bf16.msrb.mxu2 %v5457_v49  ;;  %v5804_v49 = vld [vmem:[%s11587_s1 + $0x2d8] sm:$0xf] }
  0xd2   : > { %2671 = vmatpush.bf16.msrb.mxu3 %v5553_v52  ;;  %v7391_v52 = vld [vmem:[%s11587_s1 + $0x2e0] sm:$0xf0] }
  0xd3   : > { %2633 = vmatpush.bf16.msrb.mxu1 %v6413_v2  ;;  %v9302_v40 = vpop.f32.mrf.mxu2  ;;  %v5997_v2 = vor.u32 %v7439_v46, %v5996_v45  ;;  %v5805_v10 = vor.u32 %v7391_v52, %v5804_v49  ;;  %v7385_v45 = vld [vmem:[%s11587_s1 + $0x2b0] sm:$0xf0]  ;;  %v5685_v46 = vor.u32 %v7361_v27, %v5684_v26  ;;  %v5852_v26 = vld [vmem:[%s11587_s1 + $0x338] sm:$0xf] }
  0xd4   : > { %2615 = vmatpush.bf16.msrb.mxu0 %v6305_v15  ;;  %v9304_v42 = vpop.f32.mrf.mxu3  ;;  %v9315_v47 = vpop.f32.mrf.mxu0  ;;  %v7436_v15 = vld [vmem:[%s11587_s1 + $0x448] sm:$0xf0]  ;;  %v5781_v5 = vor.u32 %v7385_v45, %v5780_v43  ;;  %v5756_v45 = vld [vmem:[%s11587_s1 + $0x278] sm:$0xf] }
  0xd5   : > { %2653 = vmatpush.bf16.msrb.mxu2 %v5445_v22  ;;  %v5889_v22 = vor.u32 %v7412_v12, %v5888_v6  ;;  %v7406_v6 = vld [vmem:[%s11587_s1 + $0x358] sm:$0xf0] }
  0xd6   : > { %2672 = vmatpush.bf16.msrb.mxu3 %v5541_v25  ;;  %v5985_v25 = vor.u32 %v7436_v15, %v5984_v14  ;;  %v7430_v12 = vld [vmem:[%s11587_s1 + $0x418] sm:$0xf0]  ;;  %v5768_v14 = vld [vmem:[%s11587_s1 + $0x290] sm:$0xf] }
  0xd7   : > { %2634 = vmatpush.bf16.msrb.mxu1 %v6401_v31  ;;  %v9323_v59 = vpop.f32.mrf.mxu1  ;;  %2616 = vmatmul.bf16.vlgmr.msrb.gmra.mxu0 %v8687_v20  ;;  %v5876_v31 = vld [vmem:[%s11587_s1 + $0x368] sm:$0xf]  ;;  %v7382_v15 = vld [vmem:[%s11587_s1 + $0x298] sm:$0xf0] }
  0xd8   : > { %2684 = vmatpush.bf16.msra.mxu0 %v5721_v33  ;;  %2654 = vmatmul.bf16.vlgmr.msrb.gmra.mxu2 %v8198_v48 }
  0xd9   : > { %2722 = vmatpush.bf16.msra.mxu2 %v5913_v34  ;;  %2673 = vmatmul.bf16.vlgmr.msrb.gmra.mxu3 %v8215_v58 }
  0xda   : > { %2741 = vmatpush.bf16.msra.mxu3 %v6009_v35  ;;  %2635 = vmatmul.bf16.vlgmr.msrb.gmra.mxu1 %v8679_v17  ;;  %v5793_v35 = vor.u32 %v7388_v18, %v5792_v16  ;;  %v5865_v18 = vor.u32 %v7406_v6, %v5864_v4  ;;  %v5648_v4 = vld [vmem:[%s11587_s1 + $0x1a0] sm:$0xf] }
  0xdb   : > { %2703 = vmatpush.bf16.msra.mxu1 %v5817_v36  ;;  %v9362_v33 = vpop.f32.mrf.mxu2  ;;  %v7409_v36 = vld [vmem:[%s11587_s1 + $0x370] sm:$0xf0]  ;;  %v5840_v6 = vld [vmem:[%s11587_s1 + $0x320] sm:$0xf] }
  0xdc   : > { %2685 = vmatpush.bf16.msra.mxu0 %v5709_v55  ;;  %v9364_v34 = vpop.f32.mrf.mxu3  ;;  %v9375_v39 = vpop.f32.mrf.mxu0  ;;  %v5877_v52 = vor.u32 %v7409_v36, %v5876_v31  ;;  %v5973_v55 = vor.u32 %v7433_v38, %v5972_v37  ;;  %v7403_v36 = vld [vmem:[%s11587_s1 + $0x340] sm:$0xf0]  ;;  %v5948_v37 = vld [vmem:[%s11587_s1 + $0x3f8] sm:$0xf] }
  0xdd   : > { %2723 = vmatpush.bf16.msra.mxu2 %v5901_v60  ;;  %v5672_v60 = vld [vmem:[%s11587_s1 + $0x1d0] sm:$0xf]  ;;  %v7427_v38 = vld [vmem:[%s11587_s1 + $0x400] sm:$0xf0] }
  0xde   : > { %2742 = vmatpush.bf16.msra.mxu3 %v5997_v2  ;;  %v7358_v2 = vld [vmem:[%s11587_s1 + $0x1d8] sm:$0xf0] }
  0xdf   : > { %2704 = vmatpush.bf16.msra.mxu1 %v5805_v10  ;;  %v9383_v49 = vpop.f32.mrf.mxu1  ;;  %v5960_v10 = vld [vmem:[%s11587_s1 + $0x410] sm:$0xf]  ;;  %v5673_v16 = vor.u32 %v7358_v2, %v5672_v60  ;;  %v5853_v60 = vor.u32 %v7403_v36, %v5852_v26  ;;  %v5949_v2 = vor.u32 %v7427_v38, %v5948_v37  ;;  %v5828_v36 = vld [vmem:[%s11587_s1 + $0x308] sm:$0xf]  ;;  %v7397_v37 = vld [vmem:[%s11587_s1 + $0x310] sm:$0xf0] }
  0xe0   : > { %2686 = vmatpush.bf16.msra.mxu0 %v5697_v19  ;;  %v5961_v19 = vor.u32 %v7430_v12, %v5960_v10  ;;  %v7400_v12 = vld [vmem:[%s11587_s1 + $0x328] sm:$0xf0]  ;;  %v5924_v38 = vld [vmem:[%s11587_s1 + $0x3c8] sm:$0xf] }
  0xe1   : > { %2724 = vmatpush.bf16.msra.mxu2 %v5889_v22  ;;  %v5660_v22 = vld [vmem:[%s11587_s1 + $0x1b8] sm:$0xf]  ;;  %v5841_v26 = vor.u32 %v7400_v12, %v5840_v6  ;;  %v6104_v6 = vld [vmem:[%s11587_s1 + $0x530] sm:$0xf] }
  0xe2   : > { %2743 = vmatpush.bf16.msra.mxu3 %v5985_v25  ;;  %v7355_v25 = vld [vmem:[%s11587_s1 + $0x1c0] sm:$0xf0]  ;;  %v6296_v12 = vld [vmem:[%s11587_s1 + $0x6b0] sm:$0xf] }
  0xe3   : > { %2705 = vmatpush.bf16.msra.mxu1 %v5793_v35  ;;  %v9418_v27 = vpop.f32.mrf.mxu2  ;;  %v5769_v35 = vor.u32 %v7382_v15, %v5768_v14  ;;  %v5936_v14 = vld [vmem:[%s11587_s1 + $0x3e0] sm:$0xf]  ;;  %v7424_v15 = vld [vmem:[%s11587_s1 + $0x3e8] sm:$0xf0] }
  0xe4   : > { %2687 = vmatpush.bf16.msra.mxu0 %v5685_v46  ;;  %v9420_v31 = vpop.f32.mrf.mxu3  ;;  %v9431_v43 = vpop.f32.mrf.mxu0  ;;  %v7379_v46 = vld [vmem:[%s11587_s1 + $0x280] sm:$0xf0] }
  0xe5   : > { %2725 = vmatpush.bf16.msra.mxu2 %v5877_v52  ;;  %v5661_v52 = vor.u32 %v7355_v25, %v5660_v22  ;;  %v5757_v10 = vor.u32 %v7379_v46, %v5756_v45  ;;  %v5636_v22 = vld [vmem:[%s11587_s1 + $0x188] sm:$0xf]  ;;  %v7349_v25 = vld [vmem:[%s11587_s1 + $0x190] sm:$0xf0] }
  0xe6   : > { %2744 = vmatpush.bf16.msra.mxu3 %v5973_v55 }
  0xe7   : > { %2706 = vmatpush.bf16.msra.mxu1 %v5781_v5  ;;  %v9439_v55 = vpop.f32.mrf.mxu1  ;;  %v7352_v5 = vld [vmem:[%s11587_s1 + $0x1a8] sm:$0xf0]  ;;  %2621 = vmatmul.bf16.gmra.mxu0 %v8799_v32 }
  0xe8   : > { %2688 = vmatpush.bf16.msra.mxu0 %v5673_v16  ;;  %2659 = vmatmul.bf16.gmra.mxu2 %v8310_v44  ;;  %v5744_v16 = vld [vmem:[%s11587_s1 + $0x260] sm:$0xf] }
  0xe9   : > { %2726 = vmatpush.bf16.msra.mxu2 %v5865_v18  ;;  %2678 = vmatmul.bf16.gmra.mxu3 %v8331_v57  ;;  %v7376_v18 = vld [vmem:[%s11587_s1 + $0x268] sm:$0xf0]  ;;  %v5829_v57 = vor.u32 %v7397_v37, %v5828_v36  ;;  %v6092_v36 = vld [vmem:[%s11587_s1 + $0x518] sm:$0xf]  ;;  %v7463_v37 = vld [vmem:[%s11587_s1 + $0x520] sm:$0xf0] }
  0xea   : > { %2745 = vmatpush.bf16.msra.mxu3 %v5961_v19  ;;  %2640 = vmatmul.bf16.gmra.mxu1 %v8791_v29  ;;  %v5649_v19 = vor.u32 %v7352_v5, %v5648_v4  ;;  %v7373_v4 = vld [vmem:[%s11587_s1 + $0x250] sm:$0xf0] }
  0xeb   : > { %2707 = vmatpush.bf16.msra.mxu1 %v5769_v35  ;;  %v5937_v35 = vor.u32 %v7424_v15, %v5936_v14  ;;  %v9484_v45 = vpop.f32.mrf.mxu2  ;;  %v5637_v14 = vor.u32 %v7349_v25, %v5636_v22  ;;  %v7514_v15 = vld [vmem:[%s11587_s1 + $0x6b8] sm:$0xf0] }
  0xec   : > { %2689 = vmatpush.bf16.msra.mxu0 %v5661_v52  ;;  %v9486_v46 = vpop.f32.mrf.mxu3  ;;  %v5745_v52 = vor.u32 %v7376_v18, %v5744_v16  ;;  %v9497_v5 = vpop.f32.mrf.mxu0  ;;  %v6392_v16 = vld [vmem:[%s11587_s1 + $0x770] sm:$0xf]  ;;  %v7538_v18 = vld [vmem:[%s11587_s1 + $0x778] sm:$0xf0]  ;;  %v6297_v29 = vor.u32 %v7514_v15, %v6296_v12  ;;  %v6368_v15 = vld [vmem:[%s11587_s1 + $0x740] sm:$0xf] }
  0xed   : > { %2727 = vmatpush.bf16.msra.mxu2 %v5853_v60  ;;  %v7421_v60 = vld [vmem:[%s11587_s1 + $0x3d0] sm:$0xf0]  ;;  %v7490_v22 = vld [vmem:[%s11587_s1 + $0x5f8] sm:$0xf0]  ;;  %v6393_v17 = vor.u32 %v7538_v18, %v6392_v16  ;;  %v7532_v16 = vld [vmem:[%s11587_s1 + $0x748] sm:$0xf0] }
  0xee   : > { %2746 = vmatpush.bf16.msra.mxu3 %v5949_v2  ;;  %v5732_v2 = vld [vmem:[%s11587_s1 + $0x248] sm:$0xf]  ;;  %v5925_v48 = vor.u32 %v7421_v60, %v5924_v38  ;;  %v6284_v38 = vld [vmem:[%s11587_s1 + $0x698] sm:$0xf]  ;;  %v6093_v60 = vor.u32 %v7463_v37, %v6092_v36  ;;  %v7505_v37 = vld [vmem:[%s11587_s1 + $0x670] sm:$0xf0] }
  0xef   : > { %2708 = vmatpush.bf16.msra.mxu1 %v5757_v10  ;;  %v7466_v10 = vld [vmem:[%s11587_s1 + $0x538] sm:$0xf0]  ;;  %v9517_v58 = vpop.f32.mrf.mxu1  ;;  %v5733_v25 = vor.u32 %v7373_v4, %v5732_v2  ;;  %v6260_v36 = vld [vmem:[%s11587_s1 + $0x668] sm:$0xf] }
  0xf0   : > { %2690 = vmatpush.bf16.msra.mxu0 %v5649_v19  ;;  %v6200_v19 = vld [vmem:[%s11587_s1 + $0x5f0] sm:$0xf]  ;;  %v6105_v44 = vor.u32 %v7466_v10, %v6104_v6 }
  0xf1   : > { %2728 = vmatpush.bf16.msra.mxu2 %v5841_v26  ;;  %v6201_v8 = vor.u32 %v7490_v22, %v6200_v19  ;;  %v2314_v26 = vadd.f32 %v9315_v47, %v9153_v41 }
  0xf2   : > { %2747 = vmatpush.bf16.msra.mxu3 %v5937_v35  ;;  %v2316_v35 = vadd.f32 %v9375_v39, %v9205_v28  ;;  %v7535_v28 = vld [vmem:[%s11587_s1 + $0x760] sm:$0xf0]  ;;  %v6188_v39 = vld [vmem:[%s11587_s1 + $0x5d8] sm:$0xf] }
  0xf3   : > { %2709 = vmatpush.bf16.msra.mxu1 %v5745_v52  ;;  %v9538_v52 = vpop.f32.mrf.mxu2  ;;  %v2333_v2 = vadd.f32 %v9323_v59, %v2314_v26  ;;  %v2262_v59 = vadd.f32 %v9207_v30, %v9197_v23  ;;  %v6176_v23 = vld [vmem:[%s11587_s1 + $0x5c0] sm:$0xf]  ;;  %v7484_v30 = vld [vmem:[%s11587_s1 + $0x5c8] sm:$0xf0]  ;;  %v6369_v26 = vor.u32 %v7532_v16, %v6368_v15  ;;  %v7526_v15 = vld [vmem:[%s11587_s1 + $0x718] sm:$0xf0] }
  0xf4   : > { %2691 = vmatpush.bf16.msra.mxu0 %v5637_v14  ;;  %v9540_v41 = vpop.f32.mrf.mxu3  ;;  %v2389_v47 = vpop.f32.mrf.mxu0  ;;  %v2335_v4 = vadd.f32 %v9383_v49, %v2316_v35  ;;  %v7508_v14 = vld [vmem:[%s11587_s1 + $0x688] sm:$0xf0]  ;;  %v7457_v35 = vld [vmem:[%s11587_s1 + $0x4f0] sm:$0xf0] }
  0xf5   : > { %2729 = vmatpush.bf16.msra.mxu2 %v5829_v57  ;;  %v6380_v57 = vld [vmem:[%s11587_s1 + $0x758] sm:$0xf]  ;;  %v2352_v18 = vadd.f32 %v9362_v33, %v2333_v2  ;;  %v6068_v33 = vld [vmem:[%s11587_s1 + $0x4e8] sm:$0xf] }
  0xf6   : > { %2748 = vmatpush.bf16.msra.mxu3 %v5925_v48  ;;  %v7511_v48 = vld [vmem:[%s11587_s1 + $0x6a0] sm:$0xf0]  ;;  %v6381_v12 = vor.u32 %v7535_v28, %v6380_v57  ;;  %v2354_v19 = vadd.f32 %v9418_v27, %v2335_v4  ;;  %v2264_v27 = vadd.f32 %v9285_v21, %v9265_v9  ;;  %v6177_v21 = vor.u32 %v7484_v30, %v6176_v23  ;;  %v6356_v57 = vld [vmem:[%s11587_s1 + $0x728] sm:$0xf]  ;;  %v7529_v28 = vld [vmem:[%s11587_s1 + $0x730] sm:$0xf0] }
  0xf7   : > { %2710 = vmatpush.bf16.msra.mxu1 %v5733_v25  ;;  %v9559_v6 = vpop.f32.mrf.mxu1  ;;  %v6285_v10 = vor.u32 %v7511_v48, %v6284_v38  ;;  %2692 = vmatmul.bf16.vlgmr.msra.gmra.mxu0 %v8205_v53  ;;  %v2281_v38 = vadd.f32 %v9252_v61, %v2262_v59  ;;  %v6164_v2 = vld [vmem:[%s11587_s1 + $0x5a8] sm:$0xf]  ;;  %v7481_v4 = vld [vmem:[%s11587_s1 + $0x5b0] sm:$0xf0]  ;;  %v6357_v59 = vor.u32 %v7529_v28, %v6356_v57  ;;  %v7478_v23 = vld [vmem:[%s11587_s1 + $0x598] sm:$0xf0] }
  0xf8   : > { %2760 = vmatpush.bf16.msrb.mxu0 %v6105_v44  ;;  %v7487_v44 = vld [vmem:[%s11587_s1 + $0x5e0] sm:$0xf0]  ;;  %2730 = vmatmul.bf16.vlgmr.msra.gmra.mxu2 %v8438_v56 }
  0xf9   : > { %2798 = vmatpush.bf16.msrb.mxu2 %v6297_v29  ;;  %v7460_v29 = vld [vmem:[%s11587_s1 + $0x508] sm:$0xf0]  ;;  %v6189_v49 = vor.u32 %v7487_v44, %v6188_v39  ;;  %2749 = vmatmul.bf16.vlgmr.msra.gmra.mxu3 %v8459_v3  ;;  %v2283_v39 = vadd.f32 %v9302_v40, %v2264_v27  ;;  %v2371_v44 = vadd.f32 %v9364_v34, %v2352_v18  ;;  %v6056_v40 = vld [vmem:[%s11587_s1 + $0x4d0] sm:$0xf]  ;;  %v7454_v34 = vld [vmem:[%s11587_s1 + $0x4d8] sm:$0xf0] }
  0xfa   : > { %2817 = vmatpush.bf16.msrb.mxu3 %v6393_v17  ;;  %v6080_v17 = vld [vmem:[%s11587_s1 + $0x500] sm:$0xf]  ;;  %2711 = vmatmul.bf16.vlgmr.msra.gmra.mxu1 %v8207_v54  ;;  %v2300_v16 = vadd.f32 %v9254_v62, %v2281_v38  ;;  %v6044_v62 = vld [vmem:[%s11587_s1 + $0x4b8] sm:$0xf] }
  0xfb   : > { %2779 = vmatpush.bf16.msrb.mxu1 %v6201_v8  ;;  %v6272_v8 = vld [vmem:[%s11587_s1 + $0x680] sm:$0xf]  ;;  %v6081_v22 = vor.u32 %v7460_v29, %v6080_v17  ;;  %v2427_v48 = vpop.f32.mrf.mxu2  ;;  %v2390_v17 = vadd.f32 %v2389_v47, %v2371_v44  ;;  %v6165_v47 = vor.u32 %v7481_v4, %v6164_v2  ;;  %v2302_v18 = vadd.f32 %v9304_v42, %v2283_v39  ;;  %v6140_v44 = vld [vmem:[%s11587_s1 + $0x578] sm:$0xf] }
  0xfc   : > { %2761 = vmatpush.bf16.msrb.mxu0 %v6093_v60  ;;  %v6273_v25 = vor.u32 %v7508_v14, %v6272_v8  ;;  %v9608_v9 = vpop.f32.mrf.mxu3  ;;  %v2373_v60 = vadd.f32 %v9420_v31, %v2354_v19  ;;  %v2391_v61 = vpop.f32.mrf.mxu0  ;;  %v6248_v31 = vld [vmem:[%s11587_s1 + $0x650] sm:$0xf]  ;;  %v2319_v30 = vadd.f32 %v9431_v43, %v2300_v16  ;;  %v6236_v43 = vld [vmem:[%s11587_s1 + $0x638] sm:$0xf] }
  0xfd   : > { %2799 = vmatpush.bf16.msrb.mxu2 %v6285_v10  ;;  %v6069_v10 = vor.u32 %v7457_v35, %v6068_v33  ;;  %v6344_v14 = vld [vmem:[%s11587_s1 + $0x710] sm:$0xf]  ;;  %v2321_v42 = vadd.f32 %v9497_v5, %v2302_v18  ;;  %v7451_v35 = vld [vmem:[%s11587_s1 + $0x4c0] sm:$0xf0]  ;;  %v7445_v18 = vld [vmem:[%s11587_s1 + $0x490] sm:$0xf0] }
  0xfe   : > { %2818 = vmatpush.bf16.msrb.mxu3 %v6381_v12  ;;  %v6261_v12 = vor.u32 %v7505_v37, %v6260_v36  ;;  %v2392_v29 = vadd.f32 %v2391_v61, %v2373_v60  ;;  %v6152_v19 = vld [vmem:[%s11587_s1 + $0x590] sm:$0xf]  ;;  %v6345_v27 = vor.u32 %v7526_v15, %v6344_v14  ;;  %v7499_v36 = vld [vmem:[%s11587_s1 + $0x640] sm:$0xf0]  ;;  %v2338_v61 = vadd.f32 %v9439_v55, %v2319_v30  ;;  %v7448_v55 = vld [vmem:[%s11587_s1 + $0x4a8] sm:$0xf0] }
  0xff   : > { %2780 = vmatpush.bf16.msrb.mxu1 %v6189_v49  ;;  %v2410_v8 = vpop.f32.mrf.mxu1  ;;  %v7502_v49 = vld [vmem:[%s11587_s1 + $0x658] sm:$0xf0]  ;;  %v6153_v5 = vor.u32 %v7478_v23, %v6152_v19  ;;  %v7475_v60 = vld [vmem:[%s11587_s1 + $0x580] sm:$0xf0]  ;;  %v6045_v2 = vor.u32 %v7451_v35, %v6044_v62  ;;  %v6237_v4 = vor.u32 %v7499_v36, %v6236_v43  ;;  %v6128_v14 = vld [vmem:[%s11587_s1 + $0x560] sm:$0xf] }
 0x100   : > { %2762 = vmatpush.bf16.msrb.mxu0 %v6081_v22  ;;  %v6057_v22 = vor.u32 %v7454_v34, %v6056_v40  ;;  %v6249_v33 = vor.u32 %v7502_v49, %v6248_v31  ;;  %v6032_v34 = vld [vmem:[%s11587_s1 + $0x4a0] sm:$0xf]  ;;  %v7472_v15 = vld [vmem:[%s11587_s1 + $0x568] sm:$0xf0]  ;;  %v6212_v19 = vld [vmem:[%s11587_s1 + $0x608] sm:$0xf] }
 0x101   : > { %2800 = vmatpush.bf16.msrb.mxu2 %v6273_v25  ;;  %v2409_v25 = vadd.f32 %v9559_v6, %v2390_v17  ;;  %v6332_v6 = vld [vmem:[%s11587_s1 + $0x6f8] sm:$0xf]  ;;  %v6224_v31 = vld [vmem:[%s11587_s1 + $0x620] sm:$0xf]  ;;  %v7496_v17 = vld [vmem:[%s11587_s1 + $0x628] sm:$0xf0]  ;;  %v6033_v16 = vor.u32 %v7448_v55, %v6032_v34 }
 0x102   : > { %2819 = vmatpush.bf16.msrb.mxu3 %v6369_v26  ;;  %v2411_v26 = vadd.f32 %v2410_v8, %v2392_v29  ;;  %v6320_v29 = vld [vmem:[%s11587_s1 + $0x6e0] sm:$0xf]  ;;  %v7520_v8 = vld [vmem:[%s11587_s1 + $0x6e8] sm:$0xf0]  ;;  %v7493_v23 = vld [vmem:[%s11587_s1 + $0x610] sm:$0xf0] }
 0x103   : > { %2781 = vmatpush.bf16.msrb.mxu1 %v6177_v21  ;;  %v2429_v37 = vpop.f32.mrf.mxu2  ;;  %v7523_v21 = vld [vmem:[%s11587_s1 + $0x700] sm:$0xf0]  ;;  %v9674_v57 = vadd.f32 %v2427_v48, %v2409_v25  ;;  %v7517_v62 = vld [vmem:[%s11587_s1 + $0x6d0] sm:$0xf0]  ;;  %v6488_v36 = vld [vmem:[%s11587_s1 + $0x830] sm:$0xf] }
 0x104   : > { %2763 = vmatpush.bf16.msrb.mxu0 %v6069_v10  ;;  %v9666_v38 = vpop.f32.mrf.mxu3  ;;  %v9676_v28 = vadd.f32 %v2429_v37, %v2411_v26  ;;  %v2394_v39 = vpop.f32.mrf.mxu0  ;;  %v2340_v10 = vadd.f32 %v9517_v58, %v2321_v42  ;;  %v6333_v40 = vor.u32 %v7523_v21, %v6332_v6  ;;  %v6141_v58 = vor.u32 %v7475_v60, %v6140_v44  ;;  %v6116_v42 = vld [vmem:[%s11587_s1 + $0x548] sm:$0xf]  ;;  %v7469_v43 = vld [vmem:[%s11587_s1 + $0x550] sm:$0xf0]  ;;  %v7562_v37 = vld [vmem:[%s11587_s1 + $0x838] sm:$0xf0] }
 0x105   : > { %2801 = vmatpush.bf16.msrb.mxu2 %v6261_v12  ;;  %v6213_v6 = vor.u32 %v7493_v23, %v6212_v19  ;;  %v6117_v60 = vor.u32 %v7469_v43, %v6116_v42  ;;  %v6416_v43 = vld [vmem:[%s11587_s1 + $0x7a0] sm:$0xf] }
 0x106   : > { %2820 = vmatpush.bf16.msrb.mxu3 %v6357_v59  ;;  %v2859_v48 = vpack.c.bf16 %v9676_v28, %v9674_v57  ;;  %v2357_v59 = vadd.f32 %v9484_v45, %v2338_v61  ;;  %v2359_v49 = vadd.f32 %v9538_v52, %v2340_v10  ;;  %v6020_v45 = vld [vmem:[%s11587_s1 + $0x488] sm:$0xf]  ;;  %v6225_v52 = vor.u32 %v7496_v17, %v6224_v31  ;;  %v6476_v10 = vld [vmem:[%s11587_s1 + $0x818] sm:$0xf]  ;;  %v7547_v28 = vld [vmem:[%s11587_s1 + $0x7c0] sm:$0xf0] }
 0x107   : > { %2782 = vmatpush.bf16.msrb.mxu1 %v6165_v47  ;;  %v2413_v12 = vpop.f32.mrf.mxu1  ;;  %2697 = vmatmul.bf16.gmra.mxu0 %v8321_v50  ;;  %v6321_v47 = vor.u32 %v7520_v8, %v6320_v29  ;;  %v6489_v61 = vor.u32 %v7562_v37, %v6488_v36  ;;  %v6428_v57 = vld [vmem:[%s11587_s1 + $0x7b8] sm:$0xf]  ;;  %v7544_v36 = vld [vmem:[%s11587_s1 + $0x7a8] sm:$0xf0] }
 0x108   : > { %2764 = vmatpush.bf16.msrb.mxu0 %v6057_v22  ;;  %2735 = vmatmul.bf16.gmra.mxu2 %v8554_v1  ;;  %v2376_v25 = vadd.f32 %v9486_v46, %v2357_v59  ;;  %v2378_v26 = vadd.f32 %v9540_v41, %v2359_v49  ;;  %v6464_v59 = vld [vmem:[%s11587_s1 + $0x800] sm:$0xf]  ;;  %v7556_v49 = vld [vmem:[%s11587_s1 + $0x808] sm:$0xf0]  ;;  %v6417_v37 = vor.u32 %v7544_v36, %v6416_v43 }
 0x109   : > { %2802 = vmatpush.bf16.msrb.mxu2 %v6249_v33  ;;  %2754 = vmatmul.bf16.gmra.mxu3 %v8575_v11  ;;  %v6129_v33 = vor.u32 %v7472_v15, %v6128_v14  ;;  %v6452_v15 = vld [vmem:[%s11587_s1 + $0x7e8] sm:$0xf] }
 0x10a   : > { %2821 = vmatpush.bf16.msrb.mxu3 %v6345_v27  ;;  %2716 = vmatmul.bf16.gmra.mxu1 %v8323_v51  ;;  %v6308_v27 = vld [vmem:[%s11587_s1 + $0x6c8] sm:$0xf]  ;;  %v2395_v21 = vadd.f32 %v2394_v39, %v2376_v25  ;;  %v7559_v39 = vld [vmem:[%s11587_s1 + $0x820] sm:$0xf0] }
 0x10b   : > { %2783 = vmatpush.bf16.msrb.mxu1 %v6153_v5  ;;  %v2432_v30 = vpop.f32.mrf.mxu2  ;;  %v6021_v5 = vor.u32 %v7445_v18, %v6020_v45  ;;  %v6309_v41 = vor.u32 %v7517_v62, %v6308_v27  ;;  %v6477_v17 = vor.u32 %v7559_v39, %v6476_v10  ;;  %v7550_v27 = vld [vmem:[%s11587_s1 + $0x7d8] sm:$0xf0] }
 0x10c   : > { %2765 = vmatpush.bf16.msrb.mxu0 %v6045_v2  ;;  %v9730_v22 = vpop.f32.mrf.mxu3  ;;  %v2396_v35 = vpop.f32.mrf.mxu0  ;;  %v2414_v2 = vadd.f32 %v2413_v12, %v2395_v21  ;;  %v7541_v21 = vld [vmem:[%s11587_s1 + $0x790] sm:$0xf0] }
 0x10d   : > { %2803 = vmatpush.bf16.msrb.mxu2 %v6237_v4  ;;  %v2397_v46 = vadd.f32 %v2396_v35, %v2378_v26  ;;  %v6429_v26 = vor.u32 %v7547_v28, %v6428_v57 }
 0x10e   : > { %2822 = vmatpush.bf16.msrb.mxu3 %v6333_v40  ;;  %v2433_v55 = vadd.f32 %v2432_v30, %v2414_v2 }
 0x10f   : > { %2784 = vmatpush.bf16.msrb.mxu1 %v6141_v58  ;;  %v2415_v44 = vpop.f32.mrf.mxu1 }
 0x110   : > { %2766 = vmatpush.bf16.msrb.mxu0 %v6033_v16  ;;  %v2416_v4 = vadd.f32 %v2415_v44, %v2397_v46  ;;  %v7553_v16 = vld [vmem:[%s11587_s1 + $0x7f0] sm:$0xf0] }
 0x111   : > { %2804 = vmatpush.bf16.msrb.mxu2 %v6225_v52  ;;  %v6453_v19 = vor.u32 %v7553_v16, %v6452_v15 }
 0x112   : > { %2823 = vmatpush.bf16.msrb.mxu3 %v6321_v47 }
 0x113   : > { %2785 = vmatpush.bf16.msrb.mxu1 %v6129_v33  ;;  %v2434_v40 = vpop.f32.mrf.mxu2  ;;  %v6440_v33 = vld [vmem:[%s11587_s1 + $0x7d0] sm:$0xf] }
 0x114   : > { %2767 = vmatpush.bf16.msrb.mxu0 %v6021_v5  ;;  %v9758_v34 = vpop.f32.mrf.mxu3  ;;  %v2435_v31 = vadd.f32 %v2434_v40, %v2416_v4  ;;  %v2465_v58 = vpop.f32.mrf.mxu0  ;;  %v6441_v62 = vor.u32 %v7550_v27, %v6440_v33  ;;  %v11623_v5 = vld [vmem:[#allocation9_spill] sm:$0xff]  ;;  %v11624_v40 = vld [vmem:[#allocation11_spill] sm:$0xff] }
 0x115   : > { %2805 = vmatpush.bf16.msrb.mxu2 %v6213_v6  ;;  %v2466_v12 = vadd.f32 %v2465_v58, %v9608_v9  ;;  %v6465_v9 = vor.u32 %v7556_v49, %v6464_v59  ;;  %v6404_v6 = vld [vmem:[%s11587_s1 + $0x788] sm:$0xf] }
 0x116   : > { %2824 = vmatpush.bf16.msrb.mxu3 %v6309_v41  ;;  %v2862_v29 = vpack.c.bf16 %v2435_v31, %v2433_v55  ;;  %v11625_v55 = vld [vmem:[#allocation13_spill] sm:$0xff] }
 0x117   : > { %2786 = vmatpush.bf16.msrb.mxu1 %v6117_v60  ;;  %v2484_v8 = vpop.f32.mrf.mxu1  ;;  %2768 = vmatmul.bf16.vlgmr.msrb.gmra.mxu0 %v8449_v63  ;;  %v6405_v60 = vor.u32 %v7541_v21, %v6404_v6 }
 0x118   : > { %2836 = vmatpush.bf16.msra.mxu0 %v6489_v61  ;;  %v2485_v14 = vadd.f32 %v2484_v8, %v2466_v12  ;;  %2806 = vmatmul.bf16.vlgmr.msrb.gmra.mxu2 %v8668_v13 }
 0x119   : > { %2825 = vmatmul.bf16.vlgmr.msrb.gmra.mxu3 %v8687_v20 }
 0x11a   : > { %7745 = vmatpush.bf16.msra.mxu3 %v6489_v61  ;;  %2787 = vmatmul.bf16.vlgmr.msrb.gmra.mxu1 %v8451_v0 }
 0x11b   : > { %2912 = vmatpush.bf16.msra.mxu1 %v2862_v29  ;;  %v2503_v45 = vpop.f32.mrf.mxu2 }
 0x11c   : > { %2837 = vmatpush.bf16.msra.mxu0 %v6477_v17  ;;  %v2522_v52 = vpop.f32.mrf.mxu3  ;;  %v2504_v47 = vadd.f32 %v2503_v45, %v2485_v14  ;;  %v2467_v18 = vpop.f32.mrf.mxu0 }
 0x11d   : > { %v2468_v49 = vadd.f32 %v2467_v18, %v9666_v38 }
 0x11e   : > { %7746 = vmatpush.bf16.msra.mxu3 %v6477_v17  ;;  %v2523_v23 = vadd.f32 %v2522_v52, %v2504_v47 }
 0x11f   : > { %2913 = vmatpush.bf16.msra.mxu1 %v2859_v48  ;;  %v2486_v30 = vpop.f32.mrf.mxu1 }
 0x120   : > { %2838 = vmatpush.bf16.msra.mxu0 %v6465_v9 }
 0x122   : > { %7747 = vmatpush.bf16.msra.mxu3 %v6465_v9  ;;  %v2487_v9 = vadd.f32 %v2486_v30, %v2468_v49 }
 0x123   : > { %v2505_v48 = vpop.f32.mrf.mxu2 }
 0x124   : > { %2839 = vmatpush.bf16.msra.mxu0 %v6453_v19  ;;  %v2524_v42 = vpop.f32.mrf.mxu3  ;;  %v2470_v25 = vpop.f32.mrf.mxu0  ;;  %v2506_v15 = vadd.f32 %v2505_v48, %v2487_v9 }
 0x126   : > { %7748 = vmatpush.bf16.msra.mxu3 %v6453_v19  ;;  %v2525_v19 = vadd.f32 %v2524_v42, %v2506_v15 }
 0x127   : > { %v2489_v35 = vpop.f32.mrf.mxu1  ;;  %2773 = vmatmul.bf16.gmra.mxu0 %v8565_v7 }
 0x128   : > { %2840 = vmatpush.bf16.msra.mxu0 %v6441_v62  ;;  %2811 = vmatmul.bf16.gmra.mxu2 %v8780_v24 }
 0x129   : > { %2830 = vmatmul.bf16.gmra.mxu3 %v8799_v32 }
 0x12a   : > { %7749 = vmatpush.bf16.msra.mxu3 %v6441_v62  ;;  %2792 = vmatmul.bf16.gmra.mxu1 %v11623_v5  ;;  %v2471_v62 = vadd.f32 %v2470_v25, %v9730_v22 }
 0x12b   : > { %v2508_v46 = vpop.f32.mrf.mxu2 }
 0x12c   : > { %2841 = vmatpush.bf16.msra.mxu0 %v6429_v26  ;;  %v2527_v44 = vpop.f32.mrf.mxu3  ;;  %v2472_v41 = vpop.f32.mrf.mxu0  ;;  %v2490_v30 = vadd.f32 %v2489_v35, %v2471_v62 }
 0x12d   : > { %v2473_v36 = vadd.f32 %v2472_v41, %v9758_v34 }
 0x12e   : > { %7750 = vmatpush.bf16.msra.mxu3 %v6429_v26  ;;  %v2509_v6 = vadd.f32 %v2508_v46, %v2490_v30 }
 0x12f   : > { %v2491_v61 = vpop.f32.mrf.mxu1 }
 0x130   : > { %2842 = vmatpush.bf16.msra.mxu0 %v6417_v37  ;;  %v2492_v21 = vadd.f32 %v2491_v61, %v2473_v36 }
 0x132   : > { %7751 = vmatpush.bf16.msra.mxu3 %v6417_v37 }
 0x133   : > { %v2510_v2 = vpop.f32.mrf.mxu2 }
 0x134   : > { %2843 = vmatpush.bf16.msra.mxu0 %v6405_v60  ;;  %v2529_v4 = vpop.f32.mrf.mxu3  ;;  %v2541_v10 = vpop.f32.mrf.mxu0  ;;  %v2511_v49 = vadd.f32 %v2510_v2, %v2492_v21 }
 0x135   : > { %v2542_v33 = vadd.f32 %v2541_v10, %v2523_v23 }
 0x136   : > { %7752 = vmatpush.bf16.msra.mxu3 %v6405_v60 }
 0x137   : > { %v2560_v39 = vpop.f32.mrf.mxu1  ;;  %2844 = vmatmul.bf16.vlgmr.msra.gmra.mxu0 %v11624_v40 }
 0x138   : > { %v2561_v57 = vadd.f32 %v2560_v39, %v2542_v33  ;;  %v2528_v39 = vadd.f32 %v2527_v44, %v2509_v6 }
 0x139   : > { %2849 = vmatmul.bf16.vlgmr.msra.gmra.mxu3 %v11625_v55 }
 0x13b   : > { %v2579_v31 = vpop.f32.mrf.mxu2 }
 0x13c   : > { %v2598_v58 = vpop.f32.mrf.mxu3  ;;  %v2543_v12 = vpop.f32.mrf.mxu0  ;;  %v2580_v37 = vadd.f32 %v2579_v31, %v2561_v57 }
 0x13d   : > { %v2544_v27 = vadd.f32 %v2543_v12, %v2525_v19  ;;  %v2530_v19 = vadd.f32 %v2529_v4, %v2511_v49 }
 0x13e   : > { %v2599_v60 = vadd.f32 %v2598_v58, %v2580_v37 }
 0x13f   : > { %v2562_v17 = vpop.f32.mrf.mxu1 }
 0x140   : > { %v2563_v38 = vadd.f32 %v2562_v17, %v2544_v27 }
 0x143   : > { %v2581_v29 = vpop.f32.mrf.mxu2 }
 0x144   : > { %v2600_v8 = vpop.f32.mrf.mxu3  ;;  %v2546_v59 = vpop.f32.mrf.mxu0  ;;  %v2582_v48 = vadd.f32 %v2581_v29, %v2563_v38 }
 0x145   : > { %v2547_v34 = vadd.f32 %v2546_v59, %v2528_v39 }
 0x146   : > { %v2601_v42 = vadd.f32 %v2600_v8, %v2582_v48 }
 0x147   : > { %v2565_v14 = vpop.f32.mrf.mxu1 }
 0x148   : > { %v2566_v29 = vadd.f32 %v2565_v14, %v2547_v34 }
 0x14b   : > { %v2584_v16 = vpop.f32.mrf.mxu2 }
 0x14c   : > { %v2603_v45 = vpop.f32.mrf.mxu3  ;;  %v2548_v52 = vpop.f32.mrf.mxu0  ;;  %v2585_v58 = vadd.f32 %v2584_v16, %v2566_v29  ;;  %v2865_v29 = vld [vmem:[%s11590_s4] sm:$0xff] }
 0x14d   : > { %v2549_v17 = vadd.f32 %v2548_v52, %v2530_v19 }
 0x14e   : > { %v2604_v62 = vadd.f32 %v2603_v45, %v2585_v58  ;;  %v9820_v45 = vld [vmem:[%s11589_s3] sm:$0xff] }
 0x14f   : > { %v2567_v47 = vpop.f32.mrf.mxu1  ;;  %6498 = vmatmul.msk.bf16.vlgmr.msra.gmra.mxu1 %vm2899_vm0, %v9820_v45 }
 0x150   : > { %v2568_v8 = vadd.f32 %v2567_v47, %v2549_v17  ;;  %v7865_v17 = vmov 0  }
 0x151   : > { %7798 = vset.pattern.permute.xlu0 %v7865_v17  ;;  %7799 = vset.pattern.permute.xlu1 %v7865_v17 }
 0x152   : > { %2871 = vperm.xlu1 %7799, %v2865_v29   ;;  %7800 = vset.pattern.permute.xlu2 %v7865_v17 }
 0x153   : > { %v2586_v28 = vpop.f32.mrf.mxu2 }
 0x154   : > { %v2605_v26 = vpop.f32.mrf.mxu3  ;;  %v2617_v43 = vpop.f32.mrf.mxu0  ;;  %v2587_v27 = vadd.f32 %v2586_v28, %v2568_v8 }
 0x155   : > { %v2618_v23 = vadd.f32 %v2617_v43, %v2599_v60 }
 0x156   : > { %v2606_v44 = vadd.f32 %v2605_v26, %v2587_v27  ;;  %v2868_v27 = vld [vmem:[%s11590_s4 + $0x18] sm:$0xff] }
 0x157   : > { %v2636_v18 = vpop.f32.mrf.mxu1 }
 0x158   : > { %v2637_v41 = vadd.f32 %v2636_v18, %v2618_v23 }
 0x15b   : > { %v2655_v10 = vpop.f32.mrf.mxu2 }
 0x15c   : > { %v2674_v12 = vpop.f32.mrf.mxu3  ;;  %v2619_v25 = vpop.f32.mrf.mxu0 }
 0x15d   : > { %v2675_v22 = vadd.f32 %v2674_v12, %v2655_v10  ;;  %v2620_v9 = vadd.f32 %v2619_v25, %v2601_v42  ;;  %v9831_v25 = vld [vmem:[%s11589_s3 + $0x8] sm:$0xff] }
 0x15f   : > { %v2638_v15 = vpop.f32.mrf.mxu1  ;;  %6499 = vmatmul.msk.bf16.gmra.mxu1 %vm2899_vm0, %v9831_v25 }
 0x160   : > { %v2639_v31 = vadd.f32 %v2638_v15, %v2620_v9 }
 0x162   : > { %v2860_v35 = vpack.c.bf16 %v2639_v31, %v2637_v41 }
 0x163   : > { %v9813_v46 = vpop.f32.mrf.mxu2 }
 0x164   : > { %v9815_v61 = vpop.f32.mrf.mxu3  ;;  %v2622_v2 = vpop.f32.mrf.mxu0 }
 0x165   : > { %v2623_v57 = vadd.f32 %v2622_v2, %v2604_v62  ;;  %v2866_v62 = vld [vmem:[%s11590_s4 + $0x8] sm:$0xff] }
 0x166   : > { %2876 = vperm.xlu1 %7799, %v2866_v62  }
 0x167   : > { %v2641_v33 = vpop.f32.mrf.mxu1 }
 0x168   : > { %v2642_v52 = vadd.f32 %v2641_v33, %v2623_v57 }
 0x16b   : > { %v2660_v43 = vpop.f32.mrf.mxu2 }
 0x16c   : > { %v2679_v4 = vpop.f32.mrf.mxu3  ;;  %v2624_v59 = vpop.f32.mrf.mxu0 }
 0x16d   : > { %v2625_v36 = vadd.f32 %v2624_v59, %v2606_v44 }
 0x16f   : > { %v2643_v37 = vpop.f32.mrf.mxu1 }
 0x170   : > { %v2644_v38 = vadd.f32 %v2643_v37, %v2625_v36  ;;  %v2680_v37 = vadd.f32 %v2679_v4, %v2660_v43 }
 0x172   : > { %v2863_v14 = vpack.c.bf16 %v2644_v38, %v2642_v52 }
 0x173   : > { %v2662_v18 = vpop.f32.mrf.mxu2 }
 0x174   : > { %v2681_v30 = vpop.f32.mrf.mxu3  ;;  %2931 = vmatpush.bf16.msra.mxu2 %v2863_v14  ;;  %v2693_v48 = vpop.f32.mrf.mxu0  ;;  %v2677_v14 = vadd.f32 %v9815_v61, %v9813_v46 }
 0x175   : > { %v2694_v6 = vadd.f32 %v2693_v48, %v2675_v22  ;;  %v2682_v52 = vadd.f32 %v2681_v30, %v2662_v18 }
 0x177   : > { %v2712_v16 = vpop.f32.mrf.mxu1 }
 0x178   : > { %2932 = vmatpush.bf16.msra.mxu2 %v2860_v35  ;;  %v2713_v47 = vadd.f32 %v2712_v16, %v2694_v6  ;;  %v2867_v35 = vld [vmem:[%s11590_s4 + $0x10] sm:$0xff] }
 0x179   : > { %2881 = vperm.xlu0 %7798, %v2867_v35  }
 0x17b   : > { %v2731_v28 = vpop.f32.mrf.mxu2  ;;  %6500 = vmatmul.msk.bf16.vlgmr.msra.gmra.mxu2 %vm2899_vm0, %v9820_v45 }
 0x17c   : > { %v2750_v26 = vpop.f32.mrf.mxu3  ;;  %v2732_v21 = vadd.f32 %v2731_v28, %v2713_v47  ;;  %v2695_v60 = vpop.f32.mrf.mxu0 }
 0x17d   : > { %v2696_v16 = vadd.f32 %v2695_v60, %v2677_v14 }
 0x17e   : > { %v9826_v49 = vadd.f32 %v2750_v26, %v2732_v21 }
 0x17f   : > { %v2714_v42 = vpop.f32.mrf.mxu1 }
 0x180   : > { %v2715_v35 = vadd.f32 %v2714_v42, %v2696_v16 }
 0x181   : > { %2886 = vperm.xlu0 %7798, %v2868_v27  }
 0x183   : > { %v2733_v23 = vpop.f32.mrf.mxu2 }
 0x184   : > { %v2752_v10 = vpop.f32.mrf.mxu3  ;;  %v2698_v12 = vpop.f32.mrf.mxu0  ;;  %v2734_v20 = vadd.f32 %v2733_v23, %v2715_v35  ;;  %v5109_v23 = vld [vmem:[%s11594_s8 + $0x10] sm:$0xff] }
 0x185   : > { %v2699_v48 = vadd.f32 %v2698_v12, %v2680_v37 }
 0x186   : > { %v2753_v4 = vadd.f32 %v2752_v10, %v2734_v20  ;;  %v5110_v20 = vld [vmem:[%s11594_s8 + $0x18] sm:$0xff] }
 0x187   : > { %v2717_v22 = vpop.f32.mrf.mxu1  ;;  %5128 = vperm.xlu1 %7799, %v5110_v20   ;;  %v2985_v20 = vld [vmem:[%s11591_s5 + $0x50] sm:$0xff] }
 0x188   : > { %v2718_v26 = vadd.f32 %v2717_v22, %v2699_v48 }
 0x189   : > { %5123 = vperm.xlu0 %7798, %v5109_v23  }
 0x18b   : > { %v2736_v39 = vpop.f32.mrf.mxu2  ;;  %6501 = vmatmul.msk.bf16.gmra.mxu2 %vm2899_vm0, %v9831_v25 }
 0x18c   : > { %v2755_v9 = vpop.f32.mrf.mxu3  ;;  %v2700_v15 = vpop.f32.mrf.mxu0  ;;  %v2737_v29 = vadd.f32 %v2736_v39, %v2718_v26 }
 0x18d   : > { %v2701_v6 = vadd.f32 %v2700_v15, %v2682_v52 }
 0x18e   : > { %v2756_v32 = vadd.f32 %v2755_v9, %v2737_v29 }
 0x18f   : > { %v2719_v19 = vpop.f32.mrf.mxu1 }
 0x190   : > { %v2720_v21 = vadd.f32 %v2719_v19, %v2701_v6 }
 0x193   : > { %v2738_v34 = vpop.f32.mrf.mxu2 }
 0x194   : > { %v2757_v41 = vpop.f32.mrf.mxu3  ;;  %v2769_v31 = vpop.f32.mrf.mxu0  ;;  %v2739_v27 = vadd.f32 %v2738_v34, %v2720_v21 }
 0x195   : > { %v2770_v15 = vadd.f32 %v2769_v31, %v9826_v49 }
 0x196   : > { %v2758_v43 = vadd.f32 %v2757_v41, %v2739_v27 }
 0x197   : > { %v2788_v2 = vpop.f32.mrf.mxu1 }
 0x19b   : > { %v2807_v33 = vpop.f32.mrf.mxu2 }
 0x19c   : > { %v2826_v58 = vpop.f32.mrf.mxu3  ;;  %v2771_v8 = vpop.f32.mrf.mxu0 }
 0x19d   : > { %v2772_v61 = vadd.f32 %v2771_v8, %v2753_v4 }
 0x19f   : > { %v2790_v57 = vpop.f32.mrf.mxu1 }
 0x1a0   : > { %v2791_v37 = vadd.f32 %v2790_v57, %v2772_v61  ;;  %v2978_v61 = vld [vmem:[%s11591_s5 + $0x18] sm:$0xff] }
 0x1a3   : > { %v2809_v36 = vpop.f32.mrf.mxu2 }
 0x1a4   : > { %v2828_v44 = vpop.f32.mrf.mxu3  ;;  %v2774_v59 = vpop.f32.mrf.mxu0  ;;  %v2810_v10 = vadd.f32 %v2809_v36, %v2791_v37  ;;  %v2982_v37 = vld [vmem:[%s11591_s5 + $0x38] sm:$0xff] }
 0x1a5   : > { %v2775_v18 = vadd.f32 %v2774_v59, %v2756_v32  ;;  %v2789_v32 = vadd.f32 %v2788_v2, %v2770_v15 }
 0x1a6   : > { %v2829_v31 = vadd.f32 %v2828_v44, %v2810_v10 }
 0x1a7   : > { %v2793_v47 = vpop.f32.mrf.mxu1  ;;  %v2808_v9 = vadd.f32 %v2807_v33, %v2789_v32 }
 0x1a8   : > { %v2794_v22 = vadd.f32 %v2793_v47, %v2775_v18  ;;  %v2975_v18 = vld [vmem:[%s11591_s5] sm:$0xff] }
 0x1a9   : > { %v2827_v59 = vadd.f32 %v2826_v58, %v2808_v9 }
 0x1ab   : > { %v2812_v17 = vpop.f32.mrf.mxu2 }
 0x1ac   : > { %v2831_v38 = vpop.f32.mrf.mxu3  ;;  %v2776_v28 = vpop.f32.mrf.mxu0  ;;  %v2813_v42 = vadd.f32 %v2812_v17, %v2794_v22  ;;  %v2981_v17 = vld [vmem:[%s11591_s5 + $0x30] sm:$0xff] }
 0x1ad   : > { %v2777_v30 = vadd.f32 %v2776_v28, %v2758_v43  ;;  %v2984_v43 = vld [vmem:[%s11591_s5 + $0x48] sm:$0xff] }
 0x1ae   : > { %v2832_v34 = vadd.f32 %v2831_v38, %v2813_v42 }
 0x1af   : > { %v2795_v13 = vpop.f32.mrf.mxu1 }
 0x1b0   : > { %v2796_v19 = vadd.f32 %v2795_v13, %v2777_v30 }
 0x1b3   : > { %v2814_v12 = vpop.f32.mrf.mxu2 }
 0x1b4   : > { %v2833_v62 = vpop.f32.mrf.mxu3  ;;  %v2845_v46 = vpop.f32.mrf.mxu0  ;;  %v2815_v39 = vadd.f32 %v2814_v12, %v2796_v19 }
 0x1b5   : > { %v2846_v48 = vadd.f32 %v2845_v46, %v2827_v59 }
 0x1b6   : > { %v2834_v49 = vadd.f32 %v2833_v62, %v2815_v39 }
 0x1bc   : > { %v2850_v60 = vpop.f32.mrf.mxu3  ;;  %v2847_v41 = vpop.f32.mrf.mxu0 }
 0x1bd   : > { %v2851_v8 = vadd.f32 %v2850_v60, %v2832_v34  ;;  %v2848_v52 = vadd.f32 %v2847_v41, %v2829_v31 }
 0x1bf   : > { %v2861_v6 = vpack.c.bf16 %v2848_v52, %v2846_v48  ;;  %v2976_v52 = vld [vmem:[%s11591_s5 + $0x8] sm:$0xff] }
 0x1c4   : > { %v2852_v13 = vpop.f32.mrf.mxu3  ;;  %v2872_v47 = vpop.permute.xlu1 %2871 }
 0x1c5   : > { %v2853_v57 = vadd.f32 %v2852_v13, %v2834_v49  ;;  %v9883_v49 = vld [vmem:[%s11592_s6] sm:$0xff]  ;;  %v9890_v13 = vld [vmem:[%s11592_s6 + $0x8] sm:$0xff] }
 0x1c7   : > { %v2864_v14 = vpack.c.bf16 %v2853_v57, %v2851_v8 }
 0x1c9   : > { %2950 = vmatpush.bf16.msrb.mxu3 %v2864_v14  ;;  %v2979_v14 = vld [vmem:[%s11591_s5 + $0x20] sm:$0xff] }
 0x1cc   : > { %v2915_v2 = vpop.f32.mrf.mxu1 }
 0x1cd   : > { %2951 = vmatpush.bf16.msrb.mxu3 %v2861_v6  ;;  %v2916_v28 = vadd.f32 %v2915_v2, %v2872_v47 }
 0x1cf   : > { %v2963_v29 = vmax.f32 %v2916_v28, 0.0 }
 0x1d0   : > { %6502 = vmatmul.msk.bf16.vlgmr.msrb.gmra.mxu3 %vm2899_vm0, %v9820_v45 }
 0x1d1   : > { %v2987_v15 = vmul.f32 %v2975_v18, %v2963_v29  ;;  %v2980_v18 = vld [vmem:[%s11591_s5 + $0x28] sm:$0xff] }
 0x1d4   : > { %v2917_v36 = vpop.f32.mrf.mxu1 }
 0x1dc   : > { %v2920_v16 = vpop.f32.mrf.mxu1 }
 0x1e0   : > { %6503 = vmatmul.msk.bf16.gmra.mxu3 %vm2899_vm0, %v9831_v25  ;;  %v2877_v25 = vpop.permute.xlu1 %2876 }
 0x1e1   : > { %v2918_v4 = vadd.f32 %v2917_v36, %v2877_v25 }
 0x1e3   : > { %v2966_v12 = vmax.f32 %v2918_v4, 0.0 }
 0x1e4   : > { %v2922_v45 = vpop.f32.mrf.mxu1 }
 0x1e5   : > { %v2990_v19 = vmul.f32 %v2978_v61, %v2966_v12 }
 0x1e7   : > { %v3003_v32 = vpack.c.bf16 %v2990_v19, %v2987_v15  ;;  %v2977_v15 = vld [vmem:[%s11591_s5 + $0x10] sm:$0xff] }
 0x1eb   : > { %v2882_v44 = vpop.permute.xlu0 %2881 }
 0x1ec   : > { %v2921_v58 = vadd.f32 %v2920_v16, %v2882_v44 }
 0x1ee   : > { %v2969_v21 = vmax.f32 %v2921_v58, 0.0 }
 0x1f0   : > { %v2993_v30 = vmul.f32 %v2981_v17, %v2969_v21  ;;  %v7651_v21 = vld [vmem:[%s11588_s2 + $0x290] sm:$0xf0] }
 0x1f3   : > { %v2887_v35 = vpop.permute.xlu0 %2886 }
 0x1f4   : > { %v2923_v27 = vadd.f32 %v2922_v45, %v2887_v35 }
 0x1f6   : > { %v2972_v46 = vmax.f32 %v2923_v27, 0.0 }
 0x1f8   : > { %v2996_v60 = vmul.f32 %v2984_v43, %v2972_v46  ;;  %v2986_v43 = vld [vmem:[%s11591_s5 + $0x58] sm:$0xff]  ;;  %v7629_v46 = vld [vmem:[%s11588_s2 + $0x1e0] sm:$0xf0] }
 0x1fa   : > { %v3006_v39 = vpack.c.bf16 %v2996_v60, %v2993_v30  ;;  %v6740_v30 = vld [vmem:[%s11588_s2 + $0x1b8] sm:$0xf] }
 0x1fc   : > { %3031 = vmatpush.bf16.msrb.mxu0 %v3006_v39  ;;  %v6741_v39 = vor.u32 %v7629_v46, %v6740_v30  ;;  %v7734_v30 = vld [vmem:[%s11588_s2 + $0x52c] sm:$0xf] }
 0x1fe   : > { %v2934_v33 = vpop.f32.mrf.mxu2 }
 0x1ff   : > { %v2935_v31 = vadd.f32 %v2934_v33, %v2872_v47 }
 0x200   : > { %3032 = vmatpush.bf16.msrb.mxu0 %v3003_v32 }
 0x201   : > { %v2964_v57 = vmax.f32 %v2935_v31, 0.0 }
 0x203   : > { %6512 = vmatmul.msk.bf16.vlgmr.msrb.gmra.mxu0 %vm2899_vm0, %v9883_v49  ;;  %v2988_v48 = vmul.f32 %v2976_v52, %v2964_v57  ;;  %v7607_v57 = vld [vmem:[%s11588_s2 + $0x130] sm:$0xf0]  ;;  %v7624_v52 = vld [vmem:[%s11588_s2 + $0x1bc] sm:$0xf] }
 0x206   : > { %v2936_v38 = vpop.f32.mrf.mxu2 }
 0x207   : > { %v2937_v8 = vadd.f32 %v2936_v38, %v2877_v25 }
 0x209   : > { %v2967_v59 = vmax.f32 %v2937_v8, 0.0  ;;  %v6652_v8 = vld [vmem:[%s11588_s2 + $0x108] sm:$0xf] }
 0x20b   : > { %v2991_v6 = vmul.f32 %v2979_v14, %v2967_v59  ;;  %v6742_v14 = vld [vmem:[%s11588_s2 + $0x1e4] sm:$0xf0] }
 0x20d   : > { %v3004_v2 = vpack.c.bf16 %v2991_v6, %v2988_v48  ;;  %v6653_v48 = vor.u32 %v7607_v57, %v6652_v8  ;;  %v6745_v6 = vor.u32 %v7624_v52, %v6742_v14  ;;  %v7094_v57 = vld [vmem:[%s11588_s2 + $0x4a4] sm:$0xf0]  ;;  %v7729_v52 = vld [vmem:[%s11588_s2 + $0x500] sm:$0xf0] }
 0x20e   : > { %v2939_v26 = vpop.f32.mrf.mxu2 }
 0x20f   : > { %v2940_v62 = vadd.f32 %v2939_v26, %v2882_v44  ;;  %v6828_v26 = vld [vmem:[%s11588_s2 + $0x268] sm:$0xf] }
 0x210   : > { %v6829_v27 = vor.u32 %v7651_v21, %v6828_v26  ;;  %v7602_v26 = vld [vmem:[%s11588_s2 + $0x10c] sm:$0xf]  ;;  %v6654_v21 = vld [vmem:[%s11588_s2 + $0x134] sm:$0xf0] }
 0x211   : > { %v2970_v22 = vmax.f32 %v2940_v62, 0.0  ;;  %v6784_v62 = vld [vmem:[%s11588_s2 + $0x210] sm:$0xf] }
 0x212   : > { %4255 = vmatpush.bf16.msra.mxu3 %v6829_v27  ;;  %v6610_v27 = vld [vmem:[%s11588_s2 + $0xdc] sm:$0xf0] }
 0x213   : > { %v2994_v10 = vmul.f32 %v2982_v37, %v2970_v22  ;;  %6513 = vmatmul.msk.bf16.gmra.mxu0 %vm2899_vm0, %v9890_v13  ;;  %v7646_v37 = vld [vmem:[%s11588_s2 + $0x26c] sm:$0xf] }
 0x216   : > { %v2941_v42 = vpop.f32.mrf.mxu2 }
 0x217   : > { %v2942_v23 = vadd.f32 %v2941_v42, %v2887_v35  ;;  %v6830_v42 = vld [vmem:[%s11588_s2 + $0x294] sm:$0xf0] }
 0x219   : > { %v2973_v9 = vmax.f32 %v2942_v23, 0.0  ;;  %v6696_v23 = vld [vmem:[%s11588_s2 + $0x160] sm:$0xf] }
 0x21b   : > { %v2997_v34 = vmul.f32 %v2985_v20, %v2973_v9  ;;  %v7618_v20 = vld [vmem:[%s11588_s2 + $0x188] sm:$0xf0] }
 0x21c   : > { %v6697_v31 = vor.u32 %v7618_v20, %v6696_v23  ;;  %v7138_v20 = vld [vmem:[%s11588_s2 + $0x4fc] sm:$0xf0] }
 0x21d   : > { %v3007_v41 = vpack.c.bf16 %v2997_v34, %v2994_v10  ;;  %v6833_v10 = vor.u32 %v7646_v37, %v6830_v42  ;;  %v7635_v34 = vld [vmem:[%s11588_s2 + $0x214] sm:$0xf]  ;;  %v7136_v37 = vld [vmem:[%s11588_s2 + $0x4d0] sm:$0xf]  ;;  %v7728_v42 = vld [vmem:[%s11588_s2 + $0x4f8] sm:$0xf0] }
 0x21e   : > { %v7137_v23 = vor.u32 %v7728_v42, %v7136_v37  ;;  %v6968_v42 = vld [vmem:[%s11588_s2 + $0x378] sm:$0xf] }
 0x21f   : > { %3050 = vmatpush.bf16.msrb.mxu1 %v3007_v41  ;;  %v6786_v41 = vld [vmem:[%s11588_s2 + $0x23c] sm:$0xf0] }
 0x220   : > { %v6789_v59 = vor.u32 %v7635_v34, %v6786_v41  ;;  %v7717_v34 = vld [vmem:[%s11588_s2 + $0x4a0] sm:$0xf0]  ;;  %v7712_v41 = vld [vmem:[%s11588_s2 + $0x47c] sm:$0xf] }
 0x221   : > { %v7097_v14 = vor.u32 %v7712_v41, %v7094_v57  ;;  %v6872_v41 = vld [vmem:[%s11588_s2 + $0x2c0] sm:$0xf] }
 0x223   : > { %3051 = vmatpush.bf16.msrb.mxu1 %v3004_v2  ;;  %v7613_v2 = vld [vmem:[%s11588_s2 + $0x164] sm:$0xf] }
 0x226   : > { %6514 = vmatmul.msk.bf16.vlgmr.msrb.gmra.mxu1 %vm2899_vm0, %v9883_v49 }
 0x236   : > { %6515 = vmatmul.msk.bf16.gmra.mxu1 %vm2899_vm0, %v9890_v13 }
 0x253   : > { %v2953_v33 = vpop.f32.mrf.mxu3 }
 0x254   : > { %v2954_v17 = vadd.f32 %v2953_v33, %v2872_v47  ;;  %v6698_v33 = vld [vmem:[%s11588_s2 + $0x18c] sm:$0xf0] }
 0x256   : > { %v2965_v61 = vmax.f32 %v2954_v17, 0.0 }
 0x258   : > { %v2989_v32 = vmul.f32 %v2977_v15, %v2965_v61  ;;  %v7182_v61 = vld [vmem:[%s11588_s2 + $0x554] sm:$0xf0]  ;;  %v7569_v15 = vld [vmem:[%s11588_s2 + $0x4] sm:$0xf] }
 0x25b   : > { %v2955_v36 = vpop.f32.mrf.mxu3 }
 0x25c   : > { %v2956_v58 = vadd.f32 %v2955_v36, %v2877_v25  ;;  %v2983_v25 = vld [vmem:[%s11591_s5 + $0x40] sm:$0xff]  ;;  %v6608_v36 = vld [vmem:[%s11588_s2 + $0xb0] sm:$0xf] }
 0x25e   : > { %v2968_v47 = vmax.f32 %v2956_v58, 0.0  ;;  %v7585_v58 = vld [vmem:[%s11588_s2 + $0x80] sm:$0xf0] }
 0x260   : > { %v2992_v22 = vmul.f32 %v2980_v18, %v2968_v47  ;;  %v6566_v47 = vld [vmem:[%s11588_s2 + $0x84] sm:$0xf0]  ;;  %v7739_v18 = vld [vmem:[%s11588_s2 + $0x550] sm:$0xf0] }
 0x262   : > { %v3005_v9 = vpack.c.bf16 %v2992_v22, %v2989_v32  ;;  %v6522_v22 = vld [vmem:[%s11588_s2 + $0x2c] sm:$0xf0] }
 0x263   : > { %v2958_v38 = vpop.f32.mrf.mxu3  ;;  %v6525_v32 = vor.u32 %v7569_v15, %v6522_v22  ;;  %v7673_v15 = vld [vmem:[%s11588_s2 + $0x340] sm:$0xf0]  ;;  %v7668_v22 = vld [vmem:[%s11588_s2 + $0x31c] sm:$0xf] }
 0x264   : > { %v2959_v16 = vadd.f32 %v2958_v38, %v2882_v44  ;;  %v7640_v44 = vld [vmem:[%s11588_s2 + $0x238] sm:$0xf0] }
 0x265   : > { %v7596_v38 = vld [vmem:[%s11588_s2 + $0xd8] sm:$0xf0] }
 0x266   : > { %v2971_v45 = vmax.f32 %v2959_v16, 0.0  ;;  %v6564_v16 = vld [vmem:[%s11588_s2 + $0x58] sm:$0xf] }
 0x267   : > { %v6565_v17 = vor.u32 %v7585_v58, %v6564_v16  ;;  %v7050_v16 = vld [vmem:[%s11588_s2 + $0x44c] sm:$0xf0] }
 0x268   : > { %v2995_v12 = vmul.f32 %v2983_v25, %v2971_v45  ;;  %v6657_v45 = vor.u32 %v7602_v26, %v6654_v21  ;;  %v7004_v26 = vld [vmem:[%s11588_s2 + $0x3c8] sm:$0xf]  ;;  %v7695_v21 = vld [vmem:[%s11588_s2 + $0x3f0] sm:$0xf0] }
 0x26b   : > { %v2960_v28 = vpop.f32.mrf.mxu3 }
 0x26c   : > { %v2961_v29 = vadd.f32 %v2960_v28, %v2887_v35  ;;  %v6785_v35 = vor.u32 %v7640_v44, %v6784_v62  ;;  %v6701_v28 = vor.u32 %v7613_v2, %v6698_v33  ;;  %v6520_v62 = vld [vmem:[%s11588_s2] sm:$0xf]  ;;  %v7574_v44 = vld [vmem:[%s11588_s2 + $0x28] sm:$0xf0] }
 0x26d   : > { %v7718_v2 = vld [vmem:[%s11588_s2 + $0x4a8] sm:$0xf0]  ;;  %v7048_v33 = vld [vmem:[%s11588_s2 + $0x420] sm:$0xf] }
 0x26e   : > { %v2974_v4 = vmax.f32 %v2961_v29, 0.0  ;;  %4256 = vmatpush.bf16.msra.mxu3 %v6785_v35  ;;  %v7591_v29 = vld [vmem:[%s11588_s2 + $0xb4] sm:$0xf]  ;;  %v7180_v35 = vld [vmem:[%s11588_s2 + $0x528] sm:$0xf] }
 0x26f   : > { %v6613_v25 = vor.u32 %v7591_v29, %v6610_v27  ;;  %v7181_v46 = vor.u32 %v7739_v18, %v7180_v35  ;;  %v7707_v29 = vld [vmem:[%s11588_s2 + $0x450] sm:$0xf0]  ;;  %v7005_v27 = vor.u32 %v7695_v21, %v7004_v26  ;;  %v6960_v35 = vld [vmem:[%s11588_s2 + $0x370] sm:$0xf]  ;;  %v7684_v18 = vld [vmem:[%s11588_s2 + $0x398] sm:$0xf0] }
 0x270   : > { %v2998_v60 = vmul.f32 %v2986_v43, %v2974_v4  ;;  %v7580_v43 = vld [vmem:[%s11588_s2 + $0x5c] sm:$0xf]  ;;  %v6521_v4 = vor.u32 %v7574_v44, %v6520_v62  ;;  %v7006_v62 = vld [vmem:[%s11588_s2 + $0x3f4] sm:$0xf0] }
 0x271   : > { %4274 = vmatpush.bf16.msra.mxu0 %v7181_v46  ;;  %v6961_v46 = vor.u32 %v7684_v18, %v6960_v35 }
 0x272   : > { %v3008_v19 = vpack.c.bf16 %v2998_v60, %v2995_v12  ;;  %4257 = vmatpush.bf16.msra.mxu3 %v6741_v39  ;;  %v7185_v12 = vor.u32 %v7734_v30, %v7182_v61  ;;  %v6569_v60 = vor.u32 %v7580_v43, %v6566_v47  ;;  %v7723_v39 = vld [vmem:[%s11588_s2 + $0x4d4] sm:$0xf]  ;;  %v7012_v43 = vld [vmem:[%s11588_s2 + $0x3d0] sm:$0xf]  ;;  %v7696_v47 = vld [vmem:[%s11588_s2 + $0x3f8] sm:$0xf0] }
 0x273   : > { %v7679_v30 = vld [vmem:[%s11588_s2 + $0x374] sm:$0xf]  ;;  %v6962_v61 = vld [vmem:[%s11588_s2 + $0x39c] sm:$0xf0] }
 0x274   : > { %3069 = vmatpush.bf16.msrb.mxu2 %v3008_v19  ;;  %v7740_v19 = vld [vmem:[%s11588_s2 + $0x558] sm:$0xf0] }
 0x275   : > { %4275 = vmatpush.bf16.msra.mxu0 %v7137_v23 }
 0x276   : > { %4258 = vmatpush.bf16.msra.mxu3 %v6697_v31 }
 0x278   : > { %3070 = vmatpush.bf16.msrb.mxu2 %v3005_v9  ;;  %v7092_v9 = vld [vmem:[%s11588_s2 + $0x478] sm:$0xf] }
 0x279   : > { %v7093_v8 = vor.u32 %v7717_v34, %v7092_v9  ;;  %v7674_v9 = vld [vmem:[%s11588_s2 + $0x348] sm:$0xf0] }
 0x27a   : > { %4259 = vmatpush.bf16.msra.mxu3 %v6653_v48 }
 0x27b   : > { %6516 = vmatmul.msk.bf16.vlgmr.msrb.gmra.mxu2 %vm2899_vm0, %v9883_v49  ;;  %v6609_v49 = vor.u32 %v7596_v38, %v6608_v36  ;;  %4276 = vmatpush.bf16.msra.mxu0 %v7093_v8  ;;  %v7706_v36 = vld [vmem:[%s11588_s2 + $0x448] sm:$0xf0]  ;;  %v7701_v38 = vld [vmem:[%s11588_s2 + $0x424] sm:$0xf] }
 0x27c   : > { %4312 = vmatpush.bf16.msra.mxu2 %v6833_v10  ;;  %v7141_v10 = vor.u32 %v7723_v39, %v7138_v20  ;;  %v7685_v39 = vld [vmem:[%s11588_s2 + $0x3a0] sm:$0xf0] }
 0x27d   : > { %v7657_v8 = vld [vmem:[%s11588_s2 + $0x2c4] sm:$0xf] }
 0x27e   : > { %4260 = vmatpush.bf16.msra.mxu3 %v6609_v49  ;;  %v7049_v49 = vor.u32 %v7706_v36, %v7048_v33 }
 0x280   : > { %4313 = vmatpush.bf16.msra.mxu2 %v6789_v59  ;;  %v7144_v59 = vld [vmem:[%s11588_s2 + $0x4d8] sm:$0xf]  ;;  %4277 = vmatpush.bf16.msra.mxu0 %v7049_v49 }
 0x281   : > { %v7145_v48 = vor.u32 %v7729_v52, %v7144_v59  ;;  %v6874_v59 = vld [vmem:[%s11588_s2 + $0x2ec] sm:$0xf0] }
 0x282   : > { %4261 = vmatpush.bf16.msra.mxu3 %v6565_v17  ;;  %v7690_v17 = vld [vmem:[%s11588_s2 + $0x3cc] sm:$0xf]  ;;  %v6877_v52 = vor.u32 %v7657_v8, %v6874_v59  ;;  %v6800_v8 = vld [vmem:[%s11588_s2 + $0x220] sm:$0xf] }
 0x283   : > { %v7009_v44 = vor.u32 %v7690_v17, %v7006_v62  ;;  %v3284_v17 = vld [vmem:[%s11588_s2 + $0x580] sm:$0x33] }
 0x284   : > { %4314 = vmatpush.bf16.msra.mxu2 %v6745_v6  ;;  %v7100_v6 = vld [vmem:[%s11588_s2 + $0x480] sm:$0xf]  ;;  %4278 = vmatpush.bf16.msra.mxu0 %v7005_v27  ;;  %v3285_v27 = vld [vmem:[%s11588_s2 + $0x588] sm:$0x33]  ;;  %v3841_v62 = vunpack.c.h.b16 %v3284_v17 }
 0x285   : > { %v7101_v58 = vor.u32 %v7718_v2, %v7100_v6  ;;  %v7663_v6 = vld [vmem:[%s11588_s2 + $0x2f0] sm:$0xf0] }
 0x286   : > { %4262 = vmatpush.bf16.msra.mxu3 %v6521_v4  ;;  %v3034_v4 = vpop.f32.mrf.mxu0 }
 0x288   : > { %4315 = vmatpush.bf16.msra.mxu2 %v6701_v28  ;;  %v7053_v28 = vor.u32 %v7701_v38, %v7050_v16  ;;  %4279 = vmatpush.bf16.msra.mxu0 %v6961_v46 }
 0x28a   : > { %4331 = vmatpush.bf16.msrb.mxu3 %v7185_v12  ;;  %v6965_v12 = vor.u32 %v7679_v30, %v6962_v61  ;;  %v6836_v61 = vld [vmem:[%s11588_s2 + $0x270] sm:$0xf] }
 0x28b   : > { %6517 = vmatmul.msk.bf16.gmra.mxu2 %vm2899_vm0, %v9890_v13  ;;  %v7188_v13 = vld [vmem:[%s11588_s2 + $0x530] sm:$0xf] }
 0x28c   : > { %4316 = vmatpush.bf16.msra.mxu2 %v6657_v45  ;;  %v7189_v31 = vor.u32 %v7740_v19, %v7188_v13  ;;  %v7056_v45 = vld [vmem:[%s11588_s2 + $0x428] sm:$0xf]  ;;  %v7013_v13 = vor.u32 %v7696_v47, %v7012_v43  ;;  %v4028_v47 = vpack.c.b16 %v3841_v62, %v3841_v62 }
 0x28d   : > { %v6918_v19 = vld [vmem:[%s11588_s2 + $0x344] sm:$0xf0] }
 0x28e   : > { %4332 = vmatpush.bf16.msrb.mxu3 %v7141_v10  ;;  %v6921_v23 = vor.u32 %v7668_v22, %v6918_v19  ;;  %v3036_v20 = vpop.f32.mrf.mxu0  ;;  %v6924_v10 = vld [vmem:[%s11588_s2 + $0x320] sm:$0xf]  ;;  %v4226_v18 = vsel %vm4221_vm1, %v4028_v47, 0  ;;  %v7653_v19 = vld [vmem:[%s11588_s2 + $0x2a0] sm:$0xf0] }
 0x28f   : > { %v10142_v34 = vpack.c.bf16 %v3036_v20, %v3034_v4  ;;  %v6838_v22 = vld [vmem:[%s11588_s2 + $0x29c] sm:$0xf0] }
 0x290   : > { %4317 = vmatpush.bf16.msra.mxu2 %v6613_v25  ;;  %v7057_v25 = vor.u32 %v7707_v29, %v7056_v45  ;;  %v3840_v45 = vunpack.c.l.b16 %v3284_v17  ;;  %v7631_v17 = vld [vmem:[%s11588_s2 + $0x1f0] sm:$0xf0] }
 0x291   : > { %4263 = vmatmul.bf16.vlgmr.msra.gmra.mxu3 %v10142_v34 }
 0x292   : > { %4333 = vmatpush.bf16.msrb.mxu3 %v7097_v14  ;;  %v6925_v14 = vor.u32 %v7674_v9, %v6924_v10  ;;  %v4027_v29 = vpack.c.b16 %v3840_v45, %v3840_v45  ;;  %v7641_v10 = vld [vmem:[%s11588_s2 + $0x240] sm:$0xf0]  ;;  %v7636_v9 = vld [vmem:[%s11588_s2 + $0x21c] sm:$0xf]  ;;  %v7626_v45 = vld [vmem:[%s11588_s2 + $0x1cc] sm:$0xf] }
 0x294   : > { %4318 = vmatpush.bf16.msra.mxu2 %v6569_v60  ;;  %v6916_v60 = vld [vmem:[%s11588_s2 + $0x318] sm:$0xf]  ;;  %v4223_v43 = vsel %vm4221_vm1, %v4027_v29, 0 }
 0x295   : > { %v6917_v37 = vor.u32 %v7673_v15, %v6916_v60  ;;  %4300 = vmatpush.bf16.msra.mxu1 %v4223_v43  ;;  %v7647_v60 = vld [vmem:[%s11588_s2 + $0x274] sm:$0xf]  ;;  %v7614_v43 = vld [vmem:[%s11588_s2 + $0x16c] sm:$0xf] }
 0x296   : > { %4334 = vmatpush.bf16.msrb.mxu3 %v7053_v28  ;;  %v3039_v2 = vpop.f32.mrf.mxu0 }
 0x297   : > { %4280 = vmatpush.bf16.msra.mxu0 %v6917_v37  ;;  %v6841_v37 = vor.u32 %v7647_v60, %v6838_v22  ;;  %v7608_v22 = vld [vmem:[%s11588_s2 + $0x138] sm:$0xf0] }
 0x298   : > { %4319 = vmatpush.bf16.msra.mxu2 %v6525_v32  ;;  %v6969_v32 = vor.u32 %v7685_v39, %v6968_v42  ;;  %v7648_v39 = vld [vmem:[%s11588_s2 + $0x27c] sm:$0xf] }
 0x29a   : > { %4335 = vmatpush.bf16.msrb.mxu3 %v7009_v44  ;;  %v3842_v44 = vunpack.c.l.b16 %v3285_v27 }
 0x29b   : > { %4320 = vmatmul.bf16.vlgmr.msra.gmra.mxu2 %v10142_v34 }
 0x29c   : > { %4388 = vmatpush.bf16.msrb.mxu2 %v7189_v31  ;;  %v7662_v31 = vld [vmem:[%s11588_s2 + $0x2e8] sm:$0xf0]  ;;  %v4029_v4 = vpack.c.b16 %v3842_v44, %v3842_v44  ;;  %v6704_v44 = vld [vmem:[%s11588_s2 + $0x168] sm:$0xf] }
 0x29d   : > { %v6873_v57 = vor.u32 %v7662_v31, %v6872_v41  ;;  %v6794_v31 = vld [vmem:[%s11588_s2 + $0x244] sm:$0xf0] }
 0x29e   : > { %4336 = vmatpush.bf16.msrb.mxu3 %v6965_v12  ;;  %v3041_v36 = vpop.f32.mrf.mxu0  ;;  %v4229_v30 = vsel %vm4221_vm1, %v4029_v4, 0  ;;  %v7652_v12 = vld [vmem:[%s11588_s2 + $0x298] sm:$0xf0]  ;;  %v6797_v59 = vor.u32 %v7636_v9, %v6794_v31  ;;  %v6706_v4 = vld [vmem:[%s11588_s2 + $0x194] sm:$0xf0] }
 0x29f   : > { %4281 = vmatpush.bf16.msra.mxu0 %v6873_v57  ;;  %v10164_v38 = vpack.c.bf16 %v3041_v36, %v3039_v2  ;;  %v6837_v15 = vor.u32 %v7652_v12, %v6836_v61  ;;  %v7642_v57 = vld [vmem:[%s11588_s2 + $0x248] sm:$0xf0]  ;;  %v7625_v36 = vld [vmem:[%s11588_s2 + $0x1c4] sm:$0xf]  ;;  %v7615_v61 = vld [vmem:[%s11588_s2 + $0x174] sm:$0xf] }
 0x2a0   : > { %4389 = vmatpush.bf16.msrb.mxu2 %v7145_v48  ;;  %v6880_v48 = vld [vmem:[%s11588_s2 + $0x2c8] sm:$0xf]  ;;  %v6714_v12 = vld [vmem:[%s11588_s2 + $0x19c] sm:$0xf0]  ;;  %v6616_v9 = vld [vmem:[%s11588_s2 + $0xb8] sm:$0xf] }
 0x2a1   : > { %v6881_v33 = vor.u32 %v7663_v6, %v6880_v48  ;;  %4268 = vmatmul.bf16.gmra.mxu3 %v10164_v38  ;;  %4369 = vmatpush.bf16.msrb.mxu1 %v6837_v15  ;;  %v6802_v48 = vld [vmem:[%s11588_s2 + $0x24c] sm:$0xf0]  ;;  %v6748_v6 = vld [vmem:[%s11588_s2 + $0x1c0] sm:$0xf]  ;;  %v6717_v60 = vor.u32 %v7615_v61, %v6714_v12  ;;  %v7597_v31 = vld [vmem:[%s11588_s2 + $0xe0] sm:$0xf0] }
 0x2a2   : > { %4337 = vmatpush.bf16.msrb.mxu3 %v6921_v23  ;;  %v6846_v23 = vld [vmem:[%s11588_s2 + $0x2a4] sm:$0xf0]  ;;  %v6660_v15 = vld [vmem:[%s11588_s2 + $0x110] sm:$0xf]  ;;  %v7576_v61 = vld [vmem:[%s11588_s2 + $0x38] sm:$0xf0] }
 0x2a3   : > { %v3053_v49 = vpop.f32.mrf.mxu1  ;;  %4357 = vmatpush.bf16.msrb.mxu0 %v4226_v18  ;;  %v6849_v20 = vor.u32 %v7648_v39, %v6846_v23  ;;  %v7620_v18 = vld [vmem:[%s11588_s2 + $0x198] sm:$0xf0]  ;;  %v7609_v39 = vld [vmem:[%s11588_s2 + $0x140] sm:$0xf0] }
 0x2a4   : > { %4390 = vmatpush.bf16.msrb.mxu2 %v7101_v58 }
 0x2a6   : > { %4338 = vmatpush.bf16.msrb.mxu3 %v6877_v52  ;;  %v6801_v52 = vor.u32 %v7642_v57, %v6800_v8  ;;  %v7592_v8 = vld [vmem:[%s11588_s2 + $0xbc] sm:$0xf]  ;;  %v6618_v57 = vld [vmem:[%s11588_s2 + $0xe4] sm:$0xf0] }
 0x2a8   : > { %4391 = vmatpush.bf16.msrb.mxu2 %v7057_v25  ;;  %v3843_v25 = vunpack.c.h.b16 %v3285_v27  ;;  %v6758_v27 = vld [vmem:[%s11588_s2 + $0x1f4] sm:$0xf0] }
 0x2a9   : > { %v6761_v62 = vor.u32 %v7626_v45, %v6758_v27  ;;  %v6580_v45 = vld [vmem:[%s11588_s2 + $0x68] sm:$0xf]  ;;  %v7587_v27 = vld [vmem:[%s11588_s2 + $0x90] sm:$0xf0] }
 0x2aa   : > { %v4030_v35 = vpack.c.b16 %v3843_v25, %v3843_v25  ;;  %4414 = vmatpush.bf16.msra.mxu3 %v4229_v30  ;;  %v7619_v25 = vld [vmem:[%s11588_s2 + $0x190] sm:$0xf0]  ;;  %v6709_v30 = vor.u32 %v7614_v43, %v6706_v4  ;;  %v6581_v43 = vor.u32 %v7587_v27, %v6580_v45  ;;  %v7713_v45 = vld [vmem:[%s11588_s2 + $0x484] sm:$0xf] }
 0x2ab   : > { %4325 = vmatmul.bf16.gmra.mxu2 %v10164_v38  ;;  %v3055_v16 = vpop.f32.mrf.mxu1  ;;  %v6705_v47 = vor.u32 %v7619_v25, %v6704_v44  ;;  %v6582_v44 = vld [vmem:[%s11588_s2 + $0x94] sm:$0xf0]  ;;  %v7575_v4 = vld [vmem:[%s11588_s2 + $0x30] sm:$0xf0] }
 0x2ac   : > { %4392 = vmatpush.bf16.msrb.mxu2 %v7013_v13  ;;  %v10168_v58 = vpack.c.bf16 %v3055_v16, %v3053_v49  ;;  %v4232_v46 = vsel %vm4221_vm1, %v4030_v35, 0  ;;  %v6844_v13 = vld [vmem:[%s11588_s2 + $0x278] sm:$0xf]  ;;  %v6750_v49 = vld [vmem:[%s11588_s2 + $0x1ec] sm:$0xf0] }
 0x2ad   : > { %v6845_v42 = vor.u32 %v7653_v19, %v6844_v13  ;;  %v6712_v35 = vld [vmem:[%s11588_s2 + $0x170] sm:$0xf]  ;;  %v7603_v13 = vld [vmem:[%s11588_s2 + $0x114] sm:$0xf]  ;;  %v6661_v19 = vor.u32 %v7608_v22, %v6660_v15 }
 0x2ae   : > { %4282 = vmatmul.bf16.vlgmr.msra.gmra.mxu0 %v10168_v58  ;;  %v7571_v22 = vld [vmem:[%s11588_s2 + $0x14] sm:$0xf] }
 0x2af   : > { %4426 = vmatpush.bf16.msra.mxu0 %v6841_v37  ;;  %v6662_v37 = vld [vmem:[%s11588_s2 + $0x13c] sm:$0xf0] }
 0x2b0   : > { %4393 = vmatpush.bf16.msrb.mxu2 %v6969_v32  ;;  %v6792_v32 = vld [vmem:[%s11588_s2 + $0x218] sm:$0xf]  ;;  %v6665_v23 = vor.u32 %v7603_v13, %v6662_v37  ;;  %v6538_v13 = vld [vmem:[%s11588_s2 + $0x3c] sm:$0xf0] }
 0x2b1   : > { %4339 = vmatmul.bf16.vlgmr.msrb.gmra.mxu3 %v10168_v58  ;;  %v6793_v41 = vor.u32 %v7641_v10, %v6792_v32  ;;  %v7604_v32 = vld [vmem:[%s11588_s2 + $0x11c] sm:$0xf]  ;;  %v6670_v10 = vld [vmem:[%s11588_s2 + $0x144] sm:$0xf0] }
 0x2b2   : > { %4483 = vmatpush.bf16.msrb.mxu3 %v6845_v42  ;;  %v6668_v42 = vld [vmem:[%s11588_s2 + $0x118] sm:$0xf] }
 0x2b3   : > { %v3058_v28 = vpop.f32.mrf.mxu1  ;;  %4370 = vmatpush.bf16.msrb.mxu1 %v6793_v41  ;;  %4427 = vmatpush.bf16.msra.mxu0 %v6797_v59  ;;  %v6673_v41 = vor.u32 %v7604_v32, %v6670_v10  ;;  %v6617_v59 = vor.u32 %v7597_v31, %v6616_v9  ;;  %v7741_v10 = vld [vmem:[%s11588_s2 + $0x560] sm:$0xf0]  ;;  %v7736_v9 = vld [vmem:[%s11588_s2 + $0x53c] sm:$0xf] }
 0x2b4   : > { %4394 = vmatpush.bf16.msrb.mxu2 %v6925_v14  ;;  %v7637_v14 = vld [vmem:[%s11588_s2 + $0x224] sm:$0xf] }
 0x2b5   : > { %v6805_v2 = vor.u32 %v7637_v14, %v6802_v48  ;;  %v6624_v14 = vld [vmem:[%s11588_s2 + $0xc0] sm:$0xf]  ;;  %v7598_v48 = vld [vmem:[%s11588_s2 + $0xe8] sm:$0xf0] }
 0x2b6   : > { %4484 = vmatpush.bf16.msrb.mxu3 %v6801_v52  ;;  %v6621_v52 = vor.u32 %v7592_v8, %v6618_v57  ;;  %v7204_v57 = vld [vmem:[%s11588_s2 + $0x540] sm:$0xf] }
 0x2b8   : > { %4395 = vmatpush.bf16.msrb.mxu2 %v6881_v33  ;;  %v7630_v33 = vld [vmem:[%s11588_s2 + $0x1e8] sm:$0xf0] }
 0x2b9   : > { %v6749_v16 = vor.u32 %v7630_v33, %v6748_v6  ;;  %v7593_v6 = vld [vmem:[%s11588_s2 + $0xc4] sm:$0xf]  ;;  %v6626_v33 = vld [vmem:[%s11588_s2 + $0xec] sm:$0xf0] }
 0x2bb   : > { %4396 = vmatmul.bf16.vlgmr.msrb.gmra.mxu2 %v10168_v58  ;;  %v3060_v26 = vpop.f32.mrf.mxu1  ;;  %4371 = vmatpush.bf16.msrb.mxu1 %v6749_v16 }
 0x2bc   : > { %v10173_v21 = vpack.c.bf16 %v3060_v26, %v3058_v28  ;;  %4471 = vmatpush.bf16.msra.mxu2 %v4232_v46  ;;  %v6753_v28 = vor.u32 %v7625_v36, %v6750_v49  ;;  %v6756_v26 = vld [vmem:[%s11588_s2 + $0x1c8] sm:$0xf]  ;;  %v6713_v46 = vor.u32 %v7620_v18, %v6712_v35  ;;  %v6572_v36 = vld [vmem:[%s11588_s2 + $0x60] sm:$0xf]  ;;  %v7586_v49 = vld [vmem:[%s11588_s2 + $0x88] sm:$0xf0] }
 0x2bd   : > { %v6757_v29 = vor.u32 %v7631_v17, %v6756_v26  ;;  %v7581_v26 = vld [vmem:[%s11588_s2 + $0x64] sm:$0xf]  ;;  %v6574_v17 = vld [vmem:[%s11588_s2 + $0x8c] sm:$0xf0]  ;;  %v7570_v35 = vld [vmem:[%s11588_s2 + $0xc] sm:$0xf] }
 0x2be   : > { %4287 = vmatmul.bf16.gmra.mxu0 %v10173_v21  ;;  %v6577_v25 = vor.u32 %v7581_v26, %v6574_v17  ;;  %v7731_v17 = vld [vmem:[%s11588_s2 + $0x510] sm:$0xf0] }
 0x2bf   : > { %4428 = vmatpush.bf16.msra.mxu0 %v6753_v28  ;;  %4485 = vmatpush.bf16.msrb.mxu3 %v6757_v29  ;;  %v6629_v28 = vor.u32 %v7593_v6, %v6626_v33  ;;  %v6573_v29 = vor.u32 %v7586_v49, %v6572_v36  ;;  %v7152_v6 = vld [vmem:[%s11588_s2 + $0x4e0] sm:$0xf]  ;;  %v7725_v49 = vld [vmem:[%s11588_s2 + $0x4e4] sm:$0xf] }
 0x2c0   : > { %4540 = vmatpush.bf16.msrb.mxu2 %v6849_v20  ;;  %4372 = vmatpush.bf16.msrb.mxu1 %v6705_v47  ;;  %v6669_v20 = vor.u32 %v7609_v39, %v6668_v42  ;;  %v6528_v47 = vld [vmem:[%s11588_s2 + $0x8] sm:$0xf]  ;;  %v6541_v42 = vor.u32 %v7571_v22, %v6538_v13  ;;  %v7735_v39 = vld [vmem:[%s11588_s2 + $0x534] sm:$0xf]  ;;  %v7708_v22 = vld [vmem:[%s11588_s2 + $0x458] sm:$0xf0] }
 0x2c1   : > { %4344 = vmatmul.bf16.gmra.mxu3 %v10173_v21  ;;  %v6529_v12 = vor.u32 %v7575_v4, %v6528_v47  ;;  %v7110_v4 = vld [vmem:[%s11588_s2 + $0x4b4] sm:$0xf0]  ;;  %v7703_v13 = vld [vmem:[%s11588_s2 + $0x434] sm:$0xf] }
 0x2c3   : > { %4429 = vmatpush.bf16.msra.mxu0 %v6709_v30  ;;  %4486 = vmatpush.bf16.msrb.mxu3 %v6713_v46  ;;  %v6530_v30 = vld [vmem:[%s11588_s2 + $0x34] sm:$0xf0]  ;;  %v6536_v46 = vld [vmem:[%s11588_s2 + $0x10] sm:$0xf] }
 0x2c4   : > { %4541 = vmatpush.bf16.msrb.mxu2 %v6805_v2  ;;  %4373 = vmatpush.bf16.msrb.mxu1 %v6661_v19  ;;  %v6625_v2 = vor.u32 %v7598_v48, %v6624_v14  ;;  %v6537_v15 = vor.u32 %v7576_v61, %v6536_v46  ;;  %v7146_v48 = vld [vmem:[%s11588_s2 + $0x504] sm:$0xf0]  ;;  %v7702_v61 = vld [vmem:[%s11588_s2 + $0x42c] sm:$0xf] }
 0x2c7   : > { %4430 = vmatpush.bf16.msra.mxu0 %v6665_v23  ;;  %4487 = vmatpush.bf16.msrb.mxu3 %v6669_v20  ;;  %v7190_v23 = vld [vmem:[%s11588_s2 + $0x55c] sm:$0xf0]  ;;  %v7196_v20 = vld [vmem:[%s11588_s2 + $0x538] sm:$0xf] }
 0x2c8   : > { %4542 = vmatpush.bf16.msrb.mxu2 %v6761_v62  ;;  %4374 = vmatpush.bf16.msrb.mxu1 %v6617_v59  ;;  %v7582_v62 = vld [vmem:[%s11588_s2 + $0x6c] sm:$0xf]  ;;  %v7193_v32 = vor.u32 %v7735_v39, %v7190_v23  ;;  %v7197_v31 = vor.u32 %v7741_v10, %v7196_v20  ;;  %v7072_v20 = vld [vmem:[%s11588_s2 + $0x438] sm:$0xf] }
 0x2c9   : > { %v6585_v18 = vor.u32 %v7582_v62, %v6582_v44  ;;  %v7742_v59 = vld [vmem:[%s11588_s2 + $0x568] sm:$0xf0]  ;;  %v7108_v44 = vld [vmem:[%s11588_s2 + $0x488] sm:$0xf] }
 0x2ca   : > { %v7205_v14 = vor.u32 %v7742_v59, %v7204_v57  ;;  %v7020_v57 = vld [vmem:[%s11588_s2 + $0x3d8] sm:$0xf] }
 0x2cb   : > { %4401 = vmatmul.bf16.gmra.mxu2 %v10173_v21  ;;  %4431 = vmatpush.bf16.msra.mxu0 %v6621_v52  ;;  %v7724_v52 = vld [vmem:[%s11588_s2 + $0x4dc] sm:$0xf] }
 0x2cc   : > { %4543 = vmatpush.bf16.msrb.mxu2 %v6717_v60  ;;  %4488 = vmatpush.bf16.msrb.mxu3 %v6625_v2  ;;  %v6533_v60 = vor.u32 %v7570_v35, %v6530_v30  ;;  %v7730_v2 = vld [vmem:[%s11588_s2 + $0x508] sm:$0xf0]  ;;  %v7149_v33 = vor.u32 %v7724_v52, %v7146_v48  ;;  %v7116_v35 = vld [vmem:[%s11588_s2 + $0x490] sm:$0xf]  ;;  %v7697_v52 = vld [vmem:[%s11588_s2 + $0x400] sm:$0xf0] }
 0x2cd   : > { %4375 = vmatpush.bf16.msrb.mxu1 %v6573_v29  ;;  %v7153_v36 = vor.u32 %v7730_v2, %v7152_v6  ;;  %v7102_v29 = vld [vmem:[%s11588_s2 + $0x4ac] sm:$0xf0]  ;;  %v7022_v48 = vld [vmem:[%s11588_s2 + $0x404] sm:$0xf0]  ;;  %v7021_v6 = vor.u32 %v7697_v52, %v7020_v57  ;;  %v6896_v57 = vld [vmem:[%s11588_s2 + $0x2d8] sm:$0xf] }
 0x2ce   : > { %v7105_v47 = vor.u32 %v7713_v45, %v7102_v29 }
 0x2cf   : > { %4432 = vmatpush.bf16.msra.mxu0 %v6577_v25  ;;  %v7719_v25 = vld [vmem:[%s11588_s2 + $0x4b0] sm:$0xf0] }
 0x2d0   : > { %4544 = vmatpush.bf16.msrb.mxu2 %v6673_v41  ;;  %4489 = vmatpush.bf16.msrb.mxu3 %v6581_v43  ;;  %v7198_v41 = vld [vmem:[%s11588_s2 + $0x564] sm:$0xf0]  ;;  %v7714_v43 = vld [vmem:[%s11588_s2 + $0x48c] sm:$0xf]  ;;  %v7109_v30 = vor.u32 %v7719_v25, %v7108_v44 }
 0x2d1   : > { %4376 = vmatpush.bf16.msrb.mxu1 %v6529_v12  ;;  %v7201_v8 = vor.u32 %v7736_v9, %v7198_v41  ;;  %v7113_v46 = vor.u32 %v7714_v43, %v7110_v4  ;;  %v7058_v12 = vld [vmem:[%s11588_s2 + $0x454] sm:$0xf0]  ;;  %v6984_v44 = vld [vmem:[%s11588_s2 + $0x388] sm:$0xf]  ;;  %v7687_v43 = vld [vmem:[%s11588_s2 + $0x3b0] sm:$0xf0] }
 0x2d2   : > { %v6926_v4 = vld [vmem:[%s11588_s2 + $0x34c] sm:$0xf0] }
 0x2d3   : > { %4433 = vmatpush.bf16.msra.mxu0 %v6533_v60  ;;  %v7064_v60 = vld [vmem:[%s11588_s2 + $0x430] sm:$0xf] }
 0x2d4   : > { %4545 = vmatpush.bf16.msrb.mxu2 %v6629_v28  ;;  %4490 = vmatpush.bf16.msrb.mxu3 %v6537_v15  ;;  %v7160_v28 = vld [vmem:[%s11588_s2 + $0x4e8] sm:$0xf]  ;;  %v7065_v39 = vor.u32 %v7708_v22, %v7064_v60  ;;  %v6940_v60 = vld [vmem:[%s11588_s2 + $0x330] sm:$0xf] }
 0x2d5   : > { %v7161_v62 = vor.u32 %v7731_v17, %v7160_v28  ;;  %v6970_v28 = vld [vmem:[%s11588_s2 + $0x3a4] sm:$0xf0]  ;;  %v7686_v17 = vld [vmem:[%s11588_s2 + $0x3a8] sm:$0xf0] }
 0x2d8   : > { %4546 = vmatpush.bf16.msrb.mxu2 %v6585_v18  ;;  %v7720_v18 = vld [vmem:[%s11588_s2 + $0x4b8] sm:$0xf0] }
 0x2d9   : > { %v7117_v15 = vor.u32 %v7720_v18, %v7116_v35  ;;  %v6932_v35 = vld [vmem:[%s11588_s2 + $0x328] sm:$0xf]  ;;  %v7675_v18 = vld [vmem:[%s11588_s2 + $0x350] sm:$0xf0] }
 0x2da   : > { %v6933_v22 = vor.u32 %v7675_v18, %v6932_v35 }
 0x2dc   : > { %4547 = vmatpush.bf16.msrb.mxu2 %v6541_v42  ;;  %v7061_v42 = vor.u32 %v7702_v61, %v7058_v12  ;;  %v6934_v12 = vld [vmem:[%s11588_s2 + $0x354] sm:$0xf0] }
 0x2fe   : > { %v3072_v16 = vpop.f32.mrf.mxu2 }
 0x306   : > { %v3074_v19 = vpop.f32.mrf.mxu2 }
 0x307   : > { %v10380_v37 = vpack.c.bf16 %v3074_v19, %v3072_v16  ;;  %v7154_v16 = vld [vmem:[%s11588_s2 + $0x50c] sm:$0xf0]  ;;  %v7066_v19 = vld [vmem:[%s11588_s2 + $0x45c] sm:$0xf0] }
 0x308   : > { %v7157_v26 = vor.u32 %v7725_v49, %v7154_v16  ;;  %v7069_v23 = vor.u32 %v7703_v13, %v7066_v19  ;;  %v7680_v49 = vld [vmem:[%s11588_s2 + $0x37c] sm:$0xf]  ;;  %v7658_v19 = vld [vmem:[%s11588_s2 + $0x2cc] sm:$0xf] }
 0x309   : > { %7222 = vmatmul.msk.bf16.vlgmr.msra.gmra.mxu1 %vm4214_vm2, %v10380_v37  ;;  %7224 = vmatmul.msk.bf16.vlgmr.msrb.gmra.mxu0 %vm4214_vm2, %v10380_v37  ;;  %v6973_v45 = vor.u32 %v7680_v49, %v6970_v28 }
 0x30a   : > { %7226 = vmatmul.msk.bf16.vlgmr.msra.gmra.mxu3 %vm4214_vm2, %v10380_v37  ;;  %7228 = vmatmul.msk.bf16.vlgmr.msra.gmra.mxu2 %vm4214_vm2, %v10380_v37 }
 0x30b   : > { %4445 = vmatpush.bf16.msra.mxu1 %v7193_v32  ;;  %4502 = vmatpush.bf16.msrb.mxu0 %v7197_v31  ;;  %v7709_v32 = vld [vmem:[%s11588_s2 + $0x460] sm:$0xf0]  ;;  %v7691_v31 = vld [vmem:[%s11588_s2 + $0x3d4] sm:$0xf] }
 0x30c   : > { %4559 = vmatpush.bf16.msra.mxu3 %v7201_v8  ;;  %4616 = vmatpush.bf16.msra.mxu2 %v7205_v14  ;;  %v7073_v41 = vor.u32 %v7709_v32, %v7072_v20  ;;  %v7014_v8 = vld [vmem:[%s11588_s2 + $0x3fc] sm:$0xf0]  ;;  %v7692_v14 = vld [vmem:[%s11588_s2 + $0x3dc] sm:$0xf]  ;;  %v7659_v20 = vld [vmem:[%s11588_s2 + $0x2d4] sm:$0xf] }
 0x30d   : > { %v7017_v59 = vor.u32 %v7691_v31, %v7014_v8  ;;  %v7025_v2 = vor.u32 %v7692_v14, %v7022_v48  ;;  %v6890_v32 = vld [vmem:[%s11588_s2 + $0x2fc] sm:$0xf0] }
 0x30e   : > { %v3077_v27 = vpop.f32.mrf.mxu2  ;;  %v6893_v8 = vor.u32 %v7659_v20, %v6890_v32  ;;  %v7643_v32 = vld [vmem:[%s11588_s2 + $0x250] sm:$0xf0] }
 0x30f   : > { %4446 = vmatpush.bf16.msra.mxu1 %v7149_v33  ;;  %4503 = vmatpush.bf16.msrb.mxu0 %v7153_v36  ;;  %v7028_v33 = vld [vmem:[%s11588_s2 + $0x3e0] sm:$0xf]  ;;  %v7698_v36 = vld [vmem:[%s11588_s2 + $0x408] sm:$0xf0] }
 0x310   : > { %4560 = vmatpush.bf16.msra.mxu3 %v7157_v26  ;;  %4617 = vmatpush.bf16.msra.mxu2 %v7161_v62  ;;  %v7029_v16 = vor.u32 %v7698_v36, %v7028_v33  ;;  %v6976_v26 = vld [vmem:[%s11588_s2 + $0x380] sm:$0xf]  ;;  %v6978_v62 = vld [vmem:[%s11588_s2 + $0x3ac] sm:$0xf0] }
 0x311   : > { %v6977_v29 = vor.u32 %v7686_v17, %v6976_v26 }
 0x313   : > { %4447 = vmatpush.bf16.msra.mxu1 %v7105_v47  ;;  %4504 = vmatpush.bf16.msrb.mxu0 %v7109_v30  ;;  %v7669_v47 = vld [vmem:[%s11588_s2 + $0x324] sm:$0xf]  ;;  %v7670_v30 = vld [vmem:[%s11588_s2 + $0x32c] sm:$0xf] }
 0x314   : > { %4561 = vmatpush.bf16.msra.mxu3 %v7113_v46  ;;  %4618 = vmatpush.bf16.msra.mxu2 %v7117_v15  ;;  %v6985_v46 = vor.u32 %v7687_v43, %v6984_v44  ;;  %v6929_v61 = vor.u32 %v7669_v47, %v6926_v4  ;;  %v7676_v15 = vld [vmem:[%s11588_s2 + $0x358] sm:$0xf0]  ;;  %v6937_v13 = vor.u32 %v7670_v30, %v6934_v12  ;;  %v4264_v14 = vpop.f32.mrf.mxu3  ;;  %v6852_v30 = vld [vmem:[%s11588_s2 + $0x280] sm:$0xf] }
 0x316   : > { %v3079_v10 = vpop.f32.mrf.mxu2 }
 0x317   : > { %v10486_v9 = vpack.c.bf16 %v3079_v10, %v3077_v27  ;;  %4448 = vmatpush.bf16.msra.mxu1 %v7061_v42  ;;  %4505 = vmatpush.bf16.msrb.mxu0 %v7065_v39  ;;  %v7681_v27 = vld [vmem:[%s11588_s2 + $0x384] sm:$0xf]  ;;  %v6882_v42 = vld [vmem:[%s11588_s2 + $0x2f4] sm:$0xf0]  ;;  %v6888_v39 = vld [vmem:[%s11588_s2 + $0x2d0] sm:$0xf]  ;;  %v6941_v10 = vor.u32 %v7676_v15, %v6940_v60 }
 0x318   : > { %4562 = vmatpush.bf16.msra.mxu3 %v7069_v23  ;;  %4619 = vmatpush.bf16.msra.mxu2 %v7073_v41  ;;  %v6981_v25 = vor.u32 %v7681_v27, %v6978_v62  ;;  %v7664_v23 = vld [vmem:[%s11588_s2 + $0x2f8] sm:$0xf0]  ;;  %v6885_v41 = vor.u32 %v7658_v19, %v6882_v42  ;;  %v6854_v60 = vld [vmem:[%s11588_s2 + $0x2ac] sm:$0xf0]  ;;  %v6860_v15 = vld [vmem:[%s11588_s2 + $0x288] sm:$0xf] }
 0x319   : > { %7223 = vmatmul.msk.bf16.gmra.mxu1 %vm4214_vm2, %v10486_v9  ;;  %7225 = vmatmul.msk.bf16.gmra.mxu0 %vm4214_vm2, %v10486_v9  ;;  %v6889_v31 = vor.u32 %v7664_v23, %v6888_v39  ;;  %v7650_v42 = vld [vmem:[%s11588_s2 + $0x28c] sm:$0xf]  ;;  %v6862_v39 = vld [vmem:[%s11588_s2 + $0x2b4] sm:$0xf0]  ;;  %v6808_v23 = vld [vmem:[%s11588_s2 + $0x228] sm:$0xf] }
 0x31a   : > { %7227 = vmatmul.msk.bf16.gmra.mxu3 %vm4214_vm2, %v10486_v9  ;;  %7229 = vmatmul.msk.bf16.gmra.mxu2 %vm4214_vm2, %v10486_v9  ;;  %v6865_v20 = vor.u32 %v7650_v42, %v6862_v39 }
 0x31b   : > { %4449 = vmatpush.bf16.msra.mxu1 %v7017_v59  ;;  %4506 = vmatpush.bf16.msrb.mxu0 %v7021_v6  ;;  %v7665_v59 = vld [vmem:[%s11588_s2 + $0x300] sm:$0xf0]  ;;  %v3286_v6 = vld [vmem:[%s11588_s2 + $0x590] sm:$0x33] }
 0x31c   : > { %4563 = vmatpush.bf16.msra.mxu3 %v7025_v2  ;;  %4620 = vmatpush.bf16.msra.mxu2 %v7029_v16  ;;  %v6897_v52 = vor.u32 %v7665_v59, %v6896_v57  ;;  %v10596_v48 = vpop.f32.mrf.mxu3  ;;  %v3287_v2 = vld [vmem:[%s11588_s2 + $0x598] sm:$0x33]  ;;  %v3844_v33 = vunpack.c.l.b16 %v3286_v6  ;;  %v3845_v36 = vunpack.c.h.b16 %v3286_v6  ;;  %v6816_v57 = vld [vmem:[%s11588_s2 + $0x230] sm:$0xf] }
 0x31d   : > { %v3846_v49 = vunpack.c.l.b16 %v3287_v2  ;;  %v3847_v16 = vunpack.c.h.b16 %v3287_v2  ;;  %v7644_v59 = vld [vmem:[%s11588_s2 + $0x258] sm:$0xf0]  ;;  %v6818_v2 = vld [vmem:[%s11588_s2 + $0x25c] sm:$0xf0] }
 0x31e   : > { %v4321_v28 = vpop.f32.mrf.mxu2  ;;  %v4031_v17 = vpack.c.b16 %v3844_v33, %v3844_v33  ;;  %v6817_v6 = vor.u32 %v7644_v59, %v6816_v57  ;;  %v6764_v33 = vld [vmem:[%s11588_s2 + $0x1d0] sm:$0xf]  ;;  %v7610_v57 = vld [vmem:[%s11588_s2 + $0x148] sm:$0xf0]  ;;  %v7605_v59 = vld [vmem:[%s11588_s2 + $0x124] sm:$0xf] }
 0x31f   : > { %4450 = vmatpush.bf16.msra.mxu1 %v6973_v45  ;;  %4507 = vmatpush.bf16.msrb.mxu0 %v6977_v29  ;;  %v4032_v45 = vpack.c.b16 %v3845_v36, %v3845_v36  ;;  %v4033_v29 = vpack.c.b16 %v3846_v49, %v3846_v49  ;;  %v4034_v27 = vpack.c.b16 %v3847_v16, %v3847_v16  ;;  %v7632_v36 = vld [vmem:[%s11588_s2 + $0x1f8] sm:$0xf0] }
 0x320   : > { %4564 = vmatpush.bf16.msra.mxu3 %v6981_v25  ;;  %4621 = vmatpush.bf16.msra.mxu2 %v6985_v46  ;;  %v4235_v62 = vsel %vm4221_vm1, %v4031_v17, 0  ;;  %v7654_v46 = vld [vmem:[%s11588_s2 + $0x2a8] sm:$0xf0]  ;;  %v7627_v17 = vld [vmem:[%s11588_s2 + $0x1d4] sm:$0xf] }
 0x321   : > { %v4238_v44 = vsel %vm4221_vm1, %v4032_v45, 0  ;;  %v4241_v25 = vsel %vm4221_vm1, %v4033_v29, 0  ;;  %v4244_v43 = vsel %vm4221_vm1, %v4034_v27, 0  ;;  %v6853_v12 = vor.u32 %v7654_v46, %v6852_v30  ;;  %v6766_v45 = vld [vmem:[%s11588_s2 + $0x1fc] sm:$0xf0] }
 0x322   : > { %v6772_v29 = vld [vmem:[%s11588_s2 + $0x1d8] sm:$0xf]  ;;  %v7621_v46 = vld [vmem:[%s11588_s2 + $0x1a0] sm:$0xf0] }
 0x323   : > { %4451 = vmatpush.bf16.msra.mxu1 %v6929_v61  ;;  %4508 = vmatpush.bf16.msrb.mxu0 %v6933_v22  ;;  %v7649_v61 = vld [vmem:[%s11588_s2 + $0x284] sm:$0xf]  ;;  %v7655_v22 = vld [vmem:[%s11588_s2 + $0x2b0] sm:$0xf0]  ;;  %v6720_v30 = vld [vmem:[%s11588_s2 + $0x178] sm:$0xf] }
 0x324   : > { %4565 = vmatpush.bf16.msra.mxu3 %v6937_v13  ;;  %4622 = vmatpush.bf16.msra.mxu2 %v6941_v10  ;;  %v10608_v26 = vpop.f32.mrf.mxu3  ;;  %v6857_v13 = vor.u32 %v7649_v61, %v6854_v60  ;;  %v6861_v19 = vor.u32 %v7655_v22, %v6860_v15  ;;  %v7638_v10 = vld [vmem:[%s11588_s2 + $0x22c] sm:$0xf]  ;;  %v7616_v61 = vld [vmem:[%s11588_s2 + $0x17c] sm:$0xf]  ;;  %v6722_v15 = vld [vmem:[%s11588_s2 + $0x1a4] sm:$0xf0] }
 0x325   : > { %v6728_v22 = vld [vmem:[%s11588_s2 + $0x180] sm:$0xf]  ;;  %v6725_v42 = vor.u32 %v7616_v61, %v6722_v15 }
 0x326   : > { %v10616_v4 = vpop.f32.mrf.mxu2  ;;  %v6642_v15 = vld [vmem:[%s11588_s2 + $0xfc] sm:$0xf0] }
 0x327   : > { %4452 = vmatpush.bf16.msra.mxu1 %v6885_v41  ;;  %4509 = vmatpush.bf16.msrb.mxu0 %v6889_v31  ;;  %v6810_v41 = vld [vmem:[%s11588_s2 + $0x254] sm:$0xf0]  ;;  %v6809_v31 = vor.u32 %v7643_v32, %v6808_v23  ;;  %v7617_v23 = vld [vmem:[%s11588_s2 + $0x184] sm:$0xf] }
 0x328   : > { %4566 = vmatpush.bf16.msra.mxu3 %v6893_v8  ;;  %4623 = vmatpush.bf16.msra.mxu2 %v6897_v52  ;;  %v6813_v8 = vor.u32 %v7638_v10, %v6810_v41  ;;  %v7639_v52 = vld [vmem:[%s11588_s2 + $0x234] sm:$0xf] }
 0x329   : > { %4377 = vmatmul.bf16.vlgmr.msrb.gmra.mxu1 %v10142_v34  ;;  %4434 = vmatmul.bf16.vlgmr.msra.gmra.mxu0 %v10142_v34  ;;  %v6821_v16 = vor.u32 %v7639_v52, %v6818_v2  ;;  %v6678_v52 = vld [vmem:[%s11588_s2 + $0x14c] sm:$0xf0] }
 0x32a   : > { %4491 = vmatmul.bf16.vlgmr.msrb.gmra.mxu3 %v10142_v34  ;;  %4548 = vmatmul.bf16.vlgmr.msrb.gmra.mxu2 %v10142_v34  ;;  %v6681_v2 = vor.u32 %v7605_v59, %v6678_v52  ;;  %v6598_v59 = vld [vmem:[%s11588_s2 + $0xa4] sm:$0xf0]  ;;  %v6544_v52 = vld [vmem:[%s11588_s2 + $0x18] sm:$0xf] }
 0x32b   : > { %4528 = vmatpush.bf16.msrb.mxu1 %v4235_v62  ;;  %4585 = vmatpush.bf16.msra.mxu0 %v4238_v44  ;;  %v4283_v35 = vpop.f32.mrf.mxu0  ;;  %v6765_v62 = vor.u32 %v7632_v36, %v6764_v33  ;;  %v7628_v44 = vld [vmem:[%s11588_s2 + $0x1dc] sm:$0xf]  ;;  %v7606_v36 = vld [vmem:[%s11588_s2 + $0x12c] sm:$0xf] }
 0x32c   : > { %4642 = vmatpush.bf16.msrb.mxu3 %v4241_v25  ;;  %4699 = vmatpush.bf16.msrb.mxu2 %v4244_v43  ;;  %v10614_v47 = vpop.f32.mrf.mxu3  ;;  %v10618_v18 = vadd.f32 %v4283_v35, %v4264_v14  ;;  %v6774_v25 = vld [vmem:[%s11588_s2 + $0x204] sm:$0xf0]  ;;  %v6769_v43 = vor.u32 %v7627_v17, %v6766_v45 }
 0x32d   : > { %v6777_v60 = vor.u32 %v7628_v44, %v6774_v25  ;;  %v6632_v17 = vld [vmem:[%s11588_s2 + $0xc8] sm:$0xf]  ;;  %v6634_v44 = vld [vmem:[%s11588_s2 + $0xf4] sm:$0xf0] }
 0x333   : > { %v10689_v27 = vpop.f32.mrf.mxu0 }
 0x334   : > { %v4340_v14 = vpop.f32.mrf.mxu3 }
 0x335   : > { %v10678_v49 = vadd.f32 %v4340_v14, %v4321_v28  ;;  %v7633_v28 = vld [vmem:[%s11588_s2 + $0x200] sm:$0xf0]  ;;  %v6684_v14 = vld [vmem:[%s11588_s2 + $0x128] sm:$0xf] }
 0x336   : > { %v6773_v35 = vor.u32 %v7633_v28, %v6772_v29  ;;  %v7594_v28 = vld [vmem:[%s11588_s2 + $0xcc] sm:$0xf] }
 0x339   : > { %4382 = vmatmul.bf16.gmra.mxu1 %v10164_v38  ;;  %4439 = vmatmul.bf16.gmra.mxu0 %v10164_v38 }
 0x33a   : > { %4496 = vmatmul.bf16.gmra.mxu3 %v10164_v38  ;;  %4553 = vmatmul.bf16.gmra.mxu2 %v10164_v38 }
 0x33b   : > { %v4288_v10 = vpop.f32.mrf.mxu0 }
 0x33c   : > { %v10724_v32 = vpop.f32.mrf.mxu3 }
 0x344   : > { %v4345_v61 = vpop.f32.mrf.mxu3 }
 0x349   : > { %4453 = vmatmul.bf16.vlgmr.msra.gmra.mxu1 %v10168_v58  ;;  %4510 = vmatmul.bf16.vlgmr.msrb.gmra.mxu0 %v10168_v58 }
 0x34a   : > { %4567 = vmatmul.bf16.vlgmr.msra.gmra.mxu3 %v10168_v58  ;;  %4624 = vmatmul.bf16.vlgmr.msra.gmra.mxu2 %v10168_v58 }
 0x34b   : > { %4597 = vmatpush.bf16.msra.mxu1 %v6853_v12  ;;  %4654 = vmatpush.bf16.msrb.mxu0 %v6857_v13  ;;  %v4326_v12 = vpop.f32.mrf.mxu2  ;;  %v7622_v13 = vld [vmem:[%s11588_s2 + $0x1a8] sm:$0xf0] }
 0x34c   : > { %4711 = vmatpush.bf16.msra.mxu3 %v6861_v19  ;;  %4768 = vmatpush.bf16.msra.mxu2 %v6865_v20  ;;  %v6721_v19 = vor.u32 %v7621_v46, %v6720_v30  ;;  %v6729_v39 = vor.u32 %v7622_v13, %v6728_v22  ;;  %v6730_v20 = vld [vmem:[%s11588_s2 + $0x1ac] sm:$0xf0]  ;;  %v7600_v30 = vld [vmem:[%s11588_s2 + $0xf8] sm:$0xf0]  ;;  %v7595_v46 = vld [vmem:[%s11588_s2 + $0xd4] sm:$0xf] }
 0x34d   : > { %v6733_v41 = vor.u32 %v7617_v23, %v6730_v20  ;;  %v6588_v22 = vld [vmem:[%s11588_s2 + $0x70] sm:$0xf]  ;;  %v7588_v13 = vld [vmem:[%s11588_s2 + $0x98] sm:$0xf0]  ;;  %v6596_v23 = vld [vmem:[%s11588_s2 + $0x78] sm:$0xf]  ;;  %v6645_v20 = vor.u32 %v7595_v46, %v6642_v15 }
 0x34e   : > { %v7214_v15 = vld [vmem:[%s11588_s2 + $0x574] sm:$0xf0] }
 0x34f   : > { %4598 = vmatpush.bf16.msra.mxu1 %v6809_v31  ;;  %4655 = vmatpush.bf16.msrb.mxu0 %v6813_v8  ;;  %v10727_v31 = vadd.f32 %v4288_v10, %v10608_v26  ;;  %v6676_v8 = vld [vmem:[%s11588_s2 + $0x120] sm:$0xf]  ;;  %v6589_v10 = vor.u32 %v7588_v13, %v6588_v22 }
 0x350   : > { %4712 = vmatpush.bf16.msra.mxu3 %v6817_v6  ;;  %4769 = vmatpush.bf16.msra.mxu2 %v6821_v16  ;;  %v6677_v26 = vor.u32 %v7610_v57, %v6676_v8  ;;  %v7611_v6 = vld [vmem:[%s11588_s2 + $0x150] sm:$0xf0]  ;;  %v6686_v16 = vld [vmem:[%s11588_s2 + $0x154] sm:$0xf0]  ;;  %v7584_v57 = vld [vmem:[%s11588_s2 + $0x7c] sm:$0xf] }
 0x351   : > { %v6685_v33 = vor.u32 %v7611_v6, %v6684_v14  ;;  %v6689_v29 = vor.u32 %v7606_v36, %v6686_v16  ;;  %v7577_v14 = vld [vmem:[%s11588_s2 + $0x40] sm:$0xf0]  ;;  %v7572_v6 = vld [vmem:[%s11588_s2 + $0x1c] sm:$0xf]  ;;  %v6546_v36 = vld [vmem:[%s11588_s2 + $0x44] sm:$0xf0] }
 0x352   : > { %v6552_v16 = vld [vmem:[%s11588_s2 + $0x20] sm:$0xf] }
 0x353   : > { %4599 = vmatpush.bf16.msra.mxu1 %v6765_v62  ;;  %4656 = vmatpush.bf16.msrb.mxu0 %v6769_v43  ;;  %v10760_v45 = vpop.f32.mrf.mxu2  ;;  %v7599_v62 = vld [vmem:[%s11588_s2 + $0xf0] sm:$0xf0]  ;;  %v6637_v43 = vor.u32 %v7594_v28, %v6634_v44  ;;  %v7573_v28 = vld [vmem:[%s11588_s2 + $0x24] sm:$0xf]  ;;  %v6554_v44 = vld [vmem:[%s11588_s2 + $0x4c] sm:$0xf0] }
 0x354   : > { %4713 = vmatpush.bf16.msra.mxu3 %v6773_v35  ;;  %4770 = vmatpush.bf16.msra.mxu2 %v6777_v60  ;;  %v6633_v25 = vor.u32 %v7599_v62, %v6632_v17  ;;  %v6640_v35 = vld [vmem:[%s11588_s2 + $0xd0] sm:$0xf]  ;;  %v7578_v17 = vld [vmem:[%s11588_s2 + $0x48] sm:$0xf0] }
 0x355   : > { %v6641_v60 = vor.u32 %v7600_v30, %v6640_v35  ;;  %v6553_v62 = vor.u32 %v7578_v17, %v6552_v16  ;;  %v7206_v35 = vld [vmem:[%s11588_s2 + $0x56c] sm:$0xf0]  ;;  %v7212_v30 = vld [vmem:[%s11588_s2 + $0x548] sm:$0xf]  ;;  %v7715_v16 = vld [vmem:[%s11588_s2 + $0x494] sm:$0xf] }
 0x356   : > { %v7118_v17 = vld [vmem:[%s11588_s2 + $0x4bc] sm:$0xf0] }
 0x357   : > { %4600 = vmatpush.bf16.msra.mxu1 %v6721_v19  ;;  %4657 = vmatpush.bf16.msrb.mxu0 %v6725_v42  ;;  %v10789_v19 = vadd.f32 %v4345_v61, %v4326_v12  ;;  %v7583_v42 = vld [vmem:[%s11588_s2 + $0x74] sm:$0xf]  ;;  %v7589_v12 = vld [vmem:[%s11588_s2 + $0xa0] sm:$0xf0] }
 0x358   : > { %4714 = vmatpush.bf16.msra.mxu3 %v6729_v39  ;;  %4771 = vmatpush.bf16.msra.mxu2 %v6733_v41  ;;  %v6590_v39 = vld [vmem:[%s11588_s2 + $0x9c] sm:$0xf0]  ;;  %v6597_v8 = vor.u32 %v7589_v12, %v6596_v23  ;;  %v7743_v61 = vld [vmem:[%s11588_s2 + $0x570] sm:$0xf0]  ;;  %v7168_v12 = vld [vmem:[%s11588_s2 + $0x4f0] sm:$0xf] }
 0x359   : > { %4458 = vmatmul.bf16.gmra.mxu1 %v10173_v21  ;;  %4515 = vmatmul.bf16.gmra.mxu0 %v10173_v21  ;;  %v6593_v41 = vor.u32 %v7583_v42, %v6590_v39  ;;  %v7213_v22 = vor.u32 %v7743_v61, %v7212_v30  ;;  %v7220_v42 = vld [vmem:[%s11588_s2 + $0x550] sm:$0xf]  ;;  %v7744_v39 = vld [vmem:[%s11588_s2 + $0x578] sm:$0xf0]  ;;  %v7132_v30 = vld [vmem:[%s11588_s2 + $0x4a0] sm:$0xf] }
 0x35a   : > { %4572 = vmatmul.bf16.gmra.mxu3 %v10173_v21  ;;  %4629 = vmatmul.bf16.gmra.mxu2 %v10173_v21  ;;  %v7221_v23 = vor.u32 %v7744_v39, %v7220_v42  ;;  %v7710_v42 = vld [vmem:[%s11588_s2 + $0x468] sm:$0xf0]  ;;  %v7705_v39 = vld [vmem:[%s11588_s2 + $0x444] sm:$0xf] }
 0x35b   : > { %4601 = vmatpush.bf16.msra.mxu1 %v6677_v26  ;;  %4658 = vmatpush.bf16.msrb.mxu0 %v6681_v2  ;;  %v6601_v26 = vor.u32 %v7584_v57, %v6598_v59  ;;  %v10818_v2 = vpop.f32.mrf.mxu2  ;;  %v7727_v57 = vld [vmem:[%s11588_s2 + $0x4f4] sm:$0xf]  ;;  %v7170_v59 = vld [vmem:[%s11588_s2 + $0x51c] sm:$0xf0] }
 0x35c   : > { %4715 = vmatpush.bf16.msra.mxu3 %v6685_v33  ;;  %4772 = vmatpush.bf16.msra.mxu2 %v6689_v29  ;;  %v6545_v33 = vor.u32 %v7577_v14, %v6544_v52  ;;  %v6549_v29 = vor.u32 %v7572_v6, %v6546_v36  ;;  %v7173_v52 = vor.u32 %v7727_v57, %v7170_v59  ;;  %v7176_v14 = vld [vmem:[%s11588_s2 + $0x4f8] sm:$0xf]  ;;  %v7733_v6 = vld [vmem:[%s11588_s2 + $0x520] sm:$0xf0]  ;;  %v7030_v59 = vld [vmem:[%s11588_s2 + $0x40c] sm:$0xf0] }
 0x35d   : > { %v7177_v36 = vor.u32 %v7733_v6, %v7176_v14  ;;  %v7693_v57 = vld [vmem:[%s11588_s2 + $0x3e4] sm:$0xf]  ;;  %v7699_v6 = vld [vmem:[%s11588_s2 + $0x410] sm:$0xf0] }
 0x35e   : > { %v7033_v14 = vor.u32 %v7693_v57, %v7030_v59  ;;  %v7672_v57 = vld [vmem:[%s11588_s2 + $0x33c] sm:$0xf]  ;;  %v6950_v59 = vld [vmem:[%s11588_s2 + $0x364] sm:$0xf0] }
 0x35f   : > { %4602 = vmatpush.bf16.msra.mxu1 %v6633_v25  ;;  %4659 = vmatpush.bf16.msrb.mxu0 %v6637_v43  ;;  %v6557_v25 = vor.u32 %v7573_v28, %v6554_v44  ;;  %v7737_v43 = vld [vmem:[%s11588_s2 + $0x544] sm:$0xf]  ;;  %v7716_v44 = vld [vmem:[%s11588_s2 + $0x49c] sm:$0xf] }
 0x360   : > { %4716 = vmatpush.bf16.msra.mxu3 %v6641_v60  ;;  %4773 = vmatpush.bf16.msra.mxu2 %v6645_v20  ;;  %v7209_v46 = vor.u32 %v7737_v43, %v7206_v35  ;;  %v7738_v60 = vld [vmem:[%s11588_s2 + $0x54c] sm:$0xf]  ;;  %v7721_v28 = vld [vmem:[%s11588_s2 + $0x4c0] sm:$0xf0] }
 0x361   : > { %v7217_v13 = vor.u32 %v7738_v60, %v7214_v15  ;;  %v7726_v20 = vld [vmem:[%s11588_s2 + $0x4ec] sm:$0xf]  ;;  %v7704_v60 = vld [vmem:[%s11588_s2 + $0x43c] sm:$0xf]  ;;  %v7074_v15 = vld [vmem:[%s11588_s2 + $0x464] sm:$0xf0] }
 0x363   : > { %4603 = vmatpush.bf16.msra.mxu1 %v6589_v10  ;;  %4660 = vmatpush.bf16.msrb.mxu0 %v6593_v41  ;;  %v7162_v10 = vld [vmem:[%s11588_s2 + $0x514] sm:$0xf0] }
 0x364   : > { %4717 = vmatpush.bf16.msra.mxu3 %v6597_v8  ;;  %4774 = vmatpush.bf16.msra.mxu2 %v6601_v26  ;;  %v7165_v41 = vor.u32 %v7726_v20, %v7162_v10  ;;  %v7732_v8 = vld [vmem:[%s11588_s2 + $0x518] sm:$0xf0] }
 0x365   : > { %v7169_v26 = vor.u32 %v7732_v8, %v7168_v12  ;;  %v7088_v12 = vld [vmem:[%s11588_s2 + $0x448] sm:$0xf] }
 0x367   : > { %4604 = vmatpush.bf16.msra.mxu1 %v6545_v33  ;;  %4661 = vmatpush.bf16.msrb.mxu0 %v6549_v29  ;;  %v10891_v33 = vpop.f32.mrf.mxu2  ;;  %v7124_v29 = vld [vmem:[%s11588_s2 + $0x498] sm:$0xf] }
 0x368   : > { %4718 = vmatpush.bf16.msra.mxu3 %v6553_v62  ;;  %4775 = vmatpush.bf16.msra.mxu2 %v6557_v25  ;;  %v7121_v62 = vor.u32 %v7715_v16, %v7118_v17  ;;  %v7126_v25 = vld [vmem:[%s11588_s2 + $0x4c4] sm:$0xf0]  ;;  %v7125_v43 = vor.u32 %v7721_v28, %v7124_v29  ;;  %v7038_v16 = vld [vmem:[%s11588_s2 + $0x414] sm:$0xf0]  ;;  %v7700_v28 = vld [vmem:[%s11588_s2 + $0x418] sm:$0xf0] }
 0x369   : > { %7230 = vmatmul.msk.bf16.vlgmr.msrb.gmra.mxu1 %vm4214_vm2, %v10380_v37  ;;  %7232 = vmatmul.msk.bf16.vlgmr.msra.gmra.mxu0 %vm4214_vm2, %v10380_v37  ;;  %v7129_v35 = vor.u32 %v7716_v44, %v7126_v25  ;;  %v10975_v25 = vpop.f32.mrf.mxu0 }
 0x36a   : > { %7234 = vmatmul.msk.bf16.vlgmr.msrb.gmra.mxu3 %vm4214_vm2, %v10380_v37  ;;  %7236 = vmatmul.msk.bf16.vlgmr.msrb.gmra.mxu2 %vm4214_vm2, %v10380_v37 }
 0x36b   : > { %4673 = vmatpush.bf16.msrb.mxu1 %v7209_v46  ;;  %4730 = vmatpush.bf16.msra.mxu0 %v7213_v22  ;;  %v7722_v46 = vld [vmem:[%s11588_s2 + $0x4c8] sm:$0xf0]  ;;  %v7080_v22 = vld [vmem:[%s11588_s2 + $0x440] sm:$0xf] }
 0x36c   : > { %4787 = vmatpush.bf16.msrb.mxu3 %v7217_v13  ;;  %4844 = vmatpush.bf16.msrb.mxu2 %v7221_v23  ;;  %v7133_v61 = vor.u32 %v7722_v46, %v7132_v30  ;;  %v7077_v13 = vor.u32 %v7704_v60, %v7074_v15  ;;  %v7082_v23 = vld [vmem:[%s11588_s2 + $0x46c] sm:$0xf0]  ;;  %v7081_v20 = vor.u32 %v7710_v42, %v7080_v22  ;;  %v7683_v60 = vld [vmem:[%s11588_s2 + $0x394] sm:$0xf]  ;;  %v6994_v15 = vld [vmem:[%s11588_s2 + $0x3bc] sm:$0xf0] }
 0x36d   : > { %v7085_v10 = vor.u32 %v7705_v39, %v7082_v23  ;;  %v6992_v30 = vld [vmem:[%s11588_s2 + $0x390] sm:$0xf]  ;;  %v7000_v42 = vld [vmem:[%s11588_s2 + $0x398] sm:$0xf]  ;;  %v7689_v39 = vld [vmem:[%s11588_s2 + $0x3c0] sm:$0xf0] }
 0x36e   : > { %v7001_v23 = vor.u32 %v7689_v39, %v7000_v42  ;;  %v7667_v42 = vld [vmem:[%s11588_s2 + $0x310] sm:$0xf0] }
 0x36f   : > { %4674 = vmatpush.bf16.msrb.mxu1 %v7165_v41  ;;  %4731 = vmatpush.bf16.msra.mxu0 %v7169_v26  ;;  %v7711_v41 = vld [vmem:[%s11588_s2 + $0x470] sm:$0xf0]  ;;  %v7036_v26 = vld [vmem:[%s11588_s2 + $0x3e8] sm:$0xf] }
 0x370   : > { %4788 = vmatpush.bf16.msrb.mxu3 %v7173_v52  ;;  %4845 = vmatpush.bf16.msrb.mxu2 %v7177_v36  ;;  %v7089_v8 = vor.u32 %v7711_v41, %v7088_v12  ;;  %v10954_v52 = vpop.f32.mrf.mxu2  ;;  %v7694_v36 = vld [vmem:[%s11588_s2 + $0x3ec] sm:$0xf]  ;;  %v7037_v17 = vor.u32 %v7699_v6, %v7036_v26  ;;  %v6948_v12 = vld [vmem:[%s11588_s2 + $0x338] sm:$0xf]  ;;  %v6956_v6 = vld [vmem:[%s11588_s2 + $0x340] sm:$0xf] }
 0x371   : > { %v7041_v29 = vor.u32 %v7694_v36, %v7038_v16  ;;  %v7678_v36 = vld [vmem:[%s11588_s2 + $0x368] sm:$0xf0]  ;;  %v11025_v16 = vpop.f32.mrf.mxu3 }
 0x373   : > { %4675 = vmatpush.bf16.msrb.mxu1 %v7121_v62  ;;  %4732 = vmatpush.bf16.msra.mxu0 %v7125_v43  ;;  %v7044_v62 = vld [vmem:[%s11588_s2 + $0x3f0] sm:$0xf]  ;;  %v7682_v43 = vld [vmem:[%s11588_s2 + $0x38c] sm:$0xf] }
 0x374   : > { %4789 = vmatpush.bf16.msrb.mxu3 %v7129_v35  ;;  %4846 = vmatpush.bf16.msrb.mxu2 %v7133_v61  ;;  %v7045_v44 = vor.u32 %v7700_v28, %v7044_v62  ;;  %v6986_v35 = vld [vmem:[%s11588_s2 + $0x3b4] sm:$0xf0]  ;;  %v7688_v61 = vld [vmem:[%s11588_s2 + $0x3b8] sm:$0xf0]  ;;  %v6898_v28 = vld [vmem:[%s11588_s2 + $0x304] sm:$0xf0] }
 0x375   : > { %v6989_v46 = vor.u32 %v7682_v43, %v6986_v35  ;;  %v6993_v22 = vor.u32 %v7688_v61, %v6992_v30  ;;  %v7660_v62 = vld [vmem:[%s11588_s2 + $0x2dc] sm:$0xf]  ;;  %v7666_v35 = vld [vmem:[%s11588_s2 + $0x308] sm:$0xf0]  ;;  %v7661_v30 = vld [vmem:[%s11588_s2 + $0x2e4] sm:$0xf] }
 0x376   : > { %v6901_v43 = vor.u32 %v7660_v62, %v6898_v28 }
 0x377   : > { %4676 = vmatpush.bf16.msrb.mxu1 %v7077_v13  ;;  %4733 = vmatpush.bf16.msra.mxu0 %v7081_v20  ;;  %v6997_v13 = vor.u32 %v7683_v60, %v6994_v15  ;;  %v7671_v20 = vld [vmem:[%s11588_s2 + $0x334] sm:$0xf] }
 0x378   : > { %4790 = vmatpush.bf16.msrb.mxu3 %v7085_v10  ;;  %4847 = vmatpush.bf16.msrb.mxu2 %v7089_v8  ;;  %v6942_v10 = vld [vmem:[%s11588_s2 + $0x35c] sm:$0xf0]  ;;  %v7677_v8 = vld [vmem:[%s11588_s2 + $0x360] sm:$0xf0] }
 0x379   : > { %7231 = vmatmul.msk.bf16.gmra.mxu1 %vm4214_vm2, %v10486_v9  ;;  %7233 = vmatmul.msk.bf16.gmra.mxu0 %vm4214_vm2, %v10486_v9  ;;  %v6945_v41 = vor.u32 %v7671_v20, %v6942_v10  ;;  %v6949_v26 = vor.u32 %v7677_v8, %v6948_v12 }
 0x37a   : > { %7235 = vmatmul.msk.bf16.gmra.mxu3 %vm4214_vm2, %v10486_v9  ;;  %7237 = vmatmul.msk.bf16.gmra.mxu2 %vm4214_vm2, %v10486_v9 }
 0x37b   : > { %4677 = vmatpush.bf16.msrb.mxu1 %v7033_v14  ;;  %4734 = vmatpush.bf16.msra.mxu0 %v7037_v17  ;;  %v6953_v14 = vor.u32 %v7672_v57, %v6950_v59  ;;  %v11027_v17 = vpop.f32.mrf.mxu2 }
 0x37c   : > { %4791 = vmatpush.bf16.msrb.mxu3 %v7041_v29  ;;  %4848 = vmatpush.bf16.msrb.mxu2 %v7045_v44  ;;  %v6957_v29 = vor.u32 %v7678_v36, %v6956_v6  ;;  %v6904_v44 = vld [vmem:[%s11588_s2 + $0x2e0] sm:$0xf] }
 0x37d   : > { %v6905_v15 = vor.u32 %v7666_v35, %v6904_v44 }
 0x37f   : > { %4678 = vmatpush.bf16.msrb.mxu1 %v6989_v46  ;;  %4735 = vmatpush.bf16.msra.mxu0 %v6993_v22  ;;  %v6906_v46 = vld [vmem:[%s11588_s2 + $0x30c] sm:$0xf0] }
 0x380   : > { %4792 = vmatpush.bf16.msrb.mxu3 %v6997_v13  ;;  %4849 = vmatpush.bf16.msrb.mxu2 %v7001_v23  ;;  %v6909_v22 = vor.u32 %v7661_v30, %v6906_v46  ;;  %v6912_v13 = vld [vmem:[%s11588_s2 + $0x2e8] sm:$0xf] }
 0x381   : > { %v6913_v20 = vor.u32 %v7667_v42, %v6912_v13 }
 0x383   : > { %4679 = vmatpush.bf16.msrb.mxu1 %v6945_v41  ;;  %4736 = vmatpush.bf16.msra.mxu0 %v6949_v26 }
 0x384   : > { %4793 = vmatpush.bf16.msrb.mxu3 %v6953_v14  ;;  %4850 = vmatpush.bf16.msrb.mxu2 %v6957_v29  ;;  %v3289_v29 = vld [vmem:[%s11588_s2 + $0x5a8] sm:$0x3] }
 0x385   : > { %v3850_v44 = vunpack.c.l.b16 %v3289_v29  ;;  %v7645_v29 = vld [vmem:[%s11588_s2 + $0x260] sm:$0xf0] }
 0x386   : > { %v4302_v61 = vpop.f32.mrf.mxu1  ;;  %v4359_v60 = vpop.f32.mrf.mxu0 }
 0x387   : > { %v11054_v39 = vadd.f32 %v4302_v61, %v10618_v18  ;;  %v11057_v23 = vadd.f32 %v4359_v60, %v10678_v49  ;;  %4680 = vmatpush.bf16.msrb.mxu1 %v6901_v43  ;;  %4737 = vmatpush.bf16.msra.mxu0 %v6905_v15  ;;  %v4037_v30 = vpack.c.b16 %v3850_v44, %v3850_v44 }
 0x388   : > { %4794 = vmatpush.bf16.msrb.mxu3 %v6909_v22  ;;  %4851 = vmatpush.bf16.msrb.mxu2 %v6913_v20  ;;  %v6868_v20 = vld [vmem:[%s11588_s2 + $0x290] sm:$0xf] }
 0x389   : > { %4605 = vmatmul.bf16.vlgmr.msra.gmra.mxu1 %v10142_v34  ;;  %4662 = vmatmul.bf16.vlgmr.msrb.gmra.mxu0 %v10142_v34  ;;  %v4253_v13 = vsel %vm4221_vm1, %v4037_v30, 0  ;;  %v11627_v30 = vld [vmem:[#allocation5_spill] sm:$0xff] }
 0x38a   : > { %4719 = vmatmul.bf16.vlgmr.msra.gmra.mxu3 %v10142_v34  ;;  %4776 = vmatmul.bf16.vlgmr.msra.gmra.mxu2 %v10142_v34 }
 0x38c   : > { %4942 = vmatpush.bf16.msra.mxu2 %v8321_v50  ;;  %4870 = vmatpush.bf16.msra.mxu3 %v4253_v13 }
 0x38d   : > { %v4416_v18 = vpop.f32.mrf.mxu3  ;;  %v11064_v10 = vpop.f32.mrf.mxu2 }
 0x38e   : > { %v11066_v49 = vpop.f32.mrf.mxu1  ;;  %v11068_v12 = vpop.f32.mrf.mxu0 }
 0x390   : > { %4943 = vmatpush.bf16.msra.mxu2 %v8205_v53 }
 0x395   : > { %v4418_v41 = vpop.f32.mrf.mxu3  ;;  %v11071_v8 = vpop.f32.mrf.mxu2 }
 0x396   : > { %v4307_v57 = vpop.f32.mrf.mxu1  ;;  %v4364_v59 = vpop.f32.mrf.mxu0 }
 0x397   : > { %v11074_v26 = vadd.f32 %v4307_v57, %v10727_v31  ;;  %v11077_v14 = vadd.f32 %v4364_v59, %v10789_v19  ;;  %v3288_v31 = vld [vmem:[%s11588_s2 + $0x5a0] sm:$0x33]  ;;  %v7656_v57 = vld [vmem:[%s11588_s2 + $0x2b8] sm:$0xf0] }
 0x398   : > { %v3848_v19 = vunpack.c.l.b16 %v3288_v31  ;;  %v3849_v28 = vunpack.c.h.b16 %v3288_v31  ;;  %v6869_v59 = vor.u32 %v7656_v57, %v6868_v20 }
 0x399   : > { %4610 = vmatmul.bf16.gmra.mxu1 %v10164_v38  ;;  %4667 = vmatmul.bf16.gmra.mxu0 %v10164_v38 }
 0x39a   : > { %4724 = vmatmul.bf16.gmra.mxu3 %v10164_v38  ;;  %4781 = vmatmul.bf16.gmra.mxu2 %v10164_v38  ;;  %v4035_v62 = vpack.c.b16 %v3848_v19, %v3848_v19  ;;  %v4036_v35 = vpack.c.b16 %v3849_v28, %v3849_v28  ;;  %v6824_v19 = vld [vmem:[%s11588_s2 + $0x238] sm:$0xf] }
 0x39b   : > { %v6825_v28 = vor.u32 %v7645_v29, %v6824_v19  ;;  %v7601_v29 = vld [vmem:[%s11588_s2 + $0x100] sm:$0xf0] }
 0x39c   : > { %v4247_v43 = vsel %vm4221_vm1, %v4035_v62, 0  ;;  %v4250_v22 = vsel %vm4221_vm1, %v4036_v35, 0  ;;  %v6780_v35 = vld [vmem:[%s11588_s2 + $0x1e0] sm:$0xf] }
 0x39d   : > { %v11083_v53 = vpop.f32.mrf.mxu3  ;;  %v11085_v50 = vpop.f32.mrf.mxu2  ;;  %4756 = vmatpush.bf16.msra.mxu1 %v4247_v43  ;;  %4813 = vmatpush.bf16.msrb.mxu0 %v4250_v22  ;;  %v7623_v22 = vld [vmem:[%s11588_s2 + $0x1b0] sm:$0xf0] }
 0x39e   : > { %v11087_v6 = vpop.f32.mrf.mxu1  ;;  %v11089_v36 = vpop.f32.mrf.mxu0 }
 0x3a5   : > { %v11098_v46 = vpop.f32.mrf.mxu3  ;;  %v11100_v61 = vpop.f32.mrf.mxu2 }
 0x3a6   : > { %v4378_v60 = vpop.f32.mrf.mxu1  ;;  %v11102_v15 = vpop.f32.mrf.mxu0 }
 0x3a7   : > { %v4398_v42 = vadd.f32 %v10818_v2, %v4378_v60  ;;  %v11626_v2 = vld [vmem:[#allocation7_spill] sm:$0xff] }
 0x3a9   : > { %4681 = vmatmul.bf16.vlgmr.msrb.gmra.mxu1 %v10168_v58  ;;  %4738 = vmatmul.bf16.vlgmr.msra.gmra.mxu0 %v10168_v58  ;;  %v11115_v31 = vadd.f32 %v4416_v18, %v4398_v42 }
 0x3aa   : > { %4795 = vmatmul.bf16.vlgmr.msrb.gmra.mxu3 %v10168_v58  ;;  %4852 = vmatmul.bf16.vlgmr.msrb.gmra.mxu2 %v10168_v58 }
 0x3ab   : > { %4825 = vmatpush.bf16.msrb.mxu1 %v6869_v59  ;;  %4904 = vmatpush.bf16.msra.mxu0 %v11626_v2 }
 0x3ac   : > { %4961 = vmatpush.bf16.msrb.mxu3 %v8323_v51  ;;  %5018 = vmatpush.bf16.msrb.mxu2 %v8565_v7  ;;  %v7634_v51 = vld [vmem:[%s11588_s2 + $0x208] sm:$0xf0] }
 0x3ad   : > { %v4492_v18 = vpop.f32.mrf.mxu3  ;;  %v11128_v62 = vpop.f32.mrf.mxu2  ;;  %v6781_v7 = vor.u32 %v7634_v51, %v6780_v35 }
 0x3ae   : > { %v4380_v58 = vpop.f32.mrf.mxu1  ;;  %v11130_v44 = vpop.f32.mrf.mxu0 }
 0x3af   : > { %v4400_v43 = vadd.f32 %v10891_v33, %v4380_v58  ;;  %4826 = vmatpush.bf16.msrb.mxu1 %v6825_v28  ;;  %4905 = vmatpush.bf16.msra.mxu0 %v11627_v30  ;;  %v6736_v33 = vld [vmem:[%s11588_s2 + $0x188] sm:$0xf]  ;;  %v7590_v30 = vld [vmem:[%s11588_s2 + $0xa8] sm:$0xf0] }
 0x3b0   : > { %4962 = vmatpush.bf16.msrb.mxu3 %v8207_v54  ;;  %5019 = vmatpush.bf16.msrb.mxu2 %v8449_v63  ;;  %v6737_v20 = vor.u32 %v7623_v22, %v6736_v33  ;;  %v6692_v63 = vld [vmem:[%s11588_s2 + $0x130] sm:$0xf]  ;;  %v6560_v22 = vld [vmem:[%s11588_s2 + $0x28] sm:$0xf] }
 0x3b1   : > { %v11142_v60 = vadd.f32 %v4418_v41, %v4400_v43  ;;  %v7612_v41 = vld [vmem:[%s11588_s2 + $0x158] sm:$0xf0] }
 0x3b2   : > { %v6693_v2 = vor.u32 %v7612_v41, %v6692_v63 }
 0x3b3   : > { %4827 = vmatpush.bf16.msrb.mxu1 %v6781_v7 }
 0x3b5   : > { %v4494_v13 = vpop.f32.mrf.mxu3  ;;  %v11150_v42 = vpop.f32.mrf.mxu2 }
 0x3b6   : > { %v4383_v57 = vpop.f32.mrf.mxu1  ;;  %v11152_v59 = vpop.f32.mrf.mxu0 }
 0x3b7   : > { %v4403_v54 = vadd.f32 %v10954_v52, %v4383_v57  ;;  %4828 = vmatpush.bf16.msrb.mxu1 %v6737_v20  ;;  %v6648_v52 = vld [vmem:[%s11588_s2 + $0xd8] sm:$0xf] }
 0x3b8   : > { %v6649_v43 = vor.u32 %v7601_v29, %v6648_v52 }
 0x3b9   : > { %4686 = vmatmul.bf16.gmra.mxu1 %v10173_v21  ;;  %4743 = vmatmul.bf16.gmra.mxu0 %v10173_v21  ;;  %v11164_v19 = vadd.f32 %v11083_v53, %v4403_v54 }
 0x3ba   : > { %4800 = vmatmul.bf16.gmra.mxu3 %v10173_v21  ;;  %4857 = vmatmul.bf16.gmra.mxu2 %v10173_v21  ;;  %v6604_v21 = vld [vmem:[%s11588_s2 + $0x80] sm:$0xf] }
 0x3bb   : > { %4829 = vmatpush.bf16.msrb.mxu1 %v6693_v2  ;;  %v6605_v7 = vor.u32 %v7590_v30, %v6604_v21  ;;  %v11193_v2 = vld [vmem:[%s11593_s7] sm:$0xff] }
 0x3bc   : > { %v5107_v30 = vld [vmem:[%s11594_s8] sm:$0xff] }
 0x3bd   : > { %v4497_v28 = vpop.f32.mrf.mxu3  ;;  %v4554_v58 = vpop.f32.mrf.mxu2  ;;  %5113 = vperm.xlu2 %7800, %v5107_v30  }
 0x3be   : > { %v4385_v35 = vpop.f32.mrf.mxu1  ;;  %v4442_v51 = vpop.f32.mrf.mxu0 }
 0x3bf   : > { %v4405_v53 = vadd.f32 %v11027_v17, %v4385_v35  ;;  %4830 = vmatpush.bf16.msrb.mxu1 %v6649_v43  ;;  %v7579_v17 = vld [vmem:[%s11588_s2 + $0x50] sm:$0xf0]  ;;  %v11628_v43 = vld [vmem:[#allocation8_spill] sm:$0xff] }
 0x3c0   : > { %v6561_v54 = vor.u32 %v7579_v17, %v6560_v22  ;;  %v11231_v22 = vld [vmem:[%s11593_s7 + $0x8] sm:$0xff] }
 0x3c1   : > { %v11182_v33 = vadd.f32 %v11098_v46, %v4405_v53 }
 0x3c3   : > { %4831 = vmatpush.bf16.msrb.mxu1 %v6605_v7  ;;  %v11629_v7 = vld [vmem:[#allocation6_spill] sm:$0xff] }
 0x3c5   : > { %v4499_v20 = vpop.f32.mrf.mxu3  ;;  %v4556_v57 = vpop.f32.mrf.mxu2 }
 0x3c6   : > { %v4454_v63 = vpop.f32.mrf.mxu1  ;;  %v4511_v41 = vpop.f32.mrf.mxu0 }
 0x3c7   : > { %v4455_v46 = vadd.f32 %v4454_v63, %v11102_v15  ;;  %v4512_v52 = vadd.f32 %v4511_v41, %v4492_v18  ;;  %4832 = vmatpush.bf16.msrb.mxu1 %v6561_v54 }
 0x3c9   : > { %7238 = vmatmul.msk.bf16.vlgmr.msra.gmra.mxu1 %vm4214_vm2, %v10380_v37  ;;  %7240 = vmatmul.msk.bf16.vlgmr.msrb.gmra.mxu0 %vm4214_vm2, %v10380_v37  ;;  %v11201_v29 = vadd.f32 %v11064_v10, %v4455_v46 }
 0x3ca   : > { %7242 = vmatmul.msk.bf16.vlgmr.msra.gmra.mxu3 %vm4214_vm2, %v10380_v37  ;;  %7256 = vmatmul.msk.bf16.vlgmr.msra.gmra.mxu2 %vm2899_vm0, %v11193_v2 }
 0x3cb   : > { %4923 = vmatpush.bf16.msra.mxu1 %v11628_v43  ;;  %4980 = vmatpush.bf16.msrb.mxu0 %v8554_v1 }
 0x3cc   : > { %5037 = vmatpush.bf16.msra.mxu3 %v11623_v5  ;;  %5094 = vmatpush.bf16.msra.mxu2 %v11625_v55 }
 0x3cd   : > { %v4568_v15 = vpop.f32.mrf.mxu3  ;;  %v11211_v18 = vpop.f32.mrf.mxu2 }
 0x3ce   : > { %v4569_v10 = vadd.f32 %v4568_v15, %v11128_v62  ;;  %v4456_v35 = vpop.f32.mrf.mxu1  ;;  %v4513_v53 = vpop.f32.mrf.mxu0 }
 0x3cf   : > { %v4457_v37 = vadd.f32 %v4456_v35, %v11130_v44  ;;  %v4514_v21 = vadd.f32 %v4513_v53, %v4494_v13  ;;  %4924 = vmatpush.bf16.msra.mxu1 %v11629_v7  ;;  %4981 = vmatpush.bf16.msrb.mxu0 %v8438_v56 }
 0x3d0   : > { %5038 = vmatpush.bf16.msra.mxu3 %v8451_v0  ;;  %5095 = vmatpush.bf16.msra.mxu2 %v11624_v40 }
 0x3d1   : > { %v11223_v1 = vadd.f32 %v11071_v8, %v4457_v37  ;;  %v5108_v8 = vld [vmem:[%s11594_s8 + $0x8] sm:$0xff] }
 0x3d2   : > { %5118 = vperm.xlu2 %7800, %v5108_v8  }
 0x3d5   : > { %v4570_v5 = vpop.f32.mrf.mxu3  ;;  %v11225_v55 = vpop.f32.mrf.mxu2 }
 0x3d6   : > { %v4571_v62 = vadd.f32 %v4570_v5, %v11150_v42  ;;  %v4459_v44 = vpop.f32.mrf.mxu1  ;;  %v4516_v13 = vpop.f32.mrf.mxu0 }
 0x3d7   : > { %v4460_v56 = vadd.f32 %v4459_v44, %v11152_v59  ;;  %v4517_v0 = vadd.f32 %v4516_v13, %v4497_v28 }
 0x3d9   : > { %7239 = vmatmul.msk.bf16.gmra.mxu1 %vm4214_vm2, %v10486_v9  ;;  %7241 = vmatmul.msk.bf16.gmra.mxu0 %vm4214_vm2, %v10486_v9  ;;  %v11239_v40 = vadd.f32 %v11085_v50, %v4460_v56 }
 0x3da   : > { %7243 = vmatmul.msk.bf16.gmra.mxu3 %vm4214_vm2, %v10486_v9  ;;  %7257 = vmatmul.msk.bf16.gmra.mxu2 %vm2899_vm0, %v11231_v22 }
 0x3dd   : > { %v4573_v42 = vpop.f32.mrf.mxu3  ;;  %v11248_v59 = vpop.f32.mrf.mxu2 }
 0x3de   : > { %v4574_v28 = vadd.f32 %v4573_v42, %v4554_v58  ;;  %v4461_v17 = vpop.f32.mrf.mxu1  ;;  %v4518_v54 = vpop.f32.mrf.mxu0 }
 0x3df   : > { %v4462_v63 = vadd.f32 %v4461_v17, %v4442_v51  ;;  %v4519_v50 = vadd.f32 %v4518_v54, %v4499_v20  ;;  %v11636_v54 = vld [vmem:[#allocation14_spill] sm:$0xff] }
 0x3e1   : > { %v11251_v41 = vadd.f32 %v11100_v61, %v4462_v63 }
 0x3e5   : > { %v4575_v9 = vpop.f32.mrf.mxu3  ;;  %v11253_v46 = vpop.f32.mrf.mxu2 }
 0x3e6   : > { %v4576_v43 = vadd.f32 %v4575_v9, %v4556_v57  ;;  %v4530_v15 = vpop.f32.mrf.mxu1  ;;  %v4587_v35 = vpop.f32.mrf.mxu0 }
 0x3e7   : > { %v11255_v53 = vadd.f32 %v4530_v15, %v4512_v52  ;;  %v11257_v37 = vadd.f32 %v4587_v35, %v4569_v10  ;;  %v11632_v52 = vld [vmem:[#allocation10_spill] sm:$0xff]  ;;  %v11637_v15 = vld [vmem:[#allocation12_spill] sm:$0xff] }
 0x3e9   : > { %11630 = vst [vmem:[#allocation9_spill] sm:$0xff] %v11257_v37  ;;  %4833 = vmatmul.bf16.vlgmr.msrb.gmra.mxu1 %v10142_v34  ;;  %7252 = vmatmul.msk.bf16.vlgmr.msra.gmra.mxu0 %vm2899_vm0, %v11193_v2 }
 0x3ea   : > { %7258 = vmatmul.msk.bf16.vlgmr.msrb.gmra.mxu3 %vm2899_vm0, %v11193_v2  ;;  %7264 = vmatmul.msk.bf16.vlgmr.msrb.gmra.mxu2 %vm2899_vm0, %v11193_v2 }
 0x3eb   : > { %4999 = vmatpush.bf16.msrb.mxu1 %v8575_v11  ;;  %5056 = vmatpush.bf16.msra.mxu0 %v8780_v24 }
 0x3ed   : > { %v4644_v61 = vpop.f32.mrf.mxu3  ;;  %v11268_v58 = vpop.f32.mrf.mxu2 }
 0x3ee   : > { %v4532_v51 = vpop.f32.mrf.mxu1  ;;  %v4589_v20 = vpop.f32.mrf.mxu0 }
 0x3ef   : > { %v11270_v57 = vadd.f32 %v4532_v51, %v4514_v21  ;;  %v11272_v34 = vadd.f32 %v4589_v20, %v4571_v62  ;;  %5000 = vmatpush.bf16.msrb.mxu1 %v8459_v3  ;;  %5057 = vmatpush.bf16.msra.mxu0 %v11632_v52 }
 0x3f1   : > { %11631 = vst [vmem:[#allocation11_spill] sm:$0xff] %v11272_v34 }
 0x3f5   : > { %v4646_v10 = vpop.f32.mrf.mxu3  ;;  %v11276_v30 = vpop.f32.mrf.mxu2 }
 0x3f6   : > { %v4535_v7 = vpop.f32.mrf.mxu1  ;;  %v4592_v11 = vpop.f32.mrf.mxu0 }
 0x3f7   : > { %v11278_v5 = vadd.f32 %v4535_v7, %v4517_v0  ;;  %v11280_v24 = vadd.f32 %v4592_v11, %v4574_v28 }
 0x3f9   : > { %11633 = vst [vmem:[#allocation13_spill] sm:$0xff] %v11280_v24  ;;  %4838 = vmatmul.bf16.gmra.mxu1 %v10164_v38  ;;  %7253 = vmatmul.msk.bf16.gmra.mxu0 %vm2899_vm0, %v11231_v22 }
 0x3fa   : > { %7259 = vmatmul.msk.bf16.gmra.mxu3 %vm2899_vm0, %v11231_v22  ;;  %7265 = vmatmul.msk.bf16.gmra.mxu2 %vm2899_vm0, %v11231_v22 }
 0x3fd   : > { %v4649_v3 = vpop.f32.mrf.mxu3  ;;  %v11289_v21 = vpop.f32.mrf.mxu2 }
 0x3fe   : > { %v4537_v62 = vpop.f32.mrf.mxu1  ;;  %v4594_v44 = vpop.f32.mrf.mxu0 }
 0x3ff   : > { %v11291_v13 = vadd.f32 %v4537_v62, %v4519_v50  ;;  %v11293_v56 = vadd.f32 %v4594_v44, %v4576_v43 }
 0x401   : > { %11634 = vst [vmem:[#allocation7_spill] sm:$0xff] %v11291_v13 }
 0x402   : > { %11635 = vst [vmem:[#allocation5_spill] sm:$0xff] %v11293_v56 }
 0x405   : > { %v4651_v0 = vpop.f32.mrf.mxu3  ;;  %v11295_v38 = vpop.f32.mrf.mxu2 }
 0x406   : > { %v4606_v8 = vpop.f32.mrf.mxu1  ;;  %v4663_v42 = vpop.f32.mrf.mxu0 }
 0x407   : > { %v4626_v28 = vadd.f32 %v11211_v18, %v4606_v8 }
 0x409   : > { %7254 = vmatmul.msk.bf16.vlgmr.msra.gmra.mxu1 %vm2899_vm0, %v11193_v2  ;;  %7260 = vmatmul.msk.bf16.vlgmr.msrb.gmra.mxu0 %vm2899_vm0, %v11193_v2  ;;  %v11302_v17 = vadd.f32 %v4644_v61, %v4626_v28 }
 0x40a   : > { %7266 = vmatmul.msk.bf16.vlgmr.msra.gmra.mxu3 %vm2899_vm0, %v11193_v2  ;;  %7272 = vmatmul.msk.bf16.vlgmr.msra.gmra.mxu2 %vm2899_vm0, %v11193_v2 }
 0x40b   : > { %5075 = vmatpush.bf16.msra.mxu1 %v11636_v54 }
 0x40d   : > { %v4720_v63 = vpop.f32.mrf.mxu3  ;;  %v4777_v50 = vpop.f32.mrf.mxu2 }
 0x40e   : > { %v4608_v9 = vpop.f32.mrf.mxu1  ;;  %v4665_v18 = vpop.f32.mrf.mxu0 }
 0x40f   : > { %v4628_v43 = vadd.f32 %v11225_v55, %v4608_v9  ;;  %5076 = vmatpush.bf16.msra.mxu1 %v11637_v15 }
 0x411   : > { %v11311_v35 = vadd.f32 %v4646_v10, %v4628_v43 }
 0x415   : > { %v4722_v61 = vpop.f32.mrf.mxu3  ;;  %v4779_v51 = vpop.f32.mrf.mxu2 }
 0x416   : > { %v4611_v20 = vpop.f32.mrf.mxu1  ;;  %v4668_v52 = vpop.f32.mrf.mxu0 }
 0x417   : > { %v4631_v7 = vadd.f32 %v11248_v59, %v4611_v20 }
 0x419   : > { %7255 = vmatmul.msk.bf16.gmra.mxu1 %vm2899_vm0, %v11231_v22  ;;  %7261 = vmatmul.msk.bf16.gmra.mxu0 %vm2899_vm0, %v11231_v22  ;;  %v11318_v11 = vadd.f32 %v4649_v3, %v4631_v7 }
 0x41a   : > { %7267 = vmatmul.msk.bf16.gmra.mxu3 %vm2899_vm0, %v11231_v22  ;;  %7273 = vmatmul.msk.bf16.gmra.mxu2 %vm2899_vm0, %v11231_v22 }
 0x41d   : > { %v4725_v55 = vpop.f32.mrf.mxu3  ;;  %v4782_v10 = vpop.f32.mrf.mxu2 }
 0x41e   : > { %v4613_v62 = vpop.f32.mrf.mxu1  ;;  %v4670_v44 = vpop.f32.mrf.mxu0 }
 0x41f   : > { %v4633_v59 = vadd.f32 %v11253_v46, %v4613_v62 }
 0x421   : > { %v11325_v8 = vadd.f32 %v4651_v0, %v4633_v59 }
 0x425   : > { %v4727_v28 = vpop.f32.mrf.mxu3  ;;  %v4784_v54 = vpop.f32.mrf.mxu2 }
 0x426   : > { %v4682_v9 = vpop.f32.mrf.mxu1  ;;  %v4739_v43 = vpop.f32.mrf.mxu0 }
 0x427   : > { %v4683_v3 = vadd.f32 %v4682_v9, %v4663_v42  ;;  %v4740_v15 = vadd.f32 %v4739_v43, %v4720_v63 }
 0x429   : > { %7262 = vmatmul.msk.bf16.vlgmr.msrb.gmra.mxu1 %vm2899_vm0, %v11193_v2  ;;  %7268 = vmatmul.msk.bf16.vlgmr.msra.gmra.mxu0 %vm2899_vm0, %v11193_v2  ;;  %v11332_v20 = vadd.f32 %v11268_v58, %v4683_v3 }
 0x42d   : > { %v4796_v7 = vpop.f32.mrf.mxu3  ;;  %v11334_v56 = vpop.f32.mrf.mxu2 }
 0x42e   : > { %v4797_v46 = vadd.f32 %v4796_v7, %v4777_v50  ;;  %v4684_v0 = vpop.f32.mrf.mxu1  ;;  %v4741_v62 = vpop.f32.mrf.mxu0 }
 0x42f   : > { %v4685_v59 = vadd.f32 %v4684_v0, %v4665_v18  ;;  %v4742_v24 = vadd.f32 %v4741_v62, %v4722_v61 }
 0x431   : > { %v11337_v42 = vadd.f32 %v11276_v30, %v4685_v59 }
 0x435   : > { %v4798_v63 = vpop.f32.mrf.mxu3  ;;  %v11339_v9 = vpop.f32.mrf.mxu2 }
 0x436   : > { %v4799_v43 = vadd.f32 %v4798_v63, %v4779_v51  ;;  %v4687_v34 = vpop.f32.mrf.mxu1  ;;  %v4744_v37 = vpop.f32.mrf.mxu0 }
 0x437   : > { %v4688_v13 = vadd.f32 %v4687_v34, %v4668_v52  ;;  %v4745_v58 = vadd.f32 %v4744_v37, %v4725_v55 }
 0x439   : > { %7263 = vmatmul.msk.bf16.gmra.mxu1 %vm2899_vm0, %v11231_v22  ;;  %7269 = vmatmul.msk.bf16.gmra.mxu0 %vm2899_vm0, %v11231_v22  ;;  %v11346_v50 = vadd.f32 %v11289_v21, %v4688_v13 }
 0x43d   : > { %v4801_v18 = vpop.f32.mrf.mxu3  ;;  %v11348_v30 = vpop.f32.mrf.mxu2 }
 0x43e   : > { %v4802_v61 = vadd.f32 %v4801_v18, %v4782_v10  ;;  %v4689_v3 = vpop.f32.mrf.mxu1  ;;  %v4746_v51 = vpop.f32.mrf.mxu0 }
 0x43f   : > { %v4690_v7 = vadd.f32 %v4689_v3, %v4670_v44  ;;  %v4747_v34 = vadd.f32 %v4746_v51, %v4727_v28  ;;  %v11361_v10 = vpop.permute.xlu2 %5113 }
 0x441   : > { %v11351_v37 = vadd.f32 %v11295_v38, %v4690_v7 }
 0x445   : > { %v4803_v52 = vpop.f32.mrf.mxu3  ;;  %v11353_v55 = vpop.f32.mrf.mxu2 }
 0x446   : > { %v4804_v0 = vadd.f32 %v4803_v52, %v4784_v54  ;;  %v4758_v62 = vpop.f32.mrf.mxu1  ;;  %v4815_v21 = vpop.f32.mrf.mxu0 }
 0x447   : > { %v11355_v13 = vadd.f32 %v4758_v62, %v4740_v15  ;;  %v11357_v59 = vadd.f32 %v4815_v21, %v4797_v46 }
 0x449   : > { %7270 = vmatmul.msk.bf16.vlgmr.msra.gmra.mxu1 %vm2899_vm0, %v11193_v2  ;;  %v11377_v2 = vpop.permute.xlu2 %5118 }
 0x44d   : > { %v11364_v44 = vpop.f32.mrf.mxu3  ;;  %v4945_v38 = vpop.f32.mrf.mxu2 }
 0x44e   : > { %v4946_v28 = vadd.f32 %v4945_v38, %v11115_v31  ;;  %v4760_v54 = vpop.f32.mrf.mxu1  ;;  %v4817_v63 = vpop.f32.mrf.mxu0 }
 0x44f   : > { %v11369_v18 = vadd.f32 %v4760_v54, %v4742_v24  ;;  %v11371_v15 = vadd.f32 %v4817_v63, %v4799_v43 }
 0x450   : > { %v5133_v46 = vadd.f32 %v11361_v10, %v4946_v28 }
 0x452   : > { %v5177_v3 = vmax.f32 %v5133_v46, 0.0 }
 0x454   : > { %5221 = vst [vmem:[%s11374_s29 + $0x10] sm:$0xff] %v5177_v3  ;;  %v11393_v3 = vpop.permute.xlu0 %5123 }
 0x455   : > { %v11379_v51 = vpop.f32.mrf.mxu3  ;;  %v4947_v7 = vpop.f32.mrf.mxu2 }
 0x456   : > { %v4948_v31 = vadd.f32 %v4947_v7, %v11142_v60  ;;  %v4763_v52 = vpop.f32.mrf.mxu1  ;;  %v4820_v24 = vpop.f32.mrf.mxu0 }
 0x457   : > { %v11382_v62 = vadd.f32 %v4763_v52, %v4745_v58  ;;  %v11384_v43 = vadd.f32 %v4820_v24, %v4802_v61 }
 0x458   : > { %v5144_v21 = vadd.f32 %v11377_v2, %v4948_v31 }
 0x459   : > { %7271 = vmatmul.msk.bf16.gmra.mxu1 %vm2899_vm0, %v11231_v22 }
 0x45a   : > { %v5188_v38 = vmax.f32 %v5144_v21, 0.0 }
 0x45c   : > { %5232 = vst [vmem:[%s11374_s29 + $0x68] sm:$0xff] %v5188_v38  ;;  %v11406_v38 = vpop.permute.xlu1 %5128 }
 0x45d   : > { %v11390_v28 = vpop.f32.mrf.mxu3  ;;  %v4950_v54 = vpop.f32.mrf.mxu2 }
 0x45e   : > { %v4951_v63 = vadd.f32 %v4950_v54, %v11164_v19  ;;  %v4765_v60 = vpop.f32.mrf.mxu1  ;;  %v4822_v46 = vpop.f32.mrf.mxu0 }
 0x45f   : > { %v11395_v58 = vadd.f32 %v4765_v60, %v4747_v34  ;;  %v11397_v61 = vadd.f32 %v4822_v46, %v4804_v0  ;;  %v4286_v60 = vadd.f32 %v10689_v27, %v10596_v48 }
 0x460   : > { %v5155_v7 = vadd.f32 %v11393_v3, %v4951_v63 }
 0x462   : > { %v5199_v31 = vmax.f32 %v5155_v7, 0.0 }
 0x464   : > { %5243 = vst [vmem:[%s11374_s29 + $0xc0] sm:$0xff] %v5199_v31 }
 0x465   : > { %v11401_v22 = vpop.f32.mrf.mxu3  ;;  %v4952_v52 = vpop.f32.mrf.mxu2 }
 0x466   : > { %v4953_v24 = vadd.f32 %v4952_v52, %v11182_v33  ;;  %v11404_v19 = vpop.f32.mrf.mxu1  ;;  %v4907_v21 = vpop.f32.mrf.mxu0  ;;  %v4305_v33 = vadd.f32 %v11066_v49, %v4286_v60 }
 0x467   : > { %v4908_v34 = vadd.f32 %v4907_v21, %v11054_v39 }
 0x468   : > { %v5166_v0 = vadd.f32 %v11406_v38, %v4953_v24 }
 0x469   : > { %v5131_v54 = vadd.f32 %v11361_v10, %v4908_v34 }
 0x46a   : > { %v5210_v63 = vmax.f32 %v5166_v0, 0.0 }
 0x46b   : > { %v5175_v46 = vmax.f32 %v5131_v54, 0.0 }
 0x46c   : > { %5254 = vst [vmem:[%s11374_s29 + $0x118] sm:$0xff] %v5210_v63 }
 0x46d   : > { %5219 = vst [vmem:[%s11374_s29] sm:$0xff] %v5175_v46  ;;  %v4964_v7 = vpop.f32.mrf.mxu3  ;;  %v5021_v31 = vpop.f32.mrf.mxu2 }
 0x46e   : > { %v4965_v39 = vadd.f32 %v4964_v7, %v11201_v29  ;;  %v5022_v52 = vadd.f32 %v5021_v31, %v11302_v17  ;;  %v11418_v24 = vpop.f32.mrf.mxu1  ;;  %v4909_v21 = vpop.f32.mrf.mxu0 }
 0x46f   : > { %v4910_v34 = vadd.f32 %v4909_v21, %v4305_v33 }
 0x470   : > { %v5134_v48 = vadd.f32 %v11361_v10, %v4965_v39  ;;  %v5137_v27 = vadd.f32 %v11361_v10, %v5022_v52 }
 0x471   : > { %v5142_v0 = vadd.f32 %v11377_v2, %v4910_v34 }
 0x472   : > { %v5178_v49 = vmax.f32 %v5134_v48, 0.0  ;;  %v5181_v54 = vmax.f32 %v5137_v27, 0.0  ;;  %v4291_v27 = vadd.f32 %v10975_v25, %v10614_v47 }
 0x473   : > { %v5186_v63 = vmax.f32 %v5142_v0, 0.0 }
 0x474   : > { %5222 = vst [vmem:[%s11374_s29 + $0x18] sm:$0xff] %v5178_v49 }
 0x475   : > { %5225 = vst [vmem:[%s11374_s29 + $0x30] sm:$0xff] %v5181_v54  ;;  %v4966_v60 = vpop.f32.mrf.mxu3  ;;  %v5023_v29 = vpop.f32.mrf.mxu2 }
 0x476   : > { %5230 = vst [vmem:[%s11374_s29 + $0x58] sm:$0xff] %v5186_v63  ;;  %v4967_v17 = vadd.f32 %v4966_v60, %v11223_v1  ;;  %v5024_v46 = vadd.f32 %v5023_v29, %v11311_v35  ;;  %v11428_v33 = vpop.f32.mrf.mxu1  ;;  %v4912_v7 = vpop.f32.mrf.mxu0  ;;  %v4310_v35 = vadd.f32 %v11087_v6, %v4291_v27  ;;  %v4854_v27 = vadd.f32 %v11334_v56, %v11404_v19 }
 0x477   : > { %v4913_v31 = vadd.f32 %v4912_v7, %v11074_v26 }
 0x478   : > { %v5145_v39 = vadd.f32 %v11377_v2, %v4967_v17  ;;  %v5148_v52 = vadd.f32 %v11377_v2, %v5024_v46  ;;  %v4873_v56 = vadd.f32 %v11364_v44, %v4854_v27  ;;  %v4856_v44 = vadd.f32 %v11339_v9, %v11418_v24 }
 0x479   : > { %v5153_v21 = vadd.f32 %v11393_v3, %v4913_v31 }
 0x47a   : > { %v5189_v34 = vmax.f32 %v5145_v39, 0.0  ;;  %v5192_v48 = vmax.f32 %v5148_v52, 0.0 }
 0x47b   : > { %v5197_v1 = vmax.f32 %v5153_v21, 0.0 }
 0x47c   : > { %5233 = vst [vmem:[%s11374_s29 + $0x70] sm:$0xff] %v5189_v34 }
 0x47d   : > { %5236 = vst [vmem:[%s11374_s29 + $0x88] sm:$0xff] %v5192_v48  ;;  %v4969_v0 = vpop.f32.mrf.mxu3  ;;  %v5026_v26 = vpop.f32.mrf.mxu2 }
 0x47e   : > { %5241 = vst [vmem:[%s11374_s29 + $0xb0] sm:$0xff] %v5197_v1  ;;  %v4970_v49 = vadd.f32 %v4969_v0, %v11239_v40  ;;  %v5027_v54 = vadd.f32 %v5026_v26, %v11318_v11  ;;  %v11442_v63 = vpop.f32.mrf.mxu1  ;;  %v4914_v60 = vpop.f32.mrf.mxu0 }
 0x47f   : > { %v4915_v29 = vadd.f32 %v4914_v60, %v4310_v35 }
 0x480   : > { %v5156_v47 = vadd.f32 %v11393_v3, %v4970_v49  ;;  %v5159_v25 = vadd.f32 %v11393_v3, %v5027_v54 }
 0x481   : > { %v5164_v6 = vadd.f32 %v11406_v38, %v4915_v29 }
 0x482   : > { %v5200_v17 = vmax.f32 %v5156_v47, 0.0  ;;  %v5203_v46 = vmax.f32 %v5159_v25, 0.0 }
 0x483   : > { %v5208_v7 = vmax.f32 %v5164_v6, 0.0 }
 0x484   : > { %5244 = vst [vmem:[%s11374_s29 + $0xc8] sm:$0xff] %v5200_v17 }
 0x485   : > { %5247 = vst [vmem:[%s11374_s29 + $0xe0] sm:$0xff] %v5203_v46  ;;  %v4971_v31 = vpop.f32.mrf.mxu3  ;;  %v5028_v39 = vpop.f32.mrf.mxu2 }
 0x486   : > { %5252 = vst [vmem:[%s11374_s29 + $0x108] sm:$0xff] %v5208_v7  ;;  %v4972_v40 = vadd.f32 %v4971_v31, %v11251_v41  ;;  %v5029_v11 = vadd.f32 %v5028_v39, %v11325_v8  ;;  %v4926_v52 = vpop.f32.mrf.mxu1  ;;  %v4983_v21 = vpop.f32.mrf.mxu0 }
 0x487   : > { %v4927_v34 = vadd.f32 %v4926_v52, %v11057_v23  ;;  %v4984_v48 = vadd.f32 %v4983_v21, %v11255_v53  ;;  %v4343_v23 = vadd.f32 %v10724_v32, %v10616_v4 }
 0x488   : > { %v5167_v1 = vadd.f32 %v11406_v38, %v4972_v40  ;;  %v5170_v35 = vadd.f32 %v11406_v38, %v5029_v11  ;;  %v4875_v11 = vadd.f32 %v11379_v51, %v4856_v44 }
 0x489   : > { %v5132_v41 = vadd.f32 %v11361_v10, %v4927_v34  ;;  %v5135_v0 = vadd.f32 %v11361_v10, %v4984_v48  ;;  %v4362_v19 = vadd.f32 %v11068_v12, %v4343_v23 }
 0x48a   : > { %v5211_v8 = vmax.f32 %v5167_v1, 0.0  ;;  %v5214_v26 = vmax.f32 %v5170_v35, 0.0  ;;  %v4859_v1 = vadd.f32 %v11348_v30, %v11428_v33 }
 0x48b   : > { %v5176_v49 = vmax.f32 %v5132_v41, 0.0  ;;  %v5179_v53 = vmax.f32 %v5135_v0, 0.0 }
 0x48c   : > { %5255 = vst [vmem:[%s11374_s29 + $0x120] sm:$0xff] %v5211_v8  ;;  %v4878_v30 = vadd.f32 %v11390_v28, %v4859_v1  ;;  %v4861_v28 = vadd.f32 %v11353_v55, %v11442_v63 }
 0x48d   : > { %5258 = vst [vmem:[%s11374_s29 + $0x138] sm:$0xff] %v5214_v26  ;;  %v5040_v54 = vpop.f32.mrf.mxu3  ;;  %v5097_v60 = vpop.f32.mrf.mxu2 }
 0x48e   : > { %5220 = vst [vmem:[%s11374_s29 + $0x8] sm:$0xff] %v5176_v49  ;;  %v5041_v29 = vadd.f32 %v5040_v54, %v11332_v20  ;;  %v5098_v47 = vadd.f32 %v5097_v60, %v4873_v56  ;;  %v4928_v25 = vpop.f32.mrf.mxu1  ;;  %v4985_v6 = vpop.f32.mrf.mxu0  ;;  %v4880_v44 = vadd.f32 %v11401_v22, %v4861_v28 }
 0x48f   : > { %5223 = vst [vmem:[%s11374_s29 + $0x20] sm:$0xff] %v5179_v53  ;;  %v4929_v4 = vadd.f32 %v4928_v25, %v4362_v19  ;;  %v4986_v32 = vadd.f32 %v4985_v6, %v11270_v57 }
 0x490   : > { %v5138_v12 = vadd.f32 %v11361_v10, %v5041_v29  ;;  %v5141_v17 = vadd.f32 %v11361_v10, %v5098_v47 }
 0x491   : > { %v5143_v46 = vadd.f32 %v11377_v2, %v4929_v4  ;;  %v5146_v20 = vadd.f32 %v11377_v2, %v4986_v32 }
 0x492   : > { %v5182_v7 = vmax.f32 %v5138_v12, 0.0  ;;  %v5185_v31 = vmax.f32 %v5141_v17, 0.0 }
 0x493   : > { %v5187_v39 = vmax.f32 %v5143_v46, 0.0  ;;  %v5190_v40 = vmax.f32 %v5146_v20, 0.0 }
 0x494   : > { %5226 = vst [vmem:[%s11374_s29 + $0x38] sm:$0xff] %v5182_v7  ;;  %v11639_v7 = vld [vmem:[#allocation9_spill] sm:$0xff] }
 0x495   : > { %5229 = vst [vmem:[%s11374_s29 + $0x50] sm:$0xff] %v5185_v31  ;;  %v5042_v57 = vpop.f32.mrf.mxu3  ;;  %v5099_v52 = vpop.f32.mrf.mxu2 }
 0x496   : > { %5231 = vst [vmem:[%s11374_s29 + $0x60] sm:$0xff] %v5187_v39  ;;  %v5043_v9 = vadd.f32 %v5042_v57, %v11337_v42  ;;  %v5100_v24 = vadd.f32 %v5099_v52, %v4875_v11  ;;  %v4931_v21 = vpop.f32.mrf.mxu1  ;;  %v4988_v34 = vpop.f32.mrf.mxu0 }
 0x497   : > { %5234 = vst [vmem:[%s11374_s29 + $0x78] sm:$0xff] %v5190_v40  ;;  %v4932_v48 = vadd.f32 %v4931_v21, %v11077_v14  ;;  %v4989_v27 = vadd.f32 %v4988_v34, %v11278_v5  ;;  %v4348_v14 = vadd.f32 %v11025_v16, %v10760_v45  ;;  %v11638_v16 = vld [vmem:[#allocation7_spill] sm:$0xff] }
 0x498   : > { %v5149_v51 = vadd.f32 %v11377_v2, %v5043_v9  ;;  %v5152_v35 = vadd.f32 %v11377_v2, %v5100_v24 }
 0x499   : > { %v5154_v42 = vadd.f32 %v11393_v3, %v4932_v48  ;;  %v5157_v41 = vadd.f32 %v11393_v3, %v4989_v27  ;;  %v4367_v33 = vadd.f32 %v11089_v36, %v4348_v14 }
 0x49a   : > { %v5193_v0 = vmax.f32 %v5149_v51, 0.0  ;;  %v5196_v8 = vmax.f32 %v5152_v35, 0.0 }
 0x49b   : > { %v5198_v26 = vmax.f32 %v5154_v42, 0.0  ;;  %v5201_v5 = vmax.f32 %v5157_v41, 0.0 }
 0x49c   : > { %5237 = vst [vmem:[%s11374_s29 + $0x90] sm:$0xff] %v5193_v0 }
 0x49d   : > { %5240 = vst [vmem:[%s11374_s29 + $0xa8] sm:$0xff] %v5196_v8  ;;  %v5045_v23 = vpop.f32.mrf.mxu3  ;;  %v5102_v49 = vpop.f32.mrf.mxu2  ;;  %v11641_v8 = vld [vmem:[#allocation13_spill] sm:$0xff] }
 0x49e   : > { %5242 = vst [vmem:[%s11374_s29 + $0xb8] sm:$0xff] %v5198_v26  ;;  %v5046_v53 = vadd.f32 %v5045_v23, %v11346_v50  ;;  %v5103_v56 = vadd.f32 %v5102_v49, %v4878_v30  ;;  %v4933_v19 = vpop.f32.mrf.mxu1  ;;  %v4990_v54 = vpop.f32.mrf.mxu0 }
 0x49f   : > { %5245 = vst [vmem:[%s11374_s29 + $0xd0] sm:$0xff] %v5201_v5  ;;  %v4934_v45 = vadd.f32 %v4933_v19, %v4367_v33  ;;  %v4991_v60 = vadd.f32 %v4990_v54, %v11638_v16 }
 0x4a0   : > { %v5160_v36 = vadd.f32 %v11393_v3, %v5046_v53  ;;  %v5163_v29 = vadd.f32 %v11393_v3, %v5103_v56  ;;  %v11642_v53 = vld [vmem:[#allocation5_spill] sm:$0xff] }
 0x4a1   : > { %v5165_v47 = vadd.f32 %v11406_v38, %v4934_v45  ;;  %v5168_v50 = vadd.f32 %v11406_v38, %v4991_v60 }
 0x4a2   : > { %v5204_v25 = vmax.f32 %v5160_v36, 0.0  ;;  %v5207_v6 = vmax.f32 %v5163_v29, 0.0 }
 0x4a3   : > { %v5209_v4 = vmax.f32 %v5165_v47, 0.0  ;;  %v5212_v32 = vmax.f32 %v5168_v50, 0.0 }
 0x4a4   : > { %5248 = vst [vmem:[%s11374_s29 + $0xe8] sm:$0xff] %v5204_v25 }
 0x4a5   : > { %5251 = vst [vmem:[%s11374_s29 + $0x100] sm:$0xff] %v5207_v6  ;;  %v5047_v12 = vpop.f32.mrf.mxu3  ;;  %v5104_v17 = vpop.f32.mrf.mxu2 }
 0x4a6   : > { %5253 = vst [vmem:[%s11374_s29 + $0x110] sm:$0xff] %v5209_v4  ;;  %v5048_v55 = vadd.f32 %v5047_v12, %v11351_v37  ;;  %v5105_v63 = vadd.f32 %v5104_v17, %v4880_v44  ;;  %v5002_v46 = vpop.f32.mrf.mxu1  ;;  %v5059_v20 = vpop.f32.mrf.mxu0 }
 0x4a7   : > { %5256 = vst [vmem:[%s11374_s29 + $0x128] sm:$0xff] %v5212_v32  ;;  %v5003_v31 = vadd.f32 %v5002_v46, %v11639_v7  ;;  %v5060_v39 = vadd.f32 %v5059_v20, %v11355_v13  ;;  %v11640_v13 = vld [vmem:[#allocation11_spill] sm:$0xff] }
 0x4a8   : > { %v5171_v22 = vadd.f32 %v11406_v38, %v5048_v55  ;;  %v5174_v40 = vadd.f32 %v11406_v38, %v5105_v63 }
 0x4a9   : > { %v5136_v11 = vadd.f32 %v11361_v10, %v5003_v31  ;;  %v5139_v57 = vadd.f32 %v11361_v10, %v5060_v39 }
 0x4aa   : > { %v5215_v37 = vmax.f32 %v5171_v22, 0.0  ;;  %v5218_v52 = vmax.f32 %v5174_v40, 0.0 }
 0x4ab   : > { %v5180_v9 = vmax.f32 %v5136_v11, 0.0  ;;  %v5183_v24 = vmax.f32 %v5139_v57, 0.0 }
 0x4ac   : > { %5259 = vst [vmem:[%s11374_s29 + $0x140] sm:$0xff] %v5215_v37 }
 0x4ad   : > { %5262 = vst [vmem:[%s11374_s29 + $0x158] sm:$0xff] %v5218_v52 }
 0x4ae   : > { %5224 = vst [vmem:[%s11374_s29 + $0x28] sm:$0xff] %v5180_v9  ;;  %v5004_v21 = vpop.f32.mrf.mxu1  ;;  %v5061_v34 = vpop.f32.mrf.mxu0 }
 0x4af   : > { %5227 = vst [vmem:[%s11374_s29 + $0x40] sm:$0xff] %v5183_v24  ;;  %v5005_v48 = vadd.f32 %v5004_v21, %v11640_v13  ;;  %v5062_v27 = vadd.f32 %v5061_v34, %v11369_v18 }
 0x4b1   : > { %v5147_v1 = vadd.f32 %v11377_v2, %v5005_v48  ;;  %v5150_v51 = vadd.f32 %v11377_v2, %v5062_v27 }
 0x4b3   : > { %v5191_v35 = vmax.f32 %v5147_v1, 0.0  ;;  %v5194_v42 = vmax.f32 %v5150_v51, 0.0 }
 0x4b5   : > { %5235 = vst [vmem:[%s11374_s29 + $0x80] sm:$0xff] %v5191_v35 }
 0x4b6   : > { %5238 = vst [vmem:[%s11374_s29 + $0x98] sm:$0xff] %v5194_v42  ;;  %v5007_v41 = vpop.f32.mrf.mxu1  ;;  %v5064_v0 = vpop.f32.mrf.mxu0 }
 0x4b7   : > { %v5008_v14 = vadd.f32 %v5007_v41, %v11641_v8  ;;  %v5065_v26 = vadd.f32 %v5064_v0, %v11382_v62 }
 0x4b9   : > { %v5158_v5 = vadd.f32 %v11393_v3, %v5008_v14  ;;  %v5161_v18 = vadd.f32 %v11393_v3, %v5065_v26 }
 0x4bb   : > { %v5202_v30 = vmax.f32 %v5158_v5, 0.0  ;;  %v5205_v33 = vmax.f32 %v5161_v18, 0.0 }
 0x4bd   : > { %5246 = vst [vmem:[%s11374_s29 + $0xd8] sm:$0xff] %v5202_v30 }
 0x4be   : > { %5249 = vst [vmem:[%s11374_s29 + $0xf0] sm:$0xff] %v5205_v33  ;;  %v5009_v23 = vpop.f32.mrf.mxu1  ;;  %v5066_v49 = vpop.f32.mrf.mxu0 }
 0x4bf   : > { %v5010_v56 = vadd.f32 %v5009_v23, %v11642_v53  ;;  %v5067_v19 = vadd.f32 %v5066_v49, %v11395_v58 }
 0x4c1   : > { %v5169_v54 = vadd.f32 %v11406_v38, %v5010_v56  ;;  %v5172_v62 = vadd.f32 %v11406_v38, %v5067_v19 }
 0x4c3   : > { %v5213_v45 = vmax.f32 %v5169_v54, 0.0  ;;  %v5216_v16 = vmax.f32 %v5172_v62, 0.0 }
 0x4c5   : > { %5257 = vst [vmem:[%s11374_s29 + $0x130] sm:$0xff] %v5213_v45 }
 0x4c6   : > { %5260 = vst [vmem:[%s11374_s29 + $0x148] sm:$0xff] %v5216_v16  ;;  %v5078_v60 = vpop.f32.mrf.mxu1 }
 0x4c7   : > { %v5079_v28 = vadd.f32 %v5078_v60, %v11357_v59 }
 0x4c9   : > { %v5140_v36 = vadd.f32 %v11361_v10, %v5079_v28 }
 0x4cb   : > { %v5184_v29 = vmax.f32 %v5140_v36, 0.0 }
 0x4cd   : > { %5228 = vst [vmem:[%s11374_s29 + $0x48] sm:$0xff] %v5184_v29 }
 0x4ce   : > { %v5080_v58 = vpop.f32.mrf.mxu1 }
 0x4cf   : > { %v5081_v47 = vadd.f32 %v5080_v58, %v11371_v15 }
 0x4d1   : > { %v5151_v50 = vadd.f32 %v11377_v2, %v5081_v47 }
 0x4d3   : > { %v5195_v25 = vmax.f32 %v5151_v50, 0.0 }
 0x4d5   : > { %5239 = vst [vmem:[%s11374_s29 + $0xa0] sm:$0xff] %v5195_v25 }
 0x4d6   : > { %v5083_v6 = vpop.f32.mrf.mxu1 }
 0x4d7   : > { %v5084_v4 = vadd.f32 %v5083_v6, %v11384_v43 }
 0x4d9   : > { %v5162_v59 = vadd.f32 %v11393_v3, %v5084_v4 }
 0x4db   : > { %v5206_v32 = vmax.f32 %v5162_v59, 0.0 }
 0x4dd   : > { %5250 = vst [vmem:[%s11374_s29 + $0xf8] sm:$0xff] %v5206_v32 }
 0x4de   : > { %v5085_v10 = vpop.f32.mrf.mxu1 }
 0x4df   : > { %v5086_v15 = vadd.f32 %v5085_v10, %v11397_v61 }
 0x4e1   : > { %v5173_v2 = vadd.f32 %v11406_v38, %v5086_v15 }
 0x4e3   : > { %v5217_v43 = vmax.f32 %v5173_v2, 0.0 }
 0x4e5   : > { %5261 = vst [vmem:[%s11374_s29 + $0x150] sm:$0xff] %v5217_v43 }
 0x4e6   : > { %7828 = shalt.err (!%p7825_p3)
}
 0x4e7   : > { %s7866_s27 = smov 1408   ;;  %s7867_s29 = smov 88  }
 0x4e8   : > { %7756 = dma.vmem_to_hbm [thread:$0]  (%p7956_p5), %s5277_s14, 5632, %s5279_s24, %s5264_s13, %s7866_s27, %s7866_s27, %s7867_s29  }
 0x4e9 PF: > { %p7762_p4 = scmp.ge.s32.totalorder %s7863_s12, 2  ;;  %s5293_s22 = sand.u32 1, %s7851_s30  }
 0x4ea   : > { %s5294_s23 = scalar_lea.sflag [#allocation3], %s5293_s22 }
 0x4eb   : > { %p7759_p7 = pnand %p7762_p4, %p7960_p6 }
 0x4ed   : > { %p7760_p8 = pneg %p7759_p7 }
 0x4ef   : > { %7846 = dma.done.wait (%p7760_p8), %s5294_s23, 5632  }
 0x4f0   : > { %7848 = vsyncadd (%p7760_p8), %s5294_s23, 4294961664  ;;  %p19_p9 = scmp.ge.s32.totalorder %s7943_s15, 4   ;;  %s11643_s30 = smov %s7855_s10 }
 0x4f1   : > { %s11644_s10 = smov %s7859_s11  ;;  %s11645_s11 = smov %s7954_s18 }
 0x4f2   : > { %s11646_s12 = smov %s7943_s15  ;;  %21 = sbr.rel (!%p19_p9) target bundleno = 5 (0x5), region = 91 }
 0x4f7   :  { %5300 = vsyncpa [#allocation3], 1 }
 0x4f8   :  { %5302 = vsyncpa [#allocation3 + $0x1], 1 }

</bundles_post_ra>
